<compile_context>
chip_gen: v7x
topology: tpu7x:2x2x1
jax: 0.10.0
libtpu: 0.0.40
codegen_flags: <defaults>
</compile_context>

<pallas_src>
import functools

import jax
import jax.numpy as jnp
import numpy as np
from jax import lax
from jax.experimental import pallas as pl
from jax.experimental.pallas import tpu as pltpu


# ----------------------------------------------------------------------------
# Host-side constant operators
# ----------------------------------------------------------------------------
def _interp_matrix(n_out, n_in):
    """1-D bilinear interpolation operator (align_corners=True), [n_out, n_in]."""
    A = np.zeros((n_out, n_in), np.float32)
    if n_in == 1:
        A[:, 0] = 1.0
        return A
    for i in range(n_out):
        src = i * (n_in - 1) / (n_out - 1) if n_out > 1 else 0.0
        i0 = min(int(np.floor(src)), n_in - 2)
        w = src - i0
        A[i, i0] = 1.0 - w
        A[i, i0 + 1] = w
    return A


# ----------------------------------------------------------------------------
# Pallas kernel: whole MLF forward for one batch element, layout [C, H*W]
# ----------------------------------------------------------------------------
def _mlf_kernel(x1_ref, x2_ref, x3_ref, up2_ref, up3_ref,
                wc1_ref, wc2_ref, wc3_ref, bc_ref,
                pmask_ref, w2e_ref, b2e_ref, sel2_ref,
                w3e_ref, b3e_ref, sel3_ref,
                wm1_ref, bm1_ref, wm2_ref, bm2_ref,
                wfc_ref, bfc_ref, cmask_ref,
                out_ref, *, H, W):
    f32 = jnp.float32
    HW = H * W

    x1 = x1_ref[0]                       # [C1, HW]
    x2 = x2_ref[0]                       # [C2, hw2]
    x3 = x3_ref[0]                       # [C3, hw3]

    # --- bilinear upsample (align_corners=True) as one lane-dense matmul each
    x2u = jnp.dot(x2, up2_ref[...], preferred_element_type=f32)   # [C2, HW]
    x3u = jnp.dot(x3, up3_ref[...], preferred_element_type=f32)   # [C3, HW]

    # --- conv (1x1, in_channels -> 64) + ReLU; channel-concat folded into
    #     split weights (keeps all sublane offsets 8-aligned in-kernel).
    feat = (jnp.dot(wc1_ref[...], x1, preferred_element_type=f32)
            + jnp.dot(wc2_ref[...], x2u, preferred_element_type=f32)
            + jnp.dot(wc3_ref[...], x3u, preferred_element_type=f32)
            + bc_ref[...])
    feat = jnp.maximum(feat, 0.0)                                  # [64, HW]

    # --- y1: AdaptiveAvgPool2d(1) == global mean over the lane axis
    y1 = jnp.sum(feat, axis=1, keepdims=True) * (1.0 / HW)         # [64, 1]

    # --- AdaptiveMaxPool2d(4): 16 lane reductions using precomputed additive
    #     masks (0 inside the cell, -BIG outside); the 2x2 pool is the max of
    #     the corresponding 4x4 cells (H, W divisible by 4).
    pm = pmask_ref[...]                                            # [16, HW]
    m4 = [jnp.max(feat + pm[t:t + 1, :], axis=1, keepdims=True)
          for t in range(16)]                                      # 16 x [64, 1]
    m2 = [jnp.maximum(jnp.maximum(m4[(2 * P) * 4 + 2 * Q],
                                  m4[(2 * P) * 4 + 2 * Q + 1]),
                      jnp.maximum(m4[(2 * P + 1) * 4 + 2 * Q],
                                  m4[(2 * P + 1) * 4 + 2 * Q + 1]))
          for P in range(2) for Q in range(2)]                     # 4 x [64, 1]
    m4M = jnp.concatenate(m4, axis=1)                              # [64, 16]
    m2M = jnp.concatenate(m2, axis=1)                              # [64, 4]

    # --- y2/y3: row-expanded conv1/conv2 weights -> one batched matmul per
    #     branch; the torch reshape(b, 64, 1, 1) becomes a per-row selection
    #     of the channel's own pooling cell (sel2/sel3 one-hot masks).
    y2all = jnp.maximum(jnp.dot(w2e_ref[...], m2M, preferred_element_type=f32)
                        + b2e_ref[...], 0.0)                       # [64, 4]
    y2 = jnp.sum(y2all * sel2_ref[...], axis=1, keepdims=True)     # [64, 1]
    y3all = jnp.maximum(jnp.dot(w3e_ref[...], m4M, preferred_element_type=f32)
                        + b3e_ref[...], 0.0)                       # [64, 16]
    y3 = jnp.sum(y3all * sel3_ref[...], axis=1, keepdims=True)     # [64, 1]

    # --- z = floor((y1+y2+y3)/3);  attention = sigmoid(mlp(z))   (all f32:
    #     floor is a hard discontinuity, keep this path exact).
    z = jnp.floor((y1 + y2 + y3) / 3.0)                            # [64, 1]
    hmid = jnp.maximum(jnp.dot(wm1_ref[...], z, preferred_element_type=f32)
                       + bm1_ref[...], 0.0)                        # [8, 1]
    att = jax.nn.sigmoid(jnp.dot(wm2_ref[...], hmid, preferred_element_type=f32)
                         + bm2_ref[...])                           # [64, 1]

    a_feat = att * feat                                            # [64, HW]

    # --- feat_conv: 3x3 "same" conv + folded BN + ReLU.  The 9 spatial taps
    #     are lane rolls (+/-1, +/-W, +/-W+/-1 on the flattened lane axis) with
    #     precomputed boundary masks; all 9 shifted copies are stacked along
    #     the contraction axis and hit the MXU as ONE [Cout, 576] x [576, HW]
    #     matmul (BN scale already folded into wfc).
    cm = cmask_ref[...]                                            # [9, HW]
    shifted = []
    k = 0
    for dh in (-1, 0, 1):
        for dw in (-1, 0, 1):
            off = dh * W + dw
            if off == 0:
                shifted.append(a_feat)
            else:
                s = pltpu.roll(a_feat, shift=(-off) % HW, axis=1)
                shifted.append(s * cm[k:k + 1, :])
            k += 1
    stacked = jnp.concatenate(shifted, axis=0)                     # [576, HW]
    out = jnp.dot(wfc_ref[...], stacked, preferred_element_type=f32) + bfc_ref[...]
    out_ref[0] = jnp.maximum(out, 0.0).astype(out_ref.dtype)


# ----------------------------------------------------------------------------
# Wrapper
# ----------------------------------------------------------------------------
def mlf_forward_pallas(x1, x2, x3, params):
    B, C1, H, W = x1.shape
    _, C2, h2, w2 = x2.shape
    _, C3, h3, w3 = x3.shape
    assert 2 * h2 == H and 2 * w2 == W and 4 * h3 == H and 4 * w3 == W
    assert H % 4 == 0 and W % 4 == 0, "adaptive pools assume H, W divisible by 4"
    C = 64
    HW, hw2, hw3 = H * W, h2 * w2, h3 * w3
    Cout = params["w_fc"].shape[0]

    # --- constant operators ---------------------------------------------------
    up2 = jnp.asarray(np.kron(_interp_matrix(H, h2), _interp_matrix(W, w2)).T)  # [hw2, HW]
    up3 = jnp.asarray(np.kron(_interp_matrix(H, h3), _interp_matrix(W, w3)).T)  # [hw3, HW]

    rows = np.arange(HW) // W
    cols = np.arange(HW) % W

    # AdaptiveMaxPool2d(4) additive cell masks: 0 inside cell t, -BIG outside.
    cell4 = (rows // (H // 4)) * 4 + (cols // (W // 4))
    pmask = np.where(cell4[None, :] == np.arange(16)[:, None],
                     0.0, -1e30).astype(np.float32)                # [16, HW]

    # boundary masks for the rolled 3x3-conv activations (zero the pixels that
    # would otherwise wrap across row / image boundaries).
    cmask = np.zeros((9, HW), np.float32)
    k = 0
    for dh in (-1, 0, 1):
        for dw in (-1, 0, 1):
            cmask[k] = ((rows + dh >= 0) & (rows + dh < H)
                        & (cols + dw >= 0) & (cols + dw < W)).astype(np.float32)
            k += 1

    # conv (1x1, in_channels -> 64), split along the concat boundaries
    w_conv = np.asarray(params["w_conv"], np.float32)              # [64, C1+C2+C3]
    assert w_conv.shape[1] == C1 + C2 + C3
    wc1 = w_conv[:, :C1]
    wc2 = w_conv[:, C1:C1 + C2]
    wc3 = w_conv[:, C1 + C2:]
    bc = np.asarray(params["b_conv"], np.float32).reshape(C, 1)

    # conv1/conv2: expand rows so that output row k uses conv channel k//4
    # (resp. k//16); sel2/sel3 pick that row's own pooling cell k%4 (k%16),
    # which is exactly torch's reshape(b, 64, 1, 1).
    w_c1 = np.asarray(params["w_c1"], np.float32)                  # [16, 64]
    b_c1 = np.asarray(params["b_c1"], np.float32)
    w_c2 = np.asarray(params["w_c2"], np.float32)                  # [4, 64]
    b_c2 = np.asarray(params["b_c2"], np.float32)
    kk = np.arange(C)
    w2e = w_c1[kk // 4].astype(np.float32)                         # [64, 64]
    b2e = b_c1[kk // 4].reshape(C, 1).astype(np.float32)
    sel2 = (np.arange(4)[None, :] == (kk % 4)[:, None]).astype(np.float32)    # [64, 4]
    w3e = w_c2[kk // 16].astype(np.float32)                        # [64, 64]
    b3e = b_c2[kk // 16].reshape(C, 1).astype(np.float32)
    sel3 = (np.arange(16)[None, :] == (kk % 16)[:, None]).astype(np.float32)  # [64, 16]

    wm1 = np.asarray(params["w_m1"], np.float32)
    bm1 = np.asarray(params["b_m1"], np.float32).reshape(-1, 1)
    wm2 = np.asarray(params["w_m2"], np.float32)
    bm2 = np.asarray(params["b_m2"], np.float32).reshape(-1, 1)

    # feat_conv: stack the 9 taps along K and fold the (inference) BN scale in.
    w_fc = np.asarray(params["w_fc"], np.float32)                  # [Cout, 64, 3, 3]
    eps = 1e-5
    s = (np.asarray(params["bn_gamma"], np.float32)
         / np.sqrt(np.asarray(params["bn_var"], np.float32) + eps))
    wfc = np.transpose(w_fc, (2, 3, 0, 1)).reshape(9, Cout, C)     # [9, Cout, 64]
    wfc = np.transpose(wfc, (1, 0, 2)).reshape(Cout, 9 * C)        # cols = k*64 + c
    wfc = (wfc * s[:, None]).astype(np.float32)
    bfc = ((np.asarray(params["b_fc"], np.float32) - np.asarray(params["bn_mean"], np.float32)) * s
           + np.asarray(params["bn_beta"], np.float32)).reshape(Cout, 1).astype(np.float32)

    # flatten spatially; kernel layout == flattened NCHW (no transposes) ------
    x1f = x1.reshape(B, C1, HW)
    x2f = x2.reshape(B, C2, hw2)
    x3f = x3.reshape(B, C3, hw3)

    kernel = functools.partial(_mlf_kernel, H=H, W=W)

    def batch_spec(c, n):
        return pl.BlockSpec((1, c, n), lambda b: (b, 0, 0))

    def full(shape):
        rank = len(shape)
        return pl.BlockSpec(shape, lambda b, _r=rank: (0,) * _r)

    matmul_flops = (
        2 * C2 * hw2 * HW + 2 * C3 * hw3 * HW                  # upsampling
        + 2 * C * (C1 + C2 + C3) * HW                          # 1x1 conv
        + 2 * C * C * (4 + 16)                                 # y2/y3 batched
        + 2 * (C // 8) * C + 2 * C * (C // 8)                  # mlp
        + 2 * Cout * (9 * C) * HW                              # stacked 3x3 conv
    )
    const_bytes = 4 * (up2.size + up3.size + pmask.size + cmask.size
                       + w_conv.size + w2e.size + w3e.size + sel2.size + sel3.size
                       + wm1.size + wm2.size + wfc.size + 4 * C + 2 * Cout)
    bytes_accessed = int(4 * (x1f.size + x2f.size + x3f.size + B * Cout * HW)
                         + const_bytes)
    cost = pl.CostEstimate(flops=int(B * matmul_flops),
                           transcendentals=int(B * C),
                           bytes_accessed=bytes_accessed)

    out = pl.pallas_call(
        kernel,
        out_shape=jax.ShapeDtypeStruct((B, Cout, HW), jnp.float32),
        grid=(B,),
        in_specs=[
            batch_spec(C1, HW),                 # x1
            batch_spec(C2, hw2),                # x2
            batch_spec(C3, hw3),                # x3
            full((hw2, HW)),                    # up2
            full((hw3, HW)),                    # up3
            full((C, C1)),                      # wc1
            full((C, C2)),                      # wc2
            full((C, C3)),                      # wc3
            full((C, 1)),                       # bc
            full((16, HW)),                     # pmask
            full((C, C)),                       # w2e
            full((C, 1)),                       # b2e
            full((C, 4)),                       # sel2
            full((C, C)),                       # w3e
            full((C, 1)),                       # b3e
            full((C, 16)),                      # sel3
            full((C // 8, C)),                  # wm1
            full((C // 8, 1)),                  # bm1
            full((C, C // 8)),                  # wm2
            full((C, 1)),                       # bm2
            full((Cout, 9 * C)),                # wfc (BN scale folded)
            full((Cout, 1)),                    # bfc (BN bias folded)
            full((9, HW)),                      # cmask
        ],
        out_specs=pl.BlockSpec((1, Cout, HW), lambda b: (b, 0, 0)),
        compiler_params=pltpu.CompilerParams(dimension_semantics=("parallel",)),
        cost_estimate=cost,
    )(x1f, x2f, x3f, up2, up3,
      jnp.asarray(wc1), jnp.asarray(wc2), jnp.asarray(wc3), jnp.asarray(bc),
      jnp.asarray(pmask),
      jnp.asarray(w2e), jnp.asarray(b2e), jnp.asarray(sel2),
      jnp.asarray(w3e), jnp.asarray(b3e), jnp.asarray(sel3),
      jnp.asarray(wm1), jnp.asarray(bm1), jnp.asarray(wm2), jnp.asarray(bm2),
      jnp.asarray(wfc), jnp.asarray(bfc), jnp.asarray(cmask))

    return out.reshape(B, Cout, H, W)


# ----------------------------------------------------------------------------
# Deterministic parameters + pure-JAX reference
# ----------------------------------------------------------------------------
def make_params(key, in_channels, out_channels):
    C = 64
    ks = jax.random.split(key, 16)

    def w(k, shape):
        return 0.1 * jax.random.normal(k, shape, jnp.float32)

    p = {
        "w_conv": w(ks[0], (C, in_channels)), "b_conv": w(ks[1], (C,)),
        "w_c1": w(ks[2], (C // 4, C)), "b_c1": w(ks[3], (C // 4,)),
        "w_c2": w(ks[4], (C // 16, C)), "b_c2": w(ks[5], (C // 16,)),
        "w_m1": w(ks[6], (C // 8, C)), "b_m1": w(ks[7], (C // 8,)),
        "w_m2": w(ks[8], (C, C // 8)), "b_m2": w(ks[9], (C,)),
        "w_fc": w(ks[10], (out_channels, C, 3, 3)), "b_fc": w(ks[11], (out_channels,)),
        "bn_gamma": jax.random.uniform(ks[12], (out_channels,), jnp.float32, 0.5, 1.5),
        "bn_beta": 0.1 * jax.random.normal(ks[13], (out_channels,), jnp.float32),
        "bn_mean": 0.1 * jax.random.normal(ks[14], (out_channels,), jnp.float32),
        "bn_var": jax.random.uniform(ks[15], (out_channels,), jnp.float32, 0.5, 1.5),
    }
    return p


def mlf_forward_ref(x1, x2, x3, p):
    hp = lax.Precision.HIGHEST
    B, _, H, W = x1.shape
    C = 64
    A_h2 = jnp.asarray(_interp_matrix(H, x2.shape[2]))
    A_w2 = jnp.asarray(_interp_matrix(W, x2.shape[3]))
    A_h3 = jnp.asarray(_interp_matrix(H, x3.shape[2]))
    A_w3 = jnp.asarray(_interp_matrix(W, x3.shape[3]))
    x2u = jnp.einsum("hp,bcpq,wq->bchw", A_h2, x2, A_w2, precision=hp)
    x3u = jnp.einsum("hp,bcpq,wq->bchw", A_h3, x3, A_w3, precision=hp)
    cat = jnp.concatenate([x1, x2u, x3u], axis=1)

    def b4(v):
        return v[None, :, None, None]

    feat = jax.nn.relu(jnp.einsum("oc,bchw->bohw", p["w_conv"], cat, precision=hp)
                       + b4(p["b_conv"]))
    y1 = jnp.mean(feat, axis=(2, 3), keepdims=True)
    m1 = feat.reshape(B, C, 2, H // 2, 2, W // 2).max(axis=(3, 5))
    y2 = jax.nn.relu(jnp.einsum("oc,bchw->bohw", p["w_c1"], m1, precision=hp) + b4(p["b_c1"]))
    m2 = feat.reshape(B, C, 4, H // 4, 4, W // 4).max(axis=(3, 5))
    y3 = jax.nn.relu(jnp.einsum("oc,bchw->bohw", p["w_c2"], m2, precision=hp) + b4(p["b_c2"]))
    y2 = y2.reshape(B, C, 1, 1)
    y3 = y3.reshape(B, C, 1, 1)
    z = jnp.floor((y1 + y2 + y3) / 3.0)
    h = jax.nn.relu(jnp.einsum("oc,bcij->boij", p["w_m1"], z, precision=hp) + b4(p["b_m1"]))
    att = jax.nn.sigmoid(jnp.einsum("oc,bcij->boij", p["w_m2"], h, precision=hp) + b4(p["b_m2"]))
    o1 = att * feat
    o2 = lax.conv_general_dilated(o1, p["w_fc"], window_strides=(1, 1),
                                  padding=((1, 1), (1, 1)),
                                  dimension_numbers=("NCHW", "OIHW", "NCHW"),
                                  precision=hp)
    o2 = o2 + b4(p["b_fc"])
    eps = 1e-5
    o2 = (o2 - b4(p["bn_mean"])) / jnp.sqrt(b4(p["bn_var"]) + eps) * b4(p["bn_gamma"]) \
         + b4(p["bn_beta"])
    return jax.nn.relu(o2)


if __name__ == "__main__":
    B, H, W = 2, 16, 16
    C1 = C2 = C3 = 4            # in_channels = 12 (concat of the three branches)
    out_channels = 32

    key = jax.random.PRNGKey(0)
    k1, k2, k3, kp = jax.random.split(key, 4)
    x1 = jax.random.normal(k1, (B, C1, H, W), jnp.float32)
    x2 = jax.random.normal(k2, (B, C2, H // 2, W // 2), jnp.float32)
    x3 = jax.random.normal(k3, (B, C3, H // 4, W // 4), jnp.float32)
    params = make_params(kp, C1 + C2 + C3, out_channels)

    out = jax.block_until_ready(mlf_forward_pallas(x1, x2, x3, params))
    ref = jax.block_until_ready(mlf_forward_ref(x1, x2, x3, params))
    np.testing.assert_allclose(np.asarray(out), np.asarray(ref), rtol=1e-3, atol=1e-4)

    print("KERNEL_OK")
</pallas_src>

<mosaic_0001>
module attributes {stable_mosaic.version = 11 : i64} {
  func.func @_mlf_kernel(%arg0: i32, %arg1: memref<1x4x256xf32, #tpu.memory_space<vmem>>, %arg2: memref<1x4x64xf32, #tpu.memory_space<vmem>>, %arg3: memref<1x4x16xf32, #tpu.memory_space<vmem>>, %arg4: memref<64x256xf32, #tpu.memory_space<vmem>>, %arg5: memref<16x256xf32, #tpu.memory_space<vmem>>, %arg6: memref<64x4xf32, #tpu.memory_space<vmem>>, %arg7: memref<64x4xf32, #tpu.memory_space<vmem>>, %arg8: memref<64x4xf32, #tpu.memory_space<vmem>>, %arg9: memref<64x1xf32, #tpu.memory_space<vmem>>, %arg10: memref<16x256xf32, #tpu.memory_space<vmem>>, %arg11: memref<64x64xf32, #tpu.memory_space<vmem>>, %arg12: memref<64x1xf32, #tpu.memory_space<vmem>>, %arg13: memref<64x4xf32, #tpu.memory_space<vmem>>, %arg14: memref<64x64xf32, #tpu.memory_space<vmem>>, %arg15: memref<64x1xf32, #tpu.memory_space<vmem>>, %arg16: memref<64x16xf32, #tpu.memory_space<vmem>>, %arg17: memref<8x64xf32, #tpu.memory_space<vmem>>, %arg18: memref<8x1xf32, #tpu.memory_space<vmem>>, %arg19: memref<64x8xf32, #tpu.memory_space<vmem>>, %arg20: memref<64x1xf32, #tpu.memory_space<vmem>>, %arg21: memref<32x576xf32, #tpu.memory_space<vmem>>, %arg22: memref<32x1xf32, #tpu.memory_space<vmem>>, %arg23: memref<9x256xf32, #tpu.memory_space<vmem>>, %arg24: memref<1x32x256xf32, #tpu.memory_space<vmem>>) attributes {dimension_semantics = [#tpu.dimension_semantics<parallel>], iteration_bounds = array<i64: 2>, scalar_prefetch = 0 : i64, scratch_operands = 0 : i64, tpu.core_type = #tpu.core_type<tc>, window_params = [{transform_indices = @transform_0, window_bounds = array<i64: 1, 4, 256>}, {transform_indices = @transform_1, window_bounds = array<i64: 1, 4, 64>}, {transform_indices = @transform_2, window_bounds = array<i64: 1, 4, 16>}, {pipeline_mode = #tpu.pipeline_mode<synchronous>, transform_indices = @transform_3, window_bounds = array<i64: 64, 256>}, {pipeline_mode = #tpu.pipeline_mode<synchronous>, transform_indices = @transform_4, window_bounds = array<i64: 16, 256>}, {pipeline_mode = #tpu.pipeline_mode<synchronous>, transform_indices = @transform_5, window_bounds = array<i64: 64, 4>}, {pipeline_mode = #tpu.pipeline_mode<synchronous>, transform_indices = @transform_6, window_bounds = array<i64: 64, 4>}, {pipeline_mode = #tpu.pipeline_mode<synchronous>, transform_indices = @transform_7, window_bounds = array<i64: 64, 4>}, {pipeline_mode = #tpu.pipeline_mode<synchronous>, transform_indices = @transform_8, window_bounds = array<i64: 64, 1>}, {pipeline_mode = #tpu.pipeline_mode<synchronous>, transform_indices = @transform_9, window_bounds = array<i64: 16, 256>}, {pipeline_mode = #tpu.pipeline_mode<synchronous>, transform_indices = @transform_10, window_bounds = array<i64: 64, 64>}, {pipeline_mode = #tpu.pipeline_mode<synchronous>, transform_indices = @transform_11, window_bounds = array<i64: 64, 1>}, {pipeline_mode = #tpu.pipeline_mode<synchronous>, transform_indices = @transform_12, window_bounds = array<i64: 64, 4>}, {pipeline_mode = #tpu.pipeline_mode<synchronous>, transform_indices = @transform_13, window_bounds = array<i64: 64, 64>}, {pipeline_mode = #tpu.pipeline_mode<synchronous>, transform_indices = @transform_14, window_bounds = array<i64: 64, 1>}, {pipeline_mode = #tpu.pipeline_mode<synchronous>, transform_indices = @transform_15, window_bounds = array<i64: 64, 16>}, {pipeline_mode = #tpu.pipeline_mode<synchronous>, transform_indices = @transform_16, window_bounds = array<i64: 8, 64>}, {pipeline_mode = #tpu.pipeline_mode<synchronous>, transform_indices = @transform_17, window_bounds = array<i64: 8, 1>}, {pipeline_mode = #tpu.pipeline_mode<synchronous>, transform_indices = @transform_18, window_bounds = array<i64: 64, 8>}, {pipeline_mode = #tpu.pipeline_mode<synchronous>, transform_indices = @transform_19, window_bounds = array<i64: 64, 1>}, {pipeline_mode = #tpu.pipeline_mode<synchronous>, transform_indices = @transform_20, window_bounds = array<i64: 32, 576>}, {pipeline_mode = #tpu.pipeline_mode<synchronous>, transform_indices = @transform_21, window_bounds = array<i64: 32, 1>}, {pipeline_mode = #tpu.pipeline_mode<synchronous>, transform_indices = @transform_22, window_bounds = array<i64: 9, 256>}, {transform_indices = @transform_23, window_bounds = array<i64: 1, 32, 256>}]} {
    %c0 = arith.constant 0 : index
    %c0_0 = arith.constant 0 : index
    %c0_1 = arith.constant 0 : index
    %0 = vector.load %arg1[%c0, %c0_0, %c0_1] : memref<1x4x256xf32, #tpu.memory_space<vmem>>, vector<1x4x256xf32>
    %1 = vector.shape_cast %0 : vector<1x4x256xf32> to vector<4x256xf32>
    %c0_2 = arith.constant 0 : index
    %c0_3 = arith.constant 0 : index
    %c0_4 = arith.constant 0 : index
    %2 = vector.load %arg2[%c0_2, %c0_3, %c0_4] : memref<1x4x64xf32, #tpu.memory_space<vmem>>, vector<1x4x64xf32>
    %3 = vector.shape_cast %2 : vector<1x4x64xf32> to vector<4x64xf32>
    %c0_5 = arith.constant 0 : index
    %c0_6 = arith.constant 0 : index
    %c0_7 = arith.constant 0 : index
    %4 = vector.load %arg3[%c0_5, %c0_6, %c0_7] : memref<1x4x16xf32, #tpu.memory_space<vmem>>, vector<1x4x16xf32>
    %5 = vector.shape_cast %4 : vector<1x4x16xf32> to vector<4x16xf32>
    %c0_8 = arith.constant 0 : index
    %c0_9 = arith.constant 0 : index
    %6 = vector.load %arg4[%c0_8, %c0_9] : memref<64x256xf32, #tpu.memory_space<vmem>>, vector<64x256xf32>
    %cst = arith.constant dense<0.000000e+00> : vector<4x256xf32>
    %7 = tpu.matmul %3, %6, %cst {dimension_numbers = #tpu.dot_dimension_numbers<[1], [0], [0], [1], [0, 0, 1, 1], [], []>} : vector<4x64xf32>, vector<64x256xf32>, vector<4x256xf32> -> vector<4x256xf32>
    %c0_10 = arith.constant 0 : index
    %c0_11 = arith.constant 0 : index
    %8 = vector.load %arg5[%c0_10, %c0_11] : memref<16x256xf32, #tpu.memory_space<vmem>>, vector<16x256xf32>
    %cst_12 = arith.constant dense<0.000000e+00> : vector<4x256xf32>
    %9 = tpu.matmul %5, %8, %cst_12 {dimension_numbers = #tpu.dot_dimension_numbers<[1], [0], [0], [1], [0, 0, 1, 1], [], []>} : vector<4x16xf32>, vector<16x256xf32>, vector<4x256xf32> -> vector<4x256xf32>
    %c0_13 = arith.constant 0 : index
    %c0_14 = arith.constant 0 : index
    %10 = vector.load %arg6[%c0_13, %c0_14] : memref<64x4xf32, #tpu.memory_space<vmem>>, vector<64x4xf32>
    %cst_15 = arith.constant dense<0.000000e+00> : vector<64x256xf32>
    %11 = tpu.matmul %10, %1, %cst_15 {dimension_numbers = #tpu.dot_dimension_numbers<[1], [0], [0], [1], [0, 0, 1, 1], [], []>} : vector<64x4xf32>, vector<4x256xf32>, vector<64x256xf32> -> vector<64x256xf32>
    %c0_16 = arith.constant 0 : index
    %c0_17 = arith.constant 0 : index
    %12 = vector.load %arg7[%c0_16, %c0_17] : memref<64x4xf32, #tpu.memory_space<vmem>>, vector<64x4xf32>
    %cst_18 = arith.constant dense<0.000000e+00> : vector<64x256xf32>
    %13 = tpu.matmul %12, %7, %cst_18 {dimension_numbers = #tpu.dot_dimension_numbers<[1], [0], [0], [1], [0, 0, 1, 1], [], []>} : vector<64x4xf32>, vector<4x256xf32>, vector<64x256xf32> -> vector<64x256xf32>
    %14 = arith.addf %11, %13 : vector<64x256xf32>
    %c0_19 = arith.constant 0 : index
    %c0_20 = arith.constant 0 : index
    %15 = vector.load %arg8[%c0_19, %c0_20] : memref<64x4xf32, #tpu.memory_space<vmem>>, vector<64x4xf32>
    %cst_21 = arith.constant dense<0.000000e+00> : vector<64x256xf32>
    %16 = tpu.matmul %15, %9, %cst_21 {dimension_numbers = #tpu.dot_dimension_numbers<[1], [0], [0], [1], [0, 0, 1, 1], [], []>} : vector<64x4xf32>, vector<4x256xf32>, vector<64x256xf32> -> vector<64x256xf32>
    %17 = arith.addf %14, %16 : vector<64x256xf32>
    %c0_22 = arith.constant 0 : index
    %c0_23 = arith.constant 0 : index
    %18 = vector.load %arg9[%c0_22, %c0_23] : memref<64x1xf32, #tpu.memory_space<vmem>>, vector<64x1xf32>
    %19 = vector.broadcast %18 : vector<64x1xf32> to vector<64x256xf32>
    %20 = arith.addf %17, %19 : vector<64x256xf32>
    %cst_24 = arith.constant 0.000000e+00 : f32
    %21 = vector.broadcast %cst_24 : f32 to vector<64x256xf32>
    %22 = arith.maximumf %20, %21 : vector<64x256xf32>
    %cst_25 = arith.constant dense<0.000000e+00> : vector<64xf32>
    %23 = vector.multi_reduction <add>, %22, %cst_25 [1] : vector<64x256xf32> to vector<64xf32>
    %24 = vector.shape_cast %23 : vector<64xf32> to vector<64x1xf32>
    %cst_26 = arith.constant 3.906250e-03 : f32
    %25 = vector.broadcast %cst_26 : f32 to vector<64x1xf32>
    %26 = arith.mulf %24, %25 : vector<64x1xf32>
    %c0_27 = arith.constant 0 : index
    %c0_28 = arith.constant 0 : index
    %27 = vector.load %arg10[%c0_27, %c0_28] : memref<16x256xf32, #tpu.memory_space<vmem>>, vector<16x256xf32>
    %28 = vector.extract_strided_slice %27 {offsets = [0, 0], sizes = [1, 256], strides = [1, 1]} : vector<16x256xf32> to vector<1x256xf32>
    %29 = vector.broadcast %28 : vector<1x256xf32> to vector<64x256xf32>
    %30 = arith.addf %22, %29 : vector<64x256xf32>
    %cst_29 = arith.constant dense<0xFF800000> : vector<64xf32>
    %31 = vector.multi_reduction <maximumf>, %30, %cst_29 [1] : vector<64x256xf32> to vector<64xf32>
    %32 = vector.shape_cast %31 : vector<64xf32> to vector<64x1xf32>
    %33 = vector.extract_strided_slice %27 {offsets = [1, 0], sizes = [1, 256], strides = [1, 1]} : vector<16x256xf32> to vector<1x256xf32>
    %34 = vector.broadcast %33 : vector<1x256xf32> to vector<64x256xf32>
    %35 = arith.addf %22, %34 : vector<64x256xf32>
    %cst_30 = arith.constant dense<0xFF800000> : vector<64xf32>
    %36 = vector.multi_reduction <maximumf>, %35, %cst_30 [1] : vector<64x256xf32> to vector<64xf32>
    %37 = vector.shape_cast %36 : vector<64xf32> to vector<64x1xf32>
    %38 = vector.extract_strided_slice %27 {offsets = [2, 0], sizes = [1, 256], strides = [1, 1]} : vector<16x256xf32> to vector<1x256xf32>
    %39 = vector.broadcast %38 : vector<1x256xf32> to vector<64x256xf32>
    %40 = arith.addf %22, %39 : vector<64x256xf32>
    %cst_31 = arith.constant dense<0xFF800000> : vector<64xf32>
    %41 = vector.multi_reduction <maximumf>, %40, %cst_31 [1] : vector<64x256xf32> to vector<64xf32>
    %42 = vector.shape_cast %41 : vector<64xf32> to vector<64x1xf32>
    %43 = vector.extract_strided_slice %27 {offsets = [3, 0], sizes = [1, 256], strides = [1, 1]} : vector<16x256xf32> to vector<1x256xf32>
    %44 = vector.broadcast %43 : vector<1x256xf32> to vector<64x256xf32>
    %45 = arith.addf %22, %44 : vector<64x256xf32>
    %cst_32 = arith.constant dense<0xFF800000> : vector<64xf32>
    %46 = vector.multi_reduction <maximumf>, %45, %cst_32 [1] : vector<64x256xf32> to vector<64xf32>
    %47 = vector.shape_cast %46 : vector<64xf32> to vector<64x1xf32>
    %48 = vector.extract_strided_slice %27 {offsets = [4, 0], sizes = [1, 256], strides = [1, 1]} : vector<16x256xf32> to vector<1x256xf32>
    %49 = vector.broadcast %48 : vector<1x256xf32> to vector<64x256xf32>
    %50 = arith.addf %22, %49 : vector<64x256xf32>
    %cst_33 = arith.constant dense<0xFF800000> : vector<64xf32>
    %51 = vector.multi_reduction <maximumf>, %50, %cst_33 [1] : vector<64x256xf32> to vector<64xf32>
    %52 = vector.shape_cast %51 : vector<64xf32> to vector<64x1xf32>
    %53 = vector.extract_strided_slice %27 {offsets = [5, 0], sizes = [1, 256], strides = [1, 1]} : vector<16x256xf32> to vector<1x256xf32>
    %54 = vector.broadcast %53 : vector<1x256xf32> to vector<64x256xf32>
    %55 = arith.addf %22, %54 : vector<64x256xf32>
    %cst_34 = arith.constant dense<0xFF800000> : vector<64xf32>
    %56 = vector.multi_reduction <maximumf>, %55, %cst_34 [1] : vector<64x256xf32> to vector<64xf32>
    %57 = vector.shape_cast %56 : vector<64xf32> to vector<64x1xf32>
    %58 = vector.extract_strided_slice %27 {offsets = [6, 0], sizes = [1, 256], strides = [1, 1]} : vector<16x256xf32> to vector<1x256xf32>
    %59 = vector.broadcast %58 : vector<1x256xf32> to vector<64x256xf32>
    %60 = arith.addf %22, %59 : vector<64x256xf32>
    %cst_35 = arith.constant dense<0xFF800000> : vector<64xf32>
    %61 = vector.multi_reduction <maximumf>, %60, %cst_35 [1] : vector<64x256xf32> to vector<64xf32>
    %62 = vector.shape_cast %61 : vector<64xf32> to vector<64x1xf32>
    %63 = vector.extract_strided_slice %27 {offsets = [7, 0], sizes = [1, 256], strides = [1, 1]} : vector<16x256xf32> to vector<1x256xf32>
    %64 = vector.broadcast %63 : vector<1x256xf32> to vector<64x256xf32>
    %65 = arith.addf %22, %64 : vector<64x256xf32>
    %cst_36 = arith.constant dense<0xFF800000> : vector<64xf32>
    %66 = vector.multi_reduction <maximumf>, %65, %cst_36 [1] : vector<64x256xf32> to vector<64xf32>
    %67 = vector.shape_cast %66 : vector<64xf32> to vector<64x1xf32>
    %68 = vector.extract_strided_slice %27 {offsets = [8, 0], sizes = [1, 256], strides = [1, 1]} : vector<16x256xf32> to vector<1x256xf32>
    %69 = vector.broadcast %68 : vector<1x256xf32> to vector<64x256xf32>
    %70 = arith.addf %22, %69 : vector<64x256xf32>
    %cst_37 = arith.constant dense<0xFF800000> : vector<64xf32>
    %71 = vector.multi_reduction <maximumf>, %70, %cst_37 [1] : vector<64x256xf32> to vector<64xf32>
    %72 = vector.shape_cast %71 : vector<64xf32> to vector<64x1xf32>
    %73 = vector.extract_strided_slice %27 {offsets = [9, 0], sizes = [1, 256], strides = [1, 1]} : vector<16x256xf32> to vector<1x256xf32>
    %74 = vector.broadcast %73 : vector<1x256xf32> to vector<64x256xf32>
    %75 = arith.addf %22, %74 : vector<64x256xf32>
    %cst_38 = arith.constant dense<0xFF800000> : vector<64xf32>
    %76 = vector.multi_reduction <maximumf>, %75, %cst_38 [1] : vector<64x256xf32> to vector<64xf32>
    %77 = vector.shape_cast %76 : vector<64xf32> to vector<64x1xf32>
    %78 = vector.extract_strided_slice %27 {offsets = [10, 0], sizes = [1, 256], strides = [1, 1]} : vector<16x256xf32> to vector<1x256xf32>
    %79 = vector.broadcast %78 : vector<1x256xf32> to vector<64x256xf32>
    %80 = arith.addf %22, %79 : vector<64x256xf32>
    %cst_39 = arith.constant dense<0xFF800000> : vector<64xf32>
    %81 = vector.multi_reduction <maximumf>, %80, %cst_39 [1] : vector<64x256xf32> to vector<64xf32>
    %82 = vector.shape_cast %81 : vector<64xf32> to vector<64x1xf32>
    %83 = vector.extract_strided_slice %27 {offsets = [11, 0], sizes = [1, 256], strides = [1, 1]} : vector<16x256xf32> to vector<1x256xf32>
    %84 = vector.broadcast %83 : vector<1x256xf32> to vector<64x256xf32>
    %85 = arith.addf %22, %84 : vector<64x256xf32>
    %cst_40 = arith.constant dense<0xFF800000> : vector<64xf32>
    %86 = vector.multi_reduction <maximumf>, %85, %cst_40 [1] : vector<64x256xf32> to vector<64xf32>
    %87 = vector.shape_cast %86 : vector<64xf32> to vector<64x1xf32>
    %88 = vector.extract_strided_slice %27 {offsets = [12, 0], sizes = [1, 256], strides = [1, 1]} : vector<16x256xf32> to vector<1x256xf32>
    %89 = vector.broadcast %88 : vector<1x256xf32> to vector<64x256xf32>
    %90 = arith.addf %22, %89 : vector<64x256xf32>
    %cst_41 = arith.constant dense<0xFF800000> : vector<64xf32>
    %91 = vector.multi_reduction <maximumf>, %90, %cst_41 [1] : vector<64x256xf32> to vector<64xf32>
    %92 = vector.shape_cast %91 : vector<64xf32> to vector<64x1xf32>
    %93 = vector.extract_strided_slice %27 {offsets = [13, 0], sizes = [1, 256], strides = [1, 1]} : vector<16x256xf32> to vector<1x256xf32>
    %94 = vector.broadcast %93 : vector<1x256xf32> to vector<64x256xf32>
    %95 = arith.addf %22, %94 : vector<64x256xf32>
    %cst_42 = arith.constant dense<0xFF800000> : vector<64xf32>
    %96 = vector.multi_reduction <maximumf>, %95, %cst_42 [1] : vector<64x256xf32> to vector<64xf32>
    %97 = vector.shape_cast %96 : vector<64xf32> to vector<64x1xf32>
    %98 = vector.extract_strided_slice %27 {offsets = [14, 0], sizes = [1, 256], strides = [1, 1]} : vector<16x256xf32> to vector<1x256xf32>
    %99 = vector.broadcast %98 : vector<1x256xf32> to vector<64x256xf32>
    %100 = arith.addf %22, %99 : vector<64x256xf32>
    %cst_43 = arith.constant dense<0xFF800000> : vector<64xf32>
    %101 = vector.multi_reduction <maximumf>, %100, %cst_43 [1] : vector<64x256xf32> to vector<64xf32>
    %102 = vector.shape_cast %101 : vector<64xf32> to vector<64x1xf32>
    %103 = vector.extract_strided_slice %27 {offsets = [15, 0], sizes = [1, 256], strides = [1, 1]} : vector<16x256xf32> to vector<1x256xf32>
    %104 = vector.broadcast %103 : vector<1x256xf32> to vector<64x256xf32>
    %105 = arith.addf %22, %104 : vector<64x256xf32>
    %cst_44 = arith.constant dense<0xFF800000> : vector<64xf32>
    %106 = vector.multi_reduction <maximumf>, %105, %cst_44 [1] : vector<64x256xf32> to vector<64xf32>
    %107 = vector.shape_cast %106 : vector<64xf32> to vector<64x1xf32>
    %108 = arith.maximumf %32, %37 : vector<64x1xf32>
    %109 = arith.maximumf %52, %57 : vector<64x1xf32>
    %110 = arith.maximumf %108, %109 : vector<64x1xf32>
    %111 = arith.maximumf %42, %47 : vector<64x1xf32>
    %112 = arith.maximumf %62, %67 : vector<64x1xf32>
    %113 = arith.maximumf %111, %112 : vector<64x1xf32>
    %114 = arith.maximumf %72, %77 : vector<64x1xf32>
    %115 = arith.maximumf %92, %97 : vector<64x1xf32>
    %116 = arith.maximumf %114, %115 : vector<64x1xf32>
    %117 = arith.maximumf %82, %87 : vector<64x1xf32>
    %118 = arith.maximumf %102, %107 : vector<64x1xf32>
    %119 = arith.maximumf %117, %118 : vector<64x1xf32>
    %120 = tpu.concatenate %32, %37, %42, %47, %52, %57, %62, %67, %72, %77, %82, %87, %92, %97, %102, %107 in 1 : vector<64x1xf32>, vector<64x1xf32>, vector<64x1xf32>, vector<64x1xf32>, vector<64x1xf32>, vector<64x1xf32>, vector<64x1xf32>, vector<64x1xf32>, vector<64x1xf32>, vector<64x1xf32>, vector<64x1xf32>, vector<64x1xf32>, vector<64x1xf32>, vector<64x1xf32>, vector<64x1xf32>, vector<64x1xf32> -> vector<64x16xf32>
    %121 = tpu.concatenate %110, %113, %116, %119 in 1 : vector<64x1xf32>, vector<64x1xf32>, vector<64x1xf32>, vector<64x1xf32> -> vector<64x4xf32>
    %c0_45 = arith.constant 0 : index
    %c0_46 = arith.constant 0 : index
    %122 = vector.load %arg11[%c0_45, %c0_46] : memref<64x64xf32, #tpu.memory_space<vmem>>, vector<64x64xf32>
    %cst_47 = arith.constant dense<0.000000e+00> : vector<64x4xf32>
    %123 = tpu.matmul %122, %121, %cst_47 {dimension_numbers = #tpu.dot_dimension_numbers<[1], [0], [0], [1], [0, 0, 1, 1], [], []>} : vector<64x64xf32>, vector<64x4xf32>, vector<64x4xf32> -> vector<64x4xf32>
    %c0_48 = arith.constant 0 : index
    %c0_49 = arith.constant 0 : index
    %124 = vector.load %arg12[%c0_48, %c0_49] : memref<64x1xf32, #tpu.memory_space<vmem>>, vector<64x1xf32>
    %125 = vector.broadcast %124 : vector<64x1xf32> to vector<64x4xf32>
    %126 = arith.addf %123, %125 : vector<64x4xf32>
    %cst_50 = arith.constant 0.000000e+00 : f32
    %127 = vector.broadcast %cst_50 : f32 to vector<64x4xf32>
    %128 = arith.maximumf %126, %127 : vector<64x4xf32>
    %c0_51 = arith.constant 0 : index
    %c0_52 = arith.constant 0 : index
    %129 = vector.load %arg13[%c0_51, %c0_52] : memref<64x4xf32, #tpu.memory_space<vmem>>, vector<64x4xf32>
    %130 = arith.mulf %128, %129 : vector<64x4xf32>
    %cst_53 = arith.constant dense<0.000000e+00> : vector<64xf32>
    %131 = vector.multi_reduction <add>, %130, %cst_53 [1] : vector<64x4xf32> to vector<64xf32>
    %132 = vector.shape_cast %131 : vector<64xf32> to vector<64x1xf32>
    %c0_54 = arith.constant 0 : index
    %c0_55 = arith.constant 0 : index
    %133 = vector.load %arg14[%c0_54, %c0_55] : memref<64x64xf32, #tpu.memory_space<vmem>>, vector<64x64xf32>
    %cst_56 = arith.constant dense<0.000000e+00> : vector<64x16xf32>
    %134 = tpu.matmul %133, %120, %cst_56 {dimension_numbers = #tpu.dot_dimension_numbers<[1], [0], [0], [1], [0, 0, 1, 1], [], []>} : vector<64x64xf32>, vector<64x16xf32>, vector<64x16xf32> -> vector<64x16xf32>
    %c0_57 = arith.constant 0 : index
    %c0_58 = arith.constant 0 : index
    %135 = vector.load %arg15[%c0_57, %c0_58] : memref<64x1xf32, #tpu.memory_space<vmem>>, vector<64x1xf32>
    %136 = vector.broadcast %135 : vector<64x1xf32> to vector<64x16xf32>
    %137 = arith.addf %134, %136 : vector<64x16xf32>
    %cst_59 = arith.constant 0.000000e+00 : f32
    %138 = vector.broadcast %cst_59 : f32 to vector<64x16xf32>
    %139 = arith.maximumf %137, %138 : vector<64x16xf32>
    %c0_60 = arith.constant 0 : index
    %c0_61 = arith.constant 0 : index
    %140 = vector.load %arg16[%c0_60, %c0_61] : memref<64x16xf32, #tpu.memory_space<vmem>>, vector<64x16xf32>
    %141 = arith.mulf %139, %140 : vector<64x16xf32>
    %cst_62 = arith.constant dense<0.000000e+00> : vector<64xf32>
    %142 = vector.multi_reduction <add>, %141, %cst_62 [1] : vector<64x16xf32> to vector<64xf32>
    %143 = vector.shape_cast %142 : vector<64xf32> to vector<64x1xf32>
    %144 = arith.addf %26, %132 : vector<64x1xf32>
    %145 = arith.addf %144, %143 : vector<64x1xf32>
    %cst_63 = arith.constant 3.000000e+00 : f32
    %146 = vector.broadcast %cst_63 : f32 to vector<64x1xf32>
    %147 = arith.divf %145, %146 : vector<64x1xf32>
    %148 = math.floor %147 : vector<64x1xf32>
    %c0_64 = arith.constant 0 : index
    %c0_65 = arith.constant 0 : index
    %149 = vector.load %arg17[%c0_64, %c0_65] : memref<8x64xf32, #tpu.memory_space<vmem>>, vector<8x64xf32>
    %cst_66 = arith.constant dense<0.000000e+00> : vector<8x1xf32>
    %150 = tpu.matmul %149, %148, %cst_66 {dimension_numbers = #tpu.dot_dimension_numbers<[1], [0], [0], [1], [0, 0, 1, 1], [], []>} : vector<8x64xf32>, vector<64x1xf32>, vector<8x1xf32> -> vector<8x1xf32>
    %c0_67 = arith.constant 0 : index
    %c0_68 = arith.constant 0 : index
    %151 = vector.load %arg18[%c0_67, %c0_68] : memref<8x1xf32, #tpu.memory_space<vmem>>, vector<8x1xf32>
    %152 = arith.addf %150, %151 : vector<8x1xf32>
    %cst_69 = arith.constant 0.000000e+00 : f32
    %153 = vector.broadcast %cst_69 : f32 to vector<8x1xf32>
    %154 = arith.maximumf %152, %153 : vector<8x1xf32>
    %c0_70 = arith.constant 0 : index
    %c0_71 = arith.constant 0 : index
    %155 = vector.load %arg19[%c0_70, %c0_71] : memref<64x8xf32, #tpu.memory_space<vmem>>, vector<64x8xf32>
    %cst_72 = arith.constant dense<0.000000e+00> : vector<64x1xf32>
    %156 = tpu.matmul %155, %154, %cst_72 {dimension_numbers = #tpu.dot_dimension_numbers<[1], [0], [0], [1], [0, 0, 1, 1], [], []>} : vector<64x8xf32>, vector<8x1xf32>, vector<64x1xf32> -> vector<64x1xf32>
    %c0_73 = arith.constant 0 : index
    %c0_74 = arith.constant 0 : index
    %157 = vector.load %arg20[%c0_73, %c0_74] : memref<64x1xf32, #tpu.memory_space<vmem>>, vector<64x1xf32>
    %158 = arith.addf %156, %157 : vector<64x1xf32>
    %159 = arith.negf %158 : vector<64x1xf32>
    %160 = math.exp %159 : vector<64x1xf32>
    %cst_75 = arith.constant 1.000000e+00 : f32
    %161 = vector.broadcast %cst_75 : f32 to vector<64x1xf32>
    %162 = arith.addf %161, %160 : vector<64x1xf32>
    %163 = arith.divf %161, %162 : vector<64x1xf32>
    %164 = vector.broadcast %163 : vector<64x1xf32> to vector<64x256xf32>
    %165 = arith.mulf %164, %22 : vector<64x256xf32>
    %c0_76 = arith.constant 0 : index
    %c0_77 = arith.constant 0 : index
    %166 = vector.load %arg23[%c0_76, %c0_77] : memref<9x256xf32, #tpu.memory_space<vmem>>, vector<9x256xf32>
    %c17_i32 = arith.constant 17 : i32
    %167 = tpu.dynamic_rotate %165 by %c17_i32 dim 1 : vector<64x256xf32>, i32 -> vector<64x256xf32>
    %168 = vector.extract_strided_slice %166 {offsets = [0, 0], sizes = [1, 256], strides = [1, 1]} : vector<9x256xf32> to vector<1x256xf32>
    %169 = vector.broadcast %168 : vector<1x256xf32> to vector<64x256xf32>
    %170 = arith.mulf %167, %169 : vector<64x256xf32>
    %c16_i32 = arith.constant 16 : i32
    %171 = tpu.dynamic_rotate %165 by %c16_i32 dim 1 : vector<64x256xf32>, i32 -> vector<64x256xf32>
    %172 = vector.extract_strided_slice %166 {offsets = [1, 0], sizes = [1, 256], strides = [1, 1]} : vector<9x256xf32> to vector<1x256xf32>
    %173 = vector.broadcast %172 : vector<1x256xf32> to vector<64x256xf32>
    %174 = arith.mulf %171, %173 : vector<64x256xf32>
    %c15_i32 = arith.constant 15 : i32
    %175 = tpu.dynamic_rotate %165 by %c15_i32 dim 1 : vector<64x256xf32>, i32 -> vector<64x256xf32>
    %176 = vector.extract_strided_slice %166 {offsets = [2, 0], sizes = [1, 256], strides = [1, 1]} : vector<9x256xf32> to vector<1x256xf32>
    %177 = vector.broadcast %176 : vector<1x256xf32> to vector<64x256xf32>
    %178 = arith.mulf %175, %177 : vector<64x256xf32>
    %c1_i32 = arith.constant 1 : i32
    %179 = tpu.dynamic_rotate %165 by %c1_i32 dim 1 : vector<64x256xf32>, i32 -> vector<64x256xf32>
    %180 = vector.extract_strided_slice %166 {offsets = [3, 0], sizes = [1, 256], strides = [1, 1]} : vector<9x256xf32> to vector<1x256xf32>
    %181 = vector.broadcast %180 : vector<1x256xf32> to vector<64x256xf32>
    %182 = arith.mulf %179, %181 : vector<64x256xf32>
    %c255_i32 = arith.constant 255 : i32
    %183 = tpu.dynamic_rotate %165 by %c255_i32 dim 1 : vector<64x256xf32>, i32 -> vector<64x256xf32>
    %184 = vector.extract_strided_slice %166 {offsets = [5, 0], sizes = [1, 256], strides = [1, 1]} : vector<9x256xf32> to vector<1x256xf32>
    %185 = vector.broadcast %184 : vector<1x256xf32> to vector<64x256xf32>
    %186 = arith.mulf %183, %185 : vector<64x256xf32>
    %c241_i32 = arith.constant 241 : i32
    %187 = tpu.dynamic_rotate %165 by %c241_i32 dim 1 : vector<64x256xf32>, i32 -> vector<64x256xf32>
    %188 = vector.extract_strided_slice %166 {offsets = [6, 0], sizes = [1, 256], strides = [1, 1]} : vector<9x256xf32> to vector<1x256xf32>
    %189 = vector.broadcast %188 : vector<1x256xf32> to vector<64x256xf32>
    %190 = arith.mulf %187, %189 : vector<64x256xf32>
    %c240_i32 = arith.constant 240 : i32
    %191 = tpu.dynamic_rotate %165 by %c240_i32 dim 1 : vector<64x256xf32>, i32 -> vector<64x256xf32>
    %192 = vector.extract_strided_slice %166 {offsets = [7, 0], sizes = [1, 256], strides = [1, 1]} : vector<9x256xf32> to vector<1x256xf32>
    %193 = vector.broadcast %192 : vector<1x256xf32> to vector<64x256xf32>
    %194 = arith.mulf %191, %193 : vector<64x256xf32>
    %c239_i32 = arith.constant 239 : i32
    %195 = tpu.dynamic_rotate %165 by %c239_i32 dim 1 : vector<64x256xf32>, i32 -> vector<64x256xf32>
    %196 = vector.extract_strided_slice %166 {offsets = [8, 0], sizes = [1, 256], strides = [1, 1]} : vector<9x256xf32> to vector<1x256xf32>
    %197 = vector.broadcast %196 : vector<1x256xf32> to vector<64x256xf32>
    %198 = arith.mulf %195, %197 : vector<64x256xf32>
    %199 = tpu.concatenate %170, %174, %178, %182, %165, %186, %190, %194, %198 in 0 : vector<64x256xf32>, vector<64x256xf32>, vector<64x256xf32>, vector<64x256xf32>, vector<64x256xf32>, vector<64x256xf32>, vector<64x256xf32>, vector<64x256xf32>, vector<64x256xf32> -> vector<576x256xf32>
    %c0_78 = arith.constant 0 : index
    %c0_79 = arith.constant 0 : index
    %200 = vector.load %arg21[%c0_78, %c0_79] : memref<32x576xf32, #tpu.memory_space<vmem>>, vector<32x576xf32>
    %cst_80 = arith.constant dense<0.000000e+00> : vector<32x256xf32>
    %201 = tpu.matmul %200, %199, %cst_80 {dimension_numbers = #tpu.dot_dimension_numbers<[1], [0], [0], [1], [0, 0, 1, 1], [], []>} : vector<32x576xf32>, vector<576x256xf32>, vector<32x256xf32> -> vector<32x256xf32>
    %c0_81 = arith.constant 0 : index
    %c0_82 = arith.constant 0 : index
    %202 = vector.load %arg22[%c0_81, %c0_82] : memref<32x1xf32, #tpu.memory_space<vmem>>, vector<32x1xf32>
    %203 = vector.broadcast %202 : vector<32x1xf32> to vector<32x256xf32>
    %204 = arith.addf %201, %203 : vector<32x256xf32>
    %cst_83 = arith.constant 0.000000e+00 : f32
    %205 = vector.broadcast %cst_83 : f32 to vector<32x256xf32>
    %206 = arith.maximumf %204, %205 : vector<32x256xf32>
    %c0_84 = arith.constant 0 : index
    %c0_85 = arith.constant 0 : index
    %c0_86 = arith.constant 0 : index
    %207 = vector.load %arg24[%c0_84, %c0_85, %c0_86] : memref<1x32x256xf32, #tpu.memory_space<vmem>>, vector<1x32x256xf32>
    %208 = vector.shape_cast %207 : vector<1x32x256xf32> to vector<32x256xf32>
    %209 = vector.shape_cast %206 : vector<32x256xf32> to vector<1x32x256xf32>
    tpu.vector_store %arg24[%c0_84, %c0_85, %c0_86], %209 {strides = array<i32>} : memref<1x32x256xf32, #tpu.memory_space<vmem>>, vector<1x32x256xf32>,
    return
  }
  func.func @transform_0(%arg0: i32) -> (i32, i32, i32) {
    %c0_i32 = arith.constant 0 : i32
    %c0_i32_0 = arith.constant 0 : i32
    %c0_i32_1 = arith.constant 0 : i32
    return %arg0, %c0_i32, %c0_i32_0 : i32, i32, i32
  }
  func.func @transform_1(%arg0: i32) -> (i32, i32, i32) {
    %c0_i32 = arith.constant 0 : i32
    %c0_i32_0 = arith.constant 0 : i32
    %c0_i32_1 = arith.constant 0 : i32
    return %arg0, %c0_i32, %c0_i32_0 : i32, i32, i32
  }
  func.func @transform_2(%arg0: i32) -> (i32, i32, i32) {
    %c0_i32 = arith.constant 0 : i32
    %c0_i32_0 = arith.constant 0 : i32
    %c0_i32_1 = arith.constant 0 : i32
    return %arg0, %c0_i32, %c0_i32_0 : i32, i32, i32
  }
  func.func @transform_3(%arg0: i32) -> (i32, i32) {
    %c0_i32 = arith.constant 0 : i32
    %c0_i32_0 = arith.constant 0 : i32
    %c0_i32_1 = arith.constant 0 : i32
    return %c0_i32, %c0_i32_0 : i32, i32
  }
  func.func @transform_4(%arg0: i32) -> (i32, i32) {
    %c0_i32 = arith.constant 0 : i32
    %c0_i32_0 = arith.constant 0 : i32
    %c0_i32_1 = arith.constant 0 : i32
    return %c0_i32, %c0_i32_0 : i32, i32
  }
  func.func @transform_5(%arg0: i32) -> (i32, i32) {
    %c0_i32 = arith.constant 0 : i32
    %c0_i32_0 = arith.constant 0 : i32
    %c0_i32_1 = arith.constant 0 : i32
    return %c0_i32, %c0_i32_0 : i32, i32
  }
  func.func @transform_6(%arg0: i32) -> (i32, i32) {
    %c0_i32 = arith.constant 0 : i32
    %c0_i32_0 = arith.constant 0 : i32
    %c0_i32_1 = arith.constant 0 : i32
    return %c0_i32, %c0_i32_0 : i32, i32
  }
  func.func @transform_7(%arg0: i32) -> (i32, i32) {
    %c0_i32 = arith.constant 0 : i32
    %c0_i32_0 = arith.constant 0 : i32
    %c0_i32_1 = arith.constant 0 : i32
    return %c0_i32, %c0_i32_0 : i32, i32
  }
  func.func @transform_8(%arg0: i32) -> (i32, i32) {
    %c0_i32 = arith.constant 0 : i32
    %c0_i32_0 = arith.constant 0 : i32
    %c0_i32_1 = arith.constant 0 : i32
    return %c0_i32, %c0_i32_0 : i32, i32
  }
  func.func @transform_9(%arg0: i32) -> (i32, i32) {
    %c0_i32 = arith.constant 0 : i32
    %c0_i32_0 = arith.constant 0 : i32
    %c0_i32_1 = arith.constant 0 : i32
    return %c0_i32, %c0_i32_0 : i32, i32
  }
  func.func @transform_10(%arg0: i32) -> (i32, i32) {
    %c0_i32 = arith.constant 0 : i32
    %c0_i32_0 = arith.constant 0 : i32
    %c0_i32_1 = arith.constant 0 : i32
    return %c0_i32, %c0_i32_0 : i32, i32
  }
  func.func @transform_11(%arg0: i32) -> (i32, i32) {
    %c0_i32 = arith.constant 0 : i32
    %c0_i32_0 = arith.constant 0 : i32
    %c0_i32_1 = arith.constant 0 : i32
    return %c0_i32, %c0_i32_0 : i32, i32
  }
  func.func @transform_12(%arg0: i32) -> (i32, i32) {
    %c0_i32 = arith.constant 0 : i32
    %c0_i32_0 = arith.constant 0 : i32
    %c0_i32_1 = arith.constant 0 : i32
    return %c0_i32, %c0_i32_0 : i32, i32
  }
  func.func @transform_13(%arg0: i32) -> (i32, i32) {
    %c0_i32 = arith.constant 0 : i32
    %c0_i32_0 = arith.constant 0 : i32
    %c0_i32_1 = arith.constant 0 : i32
    return %c0_i32, %c0_i32_0 : i32, i32
  }
  func.func @transform_14(%arg0: i32) -> (i32, i32) {
    %c0_i32 = arith.constant 0 : i32
    %c0_i32_0 = arith.constant 0 : i32
    %c0_i32_1 = arith.constant 0 : i32
    return %c0_i32, %c0_i32_0 : i32, i32
  }
  func.func @transform_15(%arg0: i32) -> (i32, i32) {
    %c0_i32 = arith.constant 0 : i32
    %c0_i32_0 = arith.constant 0 : i32
    %c0_i32_1 = arith.constant 0 : i32
    return %c0_i32, %c0_i32_0 : i32, i32
  }
  func.func @transform_16(%arg0: i32) -> (i32, i32) {
    %c0_i32 = arith.constant 0 : i32
    %c0_i32_0 = arith.constant 0 : i32
    %c0_i32_1 = arith.constant 0 : i32
    return %c0_i32, %c0_i32_0 : i32, i32
  }
  func.func @transform_17(%arg0: i32) -> (i32, i32) {
    %c0_i32 = arith.constant 0 : i32
    %c0_i32_0 = arith.constant 0 : i32
    %c0_i32_1 = arith.constant 0 : i32
    return %c0_i32, %c0_i32_0 : i32, i32
  }
  func.func @transform_18(%arg0: i32) -> (i32, i32) {
    %c0_i32 = arith.constant 0 : i32
    %c0_i32_0 = arith.constant 0 : i32
    %c0_i32_1 = arith.constant 0 : i32
    return %c0_i32, %c0_i32_0 : i32, i32
  }
  func.func @transform_19(%arg0: i32) -> (i32, i32) {
    %c0_i32 = arith.constant 0 : i32
    %c0_i32_0 = arith.constant 0 : i32
    %c0_i32_1 = arith.constant 0 : i32
    return %c0_i32, %c0_i32_0 : i32, i32
  }
  func.func @transform_20(%arg0: i32) -> (i32, i32) {
    %c0_i32 = arith.constant 0 : i32
    %c0_i32_0 = arith.constant 0 : i32
    %c0_i32_1 = arith.constant 0 : i32
    return %c0_i32, %c0_i32_0 : i32, i32
  }
  func.func @transform_21(%arg0: i32) -> (i32, i32) {
    %c0_i32 = arith.constant 0 : i32
    %c0_i32_0 = arith.constant 0 : i32
    %c0_i32_1 = arith.constant 0 : i32
    return %c0_i32, %c0_i32_0 : i32, i32
  }
  func.func @transform_22(%arg0: i32) -> (i32, i32) {
    %c0_i32 = arith.constant 0 : i32
    %c0_i32_0 = arith.constant 0 : i32
    %c0_i32_1 = arith.constant 0 : i32
    return %c0_i32, %c0_i32_0 : i32, i32
  }
  func.func @transform_23(%arg0: i32) -> (i32, i32, i32) {
    %c0_i32 = arith.constant 0 : i32
    %c0_i32_0 = arith.constant 0 : i32
    %c0_i32_1 = arith.constant 0 : i32
    return %arg0, %c0_i32, %c0_i32_0 : i32, i32, i32
  }
}

</mosaic_0001>

<bundles_post_ra>
// kernel: tpu_custom_call.1
= control target key start
LH: loop header
LB: loop body
LE: loop exit
PB: predicated region body
PF: predicated region fallthrough
CT: control target
= control target key end

     0   :  { %s8399_s0 = inlined_call_operand.vmem [shape: f32[2,4,256], index: 0, kind: input, shape index: {}]   ;;  %s8400_s1 = inlined_call_operand.vmem [shape: f32[2,4,64], index: 1, kind: input, shape index: {}]   ;;  %s8401_s2 = inlined_call_operand.vmem [shape: f32[2,4,16], index: 2, kind: input, shape index: {}]   ;;  %s8402_s3 = inlined_call_operand.vmem [shape: f32[64,256], index: 3, kind: input, shape index: {}]   ;;  %s8403_s4 = inlined_call_operand.vmem [shape: f32[16,256], index: 4, kind: input, shape index: {}]   ;;  %s8404_s5 = inlined_call_operand.vmem [shape: f32[64,4], index: 5, kind: input, shape index: {}]   ;;  %s8405_s6 = inlined_call_operand.vmem [shape: f32[64,4], index: 6, kind: input, shape index: {}]   ;;  %s8406_s7 = inlined_call_operand.vmem [shape: f32[64,4], index: 7, kind: input, shape index: {}]   ;;  %s8407_s8 = inlined_call_operand.vmem [shape: f32[64,1], index: 8, kind: input, shape index: {}]   ;;  %s8408_s9 = inlined_call_operand.vmem [shape: f32[16,256], index: 9, kind: input, shape index: {}]   ;;  %s8409_s10 = inlined_call_operand.vmem [shape: f32[64,64], index: 10, kind: input, shape index: {}]   ;;  %s8410_s11 = inlined_call_operand.vmem [shape: f32[64,1], index: 11, kind: input, shape index: {}]   ;;  %s8411_s12 = inlined_call_operand.vmem [shape: f32[64,4], index: 12, kind: input, shape index: {}]   ;;  %s8412_s13 = inlined_call_operand.vmem [shape: f32[64,64], index: 13, kind: input, shape index: {}]   ;;  %s8413_s14 = inlined_call_operand.vmem [shape: f32[64,1], index: 14, kind: input, shape index: {}]   ;;  %s8414_s15 = inlined_call_operand.vmem [shape: f32[64,16], index: 15, kind: input, shape index: {}]   ;;  %s8415_s16 = inlined_call_operand.vmem [shape: f32[8,64], index: 16, kind: input, shape index: {}]   ;;  %s8416_s17 = inlined_call_operand.vmem [shape: f32[8,1], index: 17, kind: input, shape index: {}]   ;;  %s8417_s18 = inlined_call_operand.vmem [shape: f32[64,8], index: 18, kind: input, shape index: {}]   ;;  %s8418_s19 = inlined_call_operand.vmem [shape: f32[64,1], index: 19, kind: input, shape index: {}]   ;;  %s8419_s20 = inlined_call_operand.vmem [shape: f32[32,576], index: 20, kind: input, shape index: {}]   ;;  %s8420_s21 = inlined_call_operand.vmem [shape: f32[32,1], index: 21, kind: input, shape index: {}]   ;;  %s8421_s22 = inlined_call_operand.vmem [shape: f32[9,256], index: 22, kind: input, shape index: {}]   ;;  %s8422_s23 = inlined_call_operand.hbm [shape: f32[2,32,256], index: 23, kind: output, shape index: {}]  }
   0x1   :  { %8600 = sst [smem:[#allocation69_spill]] %s8399_s0 }
   0x2   :  { %8601 = sst [smem:[#allocation70_spill]] %s8400_s1 }
   0x3   :  { %8602 = sst [smem:[#allocation71_spill]] %s8401_s2 }
   0x4   :  { %8603 = sst [smem:[#allocation72_spill]] %s8402_s3 }
   0x5   :  { %8604 = sst [smem:[#allocation73_spill]] %s8403_s4 }
   0x6   :  { %8605 = sst [smem:[#allocation74_spill]] %s8404_s5 }
   0x7   :  { %8606 = sst [smem:[#allocation75_spill]] %s8405_s6 }
   0x8   :  { %8607 = sst [smem:[#allocation76_spill]] %s8406_s7 }
   0x9   :  { %8608 = sst [smem:[#allocation77_spill]] %s8422_s23 }
   0xa   :  { %28 = vsyncpa [#allocation3], 0 }
   0xb   :  { %30 = vsyncpa [#allocation3 + $0x1], 0  ;;  %s5161_s4 = smov 0   ;;  %s5163_s30 = smov 0  }
   0xc   :  { %s5165_s24 = smov 0   ;;  %s5167_s25 = smov 0  }
   0xd LB: > { %8609 = sst [smem:[#allocation5_spill]] %s5013_s4  ;;  %s5182_s5 = sadd.s32 4294967295, %s5025_s25   ;;  %s5025_s25 = sphi %s5167_s25, %s8912_s25   ;;  %s5021_s24 = sphi %s5165_s24, %s8915_s24   ;;  %s5017_s30 = sphi %s5163_s30, %s8914_s30   ;;  %s5013_s4 = sphi %s5161_s4, %s8913_s4  }
   0xe   : > { %8610 = sst [smem:[#allocation6_spill]] %s5017_s30  ;;  %s4378_s1 = sadd.s32 4294967294, %s5025_s25  }
   0xf   : > { %8611 = sst [smem:[#allocation7_spill]] %s5021_s24  ;;  %s5186_s26 = sadd.s32 1, %s5025_s25  }
  0x10   : > { %8612 = sst [smem:[#allocation8_spill]] %s5025_s25  ;;  %s541_s2 = sadd.s32 1, %s5021_s24 }
  0x11   : > { %8613 = sst [smem:[#allocation9_spill]] %s5182_s5  ;;  %s538_s6 = ssub.s32 %s5025_s25, %s5186_s26 }
  0x12   : > { %8614 = sst [smem:[#allocation10_spill]] %s5186_s26  ;;  %p551_p0 = scmp.ne.s32.totalorder %s5021_s24, %s5017_s30 }
  0x13   : > { %p539_p1 = scmp.eq.s32.totalorder %s538_s6, 0  ;;  %p552_p2 = scmp.eq.s32.totalorder %s5182_s5, 1 }
  0x14   : > { %p557_p3 = scmp.ne.s32.totalorder %s5017_s30, %s5013_s4  ;;  %p558_p4 = scmp.eq.s32.totalorder %s4378_s1, 1 }
  0x15   : > { %s5197_s27 = scalar_select %p539_p1, %s5021_s24, %s541_s2  }
  0x16   : > { %p5199_p5 = por %p552_p2, %p551_p0  ;;  %p5203_p6 = por %p558_p4, %p557_p3 }
  0x17   : > { %8615 = sst [smem:[#allocation11_spill]] %s5197_s27  ;;  %p4381_p7 = scmp.ge.s32.totalorder %s5025_s25, 1 }
  0x18   : > { %s8616_s7 = scalar_select %p5199_p5, 1, 0 }
  0x19   : > { %s8618_s28 = scalar_select %p5203_p6, 1, 0 }
  0x1a   : > { %8617 = sst [smem:[#allocation12_spill]] %s8616_s7  ;;  %p658_p8 = scmp.lt.s32.totalorder %s5025_s25, 3 }
  0x1b   : > { %8619 = sst [smem:[#allocation13_spill]] %s8618_s28 }
  0x1c   : > { %p659_p9 = pnand %p4381_p7, %p658_p8 }
  0x1e   : > { %662 = sbr.rel (%p659_p9) target bundleno = 2581 (0xa15), region = 112 }
  0x25   : > { %s8620_s0 = sld [smem:[#allocation72_spill]]  ;;  %p730_p10 = scmp.lt.s32.totalorder %s5182_s5, 1  ;;  %v8441_v7 = vmov 0.0   ;;  %vm8500_vm0 = vcmask 130048   ;;  %vm762_vm1 = vcmask 523264   ;;  %v1387_v33 = vld [vmem:[%s8407_s8] sm:$0xff] }
  0x26   : > { %830 = vmatprep.mubr.f32.mxu0 %v8441_v7  ;;  %909 = vmatprep.mubr.f32.mxu1 %v8441_v7  ;;  %s8621_s29 = sld [smem:[#allocation73_spill]]  ;;  %s8622_s6 = sld [smem:[#allocation71_spill]]  ;;  %v5028_v34 = vmov 0   ;;  %v1389_v35 = vld [vmem:[%s8407_s8 + $0x10] sm:$0xff]  ;;  %v1388_v36 = vld [vmem:[%s8407_s8 + $0x8] sm:$0xff]  ;;  %v1390_v37 = vld [vmem:[%s8407_s8 + $0x18] sm:$0xff] }
  0x27   : > { %s5240_s2 = scalar_select %p730_p10, %s5182_s5, 1  ;;  %4928 = vset.pattern.permute.xlu0 %v5028_v34  ;;  %4929 = vset.pattern.permute.xlu1 %v5028_v34  ;;  %v1391_v38 = vld [vmem:[%s8407_s8 + $0x20] sm:$0xff]  ;;  %v1392_v39 = vld [vmem:[%s8407_s8 + $0x28] sm:$0xff]  ;;  %v1393_v40 = vld [vmem:[%s8407_s8 + $0x30] sm:$0xff]  ;;  %vm957_vm2 = vcmask 1043456   ;;  %vm932_vm3 = vcmask 31744  }
  0x28   : > { %s8623_s24 = sld [smem:[#allocation70_spill]]  ;;  %1397 = vperm.xlu0 %4928, %v1387_v33   ;;  %1407 = vperm.xlu1 %4929, %v1389_v35   ;;  %v1394_v41 = vld [vmem:[%s8407_s8 + $0x38] sm:$0xff]  ;;  %s8624_s7 = sld [smem:[#allocation69_spill]]  ;;  %vm2367_vm4 = vcmask 7168   ;;  %vm2376_vm5 = vcmask 15360   ;;  %vm2385_vm6 = vcmask 23552  }
  0x29   : > { %s4385_s28 = sshll.u32 %s5240_s2, 2  ;;  %s8625_s1 = sld [smem:[#allocation75_spill]]  ;;  %vm2402_vm7 = vcmask 39936   ;;  %vm2411_vm8 = vcmask 48128   ;;  %vm2420_vm9 = vcmask 56320   ;;  %vm2429_vm10 = vcmask 64512  }
  0x2a   : > { %s8626_s4 = sld [smem:[#allocation74_spill]]  ;;  %vm2438_vm11 = vcmask 72704   ;;  %vm2447_vm12 = vcmask 80896   ;;  %vm2456_vm13 = vcmask 89088   ;;  %vm2465_vm14 = vcmask 97280   ;;  %s5032_s27 = smov 127  }
  0x2b   : > { %v747_v0 = vld [vmem:[%s8620_s0 + $0x8] sm:$0xff]  ;;  %v749_v1 = vld [vmem:[%s8620_s0 + $0x18] sm:$0xff]  ;;  %v746_v2 = vld [vmem:[%s8620_s0] sm:$0xff]  ;;  %vm2474_vm15 = vcmask 105472   ;;  %s8596_s5 = smov 16   ;;  %s5038_s25 = smov 111  }
  0x2c   : > { %v4604_v3 = vpack.c.bf16 %v749_v1, %v747_v0  ;;  %v748_v4 = vld [vmem:[%s8620_s0 + $0x10] sm:$0xff]  ;;  %v751_v5 = vld [vmem:[%s8620_s0 + $0x28] sm:$0xff]  ;;  %v753_v6 = vld [vmem:[%s8620_s0 + $0x38] sm:$0xff]  ;;  %s742_s30 = scalar_lea.vmem %s8622_s6, %s4385_s28  ;;  %1402 = vperm.xlu0 %4928, %v1388_v36   ;;  %1412 = vperm.xlu1 %4929, %v1390_v37   ;;  %s4463_s6 = sshll.u32 %s5240_s2, 3 }
  0x2d   : > { %v4606_v8 = vpack.c.bf16 %v748_v4, %v746_v2  ;;  %v4608_v9 = vpack.c.bf16 %v753_v6, %v751_v5  ;;  %v750_v10 = vld [vmem:[%s8620_s0 + $0x20] sm:$0xff]  ;;  %v752_v11 = vld [vmem:[%s8620_s0 + $0x30] sm:$0xff]  ;;  %v755_v12 = vld [vmem:[%s8620_s0 + $0x48] sm:$0xff]  ;;  %s5034_s2 = smov 113  }
  0x2e   : > { %4605 = vmatprep.subr.bf16.mxu0 %v4604_v3  ;;  %v757_v13 = vld [vmem:[%s8620_s0 + $0x58] sm:$0xff]  ;;  %v4610_v14 = vpack.c.bf16 %v752_v11, %v750_v10  ;;  %v754_v15 = vld [vmem:[%s8620_s0 + $0x40] sm:$0xff]  ;;  %v756_v16 = vld [vmem:[%s8620_s0 + $0x50] sm:$0xff]  ;;  %s738_s26 = scalar_lea.vmem %s8623_s24, %s4385_s28  ;;  %s734_s3 = scalar_lea.vmem %s8624_s7, %s4463_s6 }
  0x2f   : > { %4607 = vmatpush1.bf16.msra.mxu0 %v4606_v8  ;;  %v4612_v17 = vpack.c.bf16 %v757_v13, %v755_v12  ;;  %v759_v18 = vld [vmem:[%s8620_s0 + $0x68] sm:$0xff]  ;;  %v840_v20 = vld [vmem:[%s8621_s29 + $0x18] sm:$0xff]  ;;  %v837_v23 = vld [vmem:[%s8621_s29] sm:$0xff]  ;;  %v4614_v26 = vpack.c.bf16 %v756_v16, %v754_v15  ;;  %s8628_s7 = sld [smem:[#allocation76_spill]]  ;;  %s8547_s24 = smov 15  }
  0x30   : > { %4609 = vmatprep.subr.bf16.mxu0 %v4608_v9  ;;  %v838_v19 = vld [vmem:[%s8621_s29 + $0x8] sm:$0xff]  ;;  %v761_v21 = vld [vmem:[%s8620_s0 + $0x78] sm:$0xff]  ;;  %v839_v24 = vld [vmem:[%s8621_s29 + $0x10] sm:$0xff]  ;;  %1417 = vperm.xlu0 %4928, %v1391_v38   ;;  %s8627_s6 = smov %s8626_s4  ;;  %v8440_v9 = vlaneseq }
  0x31   : > { %v4620_v22 = vpack.c.bf16 %v840_v20, %v838_v19  ;;  %v4622_v25 = vpack.c.bf16 %v839_v24, %v837_v23  ;;  %v4616_v27 = vpack.c.bf16 %v761_v21, %v759_v18  ;;  %v758_v28 = vld [vmem:[%s8620_s0 + $0x60] sm:$0xff]  ;;  %v760_v29 = vld [vmem:[%s8620_s0 + $0x70] sm:$0xff]  ;;  %1422 = vperm.xlu1 %4929, %v1392_v39   ;;  %v925_v49 = vld [vmem:[%s8625_s1 + $0x8] sm:$0xff] }
  0x32   : > { %v745_v30 = vld [vmem:[%s742_s30] sm:$0xf]  ;;  %v4618_v31 = vpack.c.bf16 %v760_v29, %v758_v28  ;;  %v926_v50 = vld [vmem:[%s8625_s1 + $0x10] sm:$0xff]  ;;  %v927_v51 = vld [vmem:[%s8625_s1 + $0x18] sm:$0xff]  ;;  %v5439_v10 = vshrl.u32 %v8440_v9, 7 }
  0x33   : > { %4611 = vmatpush1.bf16.msra.mxu0 %v4610_v14  ;;  %4621 = vmatprep.subr.bf16.mxu1 %v4620_v22  ;;  %v744_v32 = vld [vmem:[%s738_s26] sm:$0xf]  ;;  %v929_v53 = vld [vmem:[%s8625_s1 + $0x28] sm:$0xff]  ;;  %v930_v54 = vld [vmem:[%s8625_s1 + $0x30] sm:$0xff]  ;;  %s5036_s26 = smov 112  }
  0x34   : > { %4613 = vmatprep.subr.bf16.mxu0 %v4612_v17  ;;  %4623 = vmatpush1.bf16.msra.mxu1 %v4622_v25  ;;  %v743_v44 = vld [vmem:[%s734_s3] sm:$0xff]  ;;  %v931_v55 = vld [vmem:[%s8625_s1 + $0x38] sm:$0xff]  ;;  %v917_v57 = vld [vmem:[%s8627_s6 + $0x8] sm:$0xff]  ;;  %v5442_v11 = vsub.s32 2, %v5439_v10  ;;  %v5445_v12 = vsub.s32 0, %v5439_v10  ;;  %v5458_v16 = vsub.s32 3, %v5439_v10 }
  0x35   : > { %1427 = vperm.xlu0 %4928, %v1393_v40   ;;  %1432 = vperm.xlu1 %4929, %v1394_v41   ;;  %v1078_v46 = vcombine.high %v743_v44, %v743_v44  ;;  %v924_v48 = vld [vmem:[%s8625_s1] sm:$0xff]  ;;  %v918_v58 = vld [vmem:[%s8627_s6 + $0x10] sm:$0xff]  ;;  %v919_v59 = vld [vmem:[%s8627_s6 + $0x18] sm:$0xff]  ;;  %v5461_v17 = vsub.s32 1, %v5439_v10  ;;  %v5472_v23 = vsub.s32 4, %v5439_v10  ;;  %v5503_v35 = vsub.s32 5, %v5439_v10 }
  0x36   : > { %v928_v52 = vld [vmem:[%s8625_s1 + $0x20] sm:$0xff]  ;;  %v921_v61 = vld [vmem:[%s8627_s6 + $0x28] sm:$0xff]  ;;  %v922_v62 = vld [vmem:[%s8627_s6 + $0x30] sm:$0xff]  ;;  %8629 = vst [vmem:[#allocation14_spill] sm:$0xff] %v5442_v11  ;;  %s5031_s3 = smov 17  }
  0x37   : > { %4615 = vmatpush1.bf16.msra.mxu0 %v4614_v26  ;;  %4388 = vmatmul.mubr.msk.f32.vlgmr.msra.gmra.mrb[0].mxu1 %vm8500_vm0, %v745_v30  ;;  %v916_v56 = vld [vmem:[%s8626_s4] sm:$0xff]  ;;  %v923_v63 = vld [vmem:[%s8627_s6 + $0x38] sm:$0xff]  ;;  %v1221_v1 = vld [vmem:[%s8628_s7 + $0x8] sm:$0xff]  ;;  %8630 = vst [vmem:[#allocation15_spill] sm:$0xff] %v5445_v12  ;;  %vm2492_vm0 = vcmask 121856   ;;  %s5037_s4 = smov 1  }
  0x38   : > { %4617 = vmatprep.subr.bf16.mxu0 %v4616_v27  ;;  %1028 = vmatprep.mubr.f32.mxu1 %v8441_v7  ;;  %v920_v60 = vld [vmem:[%s8627_s6 + $0x20] sm:$0xff]  ;;  %v1222_v2 = vld [vmem:[%s8628_s7 + $0x10] sm:$0xff]  ;;  %v1223_v3 = vld [vmem:[%s8628_s7 + $0x18] sm:$0xff]  ;;  %8631 = vst [vmem:[#allocation16_spill] sm:$0xff] %v5458_v16 }
  0x39   : > { %v1220_v0 = vld [vmem:[%s8628_s7] sm:$0xff]  ;;  %v1225_v5 = vld [vmem:[%s8628_s7 + $0x28] sm:$0xff]  ;;  %v1226_v6 = vld [vmem:[%s8628_s7 + $0x30] sm:$0xff]  ;;  %8632 = vst [vmem:[#allocation17_spill] sm:$0xff] %v5461_v17 }
  0x3a   : > { %v1224_v4 = vld [vmem:[%s8628_s7 + $0x20] sm:$0xff]  ;;  %v1227_v8 = vld [vmem:[%s8628_s7 + $0x38] sm:$0xff]  ;;  %v5455_v15 = vld [vmem:[%s8408_s9 + $0x8] sm:$0xff]  ;;  %8635 = vst [vmem:[#allocation20_spill] sm:$0xff] %v5503_v35 }
  0x3b   : > { %4619 = vmatpush1.bf16.msra.mxu0 %v4618_v31  ;;  %v5450_v14 = vld [vmem:[%s8408_s9] sm:$0xff]  ;;  %v5476_v25 = vrot.slane %v5455_v15, %v5442_v11  ;;  %v5480_v26 = vrot.slane %v5455_v15, %v5445_v12  ;;  %v5490_v29 = vrot.slane %v5455_v15, %v5458_v16  ;;  %v5500_v34 = vrot.slane %v5455_v15, %v5461_v17 }
  0x3c   : > { %v5465_v21 = vrot.slane %v5450_v14, %v5442_v11  ;;  %v5469_v22 = vrot.slane %v5450_v14, %v5445_v12  ;;  %v5486_v28 = vrot.slane %v5450_v14, %v5458_v16  ;;  %v5494_v30 = vrot.slane %v5450_v14, %v5461_v17 }
  0x3d   : > { %v5511_v40 = vrot.slane %v5450_v14, %v5472_v23 }
  0x3e   : > { %4387 = vmatmul.mubr.msk.f32.vlgmr.msra.gmra.mrb[0].mxu0 %vm762_vm1, %v744_v32 }
  0xa7   : > { %v1398_v13 = vpop.permute.xlu0 %1397 }
  0xab   : > { %v1403_v31 = vpop.permute.xlu0 %1402 }
 0x10a   : > { %v911_v42 = vpop.f32.mrb[0].mxu1 }
 0x10b   : > { %v913_v43 = vpop.f32.mrb[1].mxu1 }
 0x111   : > { %v832_v45 = vpop.f32.mrb[0].mxu0 }
 0x112   : > { %v834_v47 = vpop.f32.mrb[1].mxu0 }
 0x113   : > { %4389 = vmatprep.subr.msk.mxu1 %vm957_vm2, %v834_v47 }
 0x114   : > { %4390 = vmatpush1.msk.msra.mxu1 %vm957_vm2, %v832_v45 }
 0x115   : > { %4391 = vmatmul.mubr.msk.f32.vlgmr.msra.gmra.mrb[2].mxu1 %vm932_vm3, %v924_v48  ;;  %4399 = vmatprep.subr.msk.mxu1 %vm957_vm2, %v1078_v46 }
 0x116   : > { %1034 = vmatprep.mubr.f32.mxu1 %v8441_v7  ;;  %4400 = vmatpush1.msk.msra.mxu1 %vm957_vm2, %v743_v44  ;;  %v5519_v44 = vrot.slane %v5455_v15, %v5472_v23 }
 0x117   : > { %4409 = vmatprep.subr.msk.mxu1 %vm957_vm2, %v913_v43 }
 0x119   : > { %4392 = vmatmul.mubr.msk.f32.gmra.mrb[4].mxu1 %vm932_vm3, %v925_v49 }
 0x11a   : > { %1040 = vmatprep.mubr.f32.mxu1 %v8441_v7 }
 0x11d   : > { %4393 = vmatmul.mubr.msk.f32.gmra.mrb[6].mxu1 %vm932_vm3, %v926_v50 }
 0x11e   : > { %1046 = vmatprep.mubr.f32.mxu1 %v8441_v7 }
 0x121   : > { %4394 = vmatmul.mubr.msk.f32.gmra.mrb[8].mxu1 %vm932_vm3, %v927_v51 }
 0x122   : > { %1052 = vmatprep.mubr.f32.mxu1 %v8441_v7 }
 0x125   : > { %4395 = vmatmul.mubr.msk.f32.gmra.mrb[10].mxu1 %vm932_vm3, %v928_v52 }
 0x126   : > { %1058 = vmatprep.mubr.f32.mxu1 %v8441_v7 }
 0x129   : > { %4396 = vmatmul.mubr.msk.f32.gmra.mrb[12].mxu1 %vm932_vm3, %v929_v53 }
 0x12a   : > { %1064 = vmatprep.mubr.f32.mxu1 %v8441_v7 }
 0x12d   : > { %4397 = vmatmul.mubr.msk.f32.gmra.mrb[14].mxu1 %vm932_vm3, %v930_v54 }
 0x12e   : > { %1070 = vmatprep.mubr.f32.mxu1 %v8441_v7 }
 0x131   : > { %4398 = vmatmul.mubr.msk.f32.gmra.mrb[16].mxu1 %vm932_vm3, %v931_v55  ;;  %v5538_v55 = vsub.s32 6, %v5439_v10 }
 0x132   : > { %1171 = vmatprep.mubr.f32.mxu1 %v8441_v7 }
 0x133   : > { %8638 = vst [vmem:[#allocation23_spill] sm:$0xff] %v5538_v55 }
 0x135   : > { %4401 = vmatmul.mubr.msk.f32.vlgmr.msra.gmra.mrb[2].mxu1 %vm932_vm3, %v916_v56 }
 0x136   : > { %4410 = vmatpush1.msk.msra.mxu1 %vm957_vm2, %v911_v42  ;;  %1177 = vmatprep.mubr.f32.mxu1 %v8441_v7  ;;  %vm2483_vm2 = vcmask 113664  }
 0x139   : > { %4402 = vmatmul.mubr.msk.f32.gmra.mrb[4].mxu1 %vm932_vm3, %v917_v57 }
 0x13a   : > { %1183 = vmatprep.mubr.f32.mxu1 %v8441_v7 }
 0x13d   : > { %4403 = vmatmul.mubr.msk.f32.gmra.mrb[6].mxu1 %vm932_vm3, %v918_v58  ;;  %v5546_v58 = vrot.slane %v5450_v14, %v5503_v35 }
 0x13e   : > { %1189 = vmatprep.mubr.f32.mxu1 %v8441_v7 }
 0x141   : > { %4404 = vmatmul.mubr.msk.f32.gmra.mrb[8].mxu1 %vm932_vm3, %v919_v59  ;;  %v5550_v59 = vrot.slane %v5455_v15, %v5503_v35 }
 0x142   : > { %1195 = vmatprep.mubr.f32.mxu1 %v8441_v7 }
 0x145   : > { %4405 = vmatmul.mubr.msk.f32.gmra.mrb[10].mxu1 %vm932_vm3, %v920_v60 }
 0x146   : > { %1201 = vmatprep.mubr.f32.mxu1 %v8441_v7 }
 0x149   : > { %4406 = vmatmul.mubr.msk.f32.gmra.mrb[12].mxu1 %vm932_vm3, %v921_v61 }
 0x14a   : > { %1207 = vmatprep.mubr.f32.mxu1 %v8441_v7 }
 0x14d   : > { %4407 = vmatmul.mubr.msk.f32.gmra.mrb[14].mxu1 %vm932_vm3, %v922_v62 }
 0x14e   : > { %1213 = vmatprep.mubr.f32.mxu1 %v8441_v7 }
 0x151   : > { %4408 = vmatmul.mubr.msk.f32.gmra.mrb[16].mxu1 %vm932_vm3, %v923_v63 }
 0x152   : > { %1322 = vmatprep.mubr.f32.mxu1 %v8441_v7 }
 0x155   : > { %4411 = vmatmul.mubr.msk.f32.vlgmr.msra.gmra.mrb[2].mxu1 %vm932_vm3, %v1220_v0 }
 0x156   : > { %1328 = vmatprep.mubr.f32.mxu1 %v8441_v7 }
 0x159   : > { %4412 = vmatmul.mubr.msk.f32.gmra.mrb[4].mxu1 %vm932_vm3, %v1221_v1 }
 0x15a   : > { %1334 = vmatprep.mubr.f32.mxu1 %v8441_v7 }
 0x15d   : > { %4413 = vmatmul.mubr.msk.f32.gmra.mrb[6].mxu1 %vm932_vm3, %v1222_v2  ;;  %v5562_v2 = vrot.slane %v5450_v14, %v5538_v55 }
 0x15e   : > { %1340 = vmatprep.mubr.f32.mxu1 %v8441_v7 }
 0x161   : > { %4414 = vmatmul.mubr.msk.f32.gmra.mrb[8].mxu1 %vm932_vm3, %v1223_v3 }
 0x162   : > { %1346 = vmatprep.mubr.f32.mxu1 %v8441_v7 }
 0x165   : > { %4415 = vmatmul.mubr.msk.f32.gmra.mrb[10].mxu1 %vm932_vm3, %v1224_v4 }
 0x166   : > { %1352 = vmatprep.mubr.f32.mxu1 %v8441_v7 }
 0x169   : > { %4416 = vmatmul.mubr.msk.f32.gmra.mrb[12].mxu1 %vm932_vm3, %v1225_v5  ;;  %v5568_v5 = vrot.slane %v5455_v15, %v5538_v55 }
 0x16a   : > { %1358 = vmatprep.mubr.f32.mxu1 %v8441_v7 }
 0x16d   : > { %4417 = vmatmul.mubr.msk.f32.gmra.mrb[14].mxu1 %vm932_vm3, %v1226_v6  ;;  %v5571_v6 = vsub.s32 7, %v5439_v10 }
 0x16e   : > { %1364 = vmatprep.mubr.f32.mxu1 %v8441_v7 }
 0x16f   : > { %8639 = vst [vmem:[#allocation24_spill] sm:$0xff] %v5571_v6 }
 0x171   : > { %4418 = vmatmul.mubr.msk.f32.gmra.mrb[16].mxu1 %vm932_vm3, %v1227_v8 }
 0x228   : > { %v1324_v18 = vpop.f32.mrb[2].mxu1 }
 0x229   : > { %v1435_v19 = vadd.f32 %v1398_v13, %v1324_v18  ;;  %v1326_v20 = vpop.f32.mrb[3].mxu1 }
 0x22a   : > { %v1436_v24 = vadd.f32 %v1398_v13, %v1326_v20 }
 0x22b   : > { %v5482_v27 = vmax.f32 %v1435_v19, 0.0 }
 0x22c   : > { %v5496_v32 = vmax.f32 %v1436_v24, 0.0  ;;  %v1330_v33 = vpop.f32.mrb[4].mxu1 }
 0x22d   : > { %8633 = vst [vmem:[#allocation18_spill] sm:$0xff] %v5482_v27  ;;  %v1437_v36 = vadd.f32 %v1403_v31, %v1330_v33  ;;  %v1332_v37 = vpop.f32.mrb[5].mxu1  ;;  %v1607_v38 = vadd.f32 %v5465_v21, %v5482_v27  ;;  %v1511_v39 = vadd.f32 %v5469_v22, %v5482_v27  ;;  %v1655_v46 = vadd.f32 %v5486_v28, %v5482_v27 }
 0x22e   : > { %8634 = vst [vmem:[#allocation19_spill] sm:$0xff] %v5496_v32  ;;  %v1438_v41 = vadd.f32 %v1403_v31, %v1332_v37  ;;  %v1608_v42 = vadd.f32 %v5476_v25, %v5496_v32  ;;  %v1512_v43 = vadd.f32 %v5480_v26, %v5496_v32  ;;  %v1656_v47 = vadd.f32 %v5490_v29, %v5496_v32 }
 0x22f   : > { %v5521_v45 = vmax.f32 %v1437_v36, 0.0  ;;  %v1559_v48 = vadd.f32 %v5494_v30, %v5482_v27  ;;  %v1560_v53 = vadd.f32 %v5500_v34, %v5496_v32  ;;  %v1703_v56 = vadd.f32 %v5511_v40, %v5482_v27 }
 0x230   : > { %v5529_v49 = vmax.f32 %v1438_v41, 0.0  ;;  %v5531_v50 = vpop.f32.mrb[6].mxu1  ;;  %v1623_v51 = vmax.f32 %v1607_v38, %v1608_v42  ;;  %v1527_v52 = vmax.f32 %v1511_v39, %v1512_v43  ;;  %v1704_v57 = vadd.f32 %v5519_v44, %v5496_v32  ;;  %v5604_v43 = vld [vmem:[%s8408_s9 + $0x10] sm:$0xff] }
 0x231   : > { %8636 = vst [vmem:[#allocation21_spill] sm:$0xff] %v5521_v45  ;;  %v5535_v54 = vpop.f32.mrb[7].mxu1  ;;  %v1671_v61 = vmax.f32 %v1655_v46, %v1656_v47  ;;  %v1575_v62 = vmax.f32 %v1559_v48, %v1560_v53  ;;  %v1561_v63 = vadd.f32 %v5494_v30, %v5521_v45  ;;  %v1751_v4 = vadd.f32 %v5546_v58, %v5482_v27 }
 0x232   : > { %8637 = vst [vmem:[#allocation22_spill] sm:$0xff] %v5529_v49  ;;  %1624 = vmax.xlane.f32.xlu1 %v1623_v51  ;;  %1528 = vmax.xlane.f32.xlu0 %v1527_v52  ;;  %v1562_v0 = vadd.f32 %v5500_v34, %v5529_v49  ;;  %v1719_v3 = vmax.f32 %v1703_v56, %v1704_v57 }
 0x233   : > { %v1752_v18 = vadd.f32 %v5550_v59, %v5496_v32  ;;  %v1609_v19 = vadd.f32 %v5465_v21, %v5521_v45  ;;  %v1610_v20 = vadd.f32 %v5476_v25, %v5529_v49  ;;  %v1799_v10 = vadd.f32 %v5562_v2, %v5482_v27 }
 0x234   : > { %v5552_v60 = vpop.f32.mrb[8].mxu1  ;;  %v1578_v13 = vmax.f32 %v1561_v63, %v1562_v0  ;;  %v1800_v31 = vadd.f32 %v5568_v5, %v5496_v32  ;;  %v5589_v33 = vrot.slane %v5450_v14, %v5571_v6  ;;  %v5593_v36 = vrot.slane %v5455_v15, %v5571_v6  ;;  %v5609_v14 = vld [vmem:[%s8408_s9 + $0x18] sm:$0xff] }
 0x235   : > { %v5558_v1 = vpop.f32.mrb[9].mxu1  ;;  %v1767_v38 = vmax.f32 %v1751_v4, %v1752_v18  ;;  %v1626_v39 = vmax.f32 %v1609_v19, %v1610_v20  ;;  %v1657_v41 = vadd.f32 %v5486_v28, %v5521_v45  ;;  %v1658_v42 = vadd.f32 %v5490_v29, %v5529_v49 }
 0x236   : > { %1672 = vmax.xlane.f32.xlu1 %v1671_v61  ;;  %1576 = vmax.xlane.f32.xlu0 %v1575_v62  ;;  %8640 = vst [vmem:[#allocation25_spill] sm:$0xff] %v5593_v36  ;;  %v1815_v46 = vmax.f32 %v1799_v10, %v1800_v31  ;;  %v1847_v47 = vadd.f32 %v5589_v33, %v5482_v27 }
 0x237   : > { %v5617_v48 = vrot.slane %v5604_v43, %v5445_v12  ;;  %v5621_v51 = vrot.slane %v5609_v14, %v5445_v12  ;;  %v1674_v53 = vmax.f32 %v1657_v41, %v1658_v42  ;;  %v1848_v56 = vadd.f32 %v5593_v36, %v5496_v32 }
 0x238   : > { %v5573_v8 = vpop.f32.mrb[10].mxu1  ;;  %v1705_v57 = vadd.f32 %v5511_v40, %v5521_v45  ;;  %v1706_v61 = vadd.f32 %v5519_v44, %v5529_v49  ;;  %v5643_v4 = vrot.slane %v5609_v14, %v5461_v17  ;;  %v1753_v20 = vadd.f32 %v5546_v58, %v5521_v45 }
 0x239   : > { %v5581_v24 = vpop.f32.mrb[11].mxu1  ;;  %8641 = vst [vmem:[#allocation26_spill] sm:$0xff] %v5617_v48  ;;  %v1895_v63 = vadd.f32 %v5617_v48, %v5482_v27  ;;  %v1896_v0 = vadd.f32 %v5621_v51, %v5496_v32  ;;  %v1863_v18 = vmax.f32 %v1847_v47, %v1848_v56  ;;  %v1754_v10 = vadd.f32 %v5550_v59, %v5529_v49 }
 0x23a   : > { %1720 = vmax.xlane.f32.xlu1 %v1719_v3  ;;  %1579 = vmax.xlane.f32.xlu0 %v1578_v13  ;;  %v5639_v3 = vrot.slane %v5604_v43, %v5461_v17  ;;  %8642 = vst [vmem:[#allocation27_spill] sm:$0xff] %v5643_v4  ;;  %v1722_v19 = vmax.f32 %v1705_v57, %v1706_v61 }
 0x23b   : > { %v5657_v41 = vrot.slane %v5604_v43, %v5472_v23  ;;  %v5661_v42 = vrot.slane %v5609_v14, %v5472_v23  ;;  %v1944_v47 = vadd.f32 %v5643_v4, %v5496_v32  ;;  %v1802_v56 = vadd.f32 %v5568_v5, %v5529_v49 }
 0x23c   : > { %v5595_v37 = vpop.f32.mrb[12].mxu1  ;;  %v5675_v23 = vrot.slane %v5604_v43, %v5503_v35  ;;  %v5705_v7 = vrot.slane %v5604_v43, %v5458_v16 }
 0x23d   : > { %v5611_v15 = vpop.f32.mrb[13].mxu1  ;;  %8643 = vst [vmem:[#allocation28_spill] sm:$0xff] %v5657_v41  ;;  %8644 = vst [vmem:[#allocation29_spill] sm:$0xff] %v5661_v42  ;;  %v2087_v57 = vadd.f32 %v5657_v41, %v5482_v27  ;;  %v2088_v61 = vadd.f32 %v5661_v42, %v5496_v32 }
 0x23e   : > { %1768 = vmax.xlane.f32.xlu1 %v1767_v38  ;;  %1627 = vmax.xlane.f32.xlu0 %v1626_v39  ;;  %v1911_v38 = vmax.f32 %v1895_v63, %v1896_v0  ;;  %v1943_v39 = vadd.f32 %v5639_v3, %v5482_v27  ;;  %v5679_v63 = vrot.slane %v5609_v14, %v5503_v35 }
 0x23f   : > { %8647 = vst [vmem:[#allocation32_spill] sm:$0xff] %v5705_v7  ;;  %v5737_v35 = vrot.slane %v5604_v43, %v5571_v6 }
 0x240   : > { %v5623_v52 = vpop.f32.mrb[14].mxu1  ;;  %8645 = vst [vmem:[#allocation30_spill] sm:$0xff] %v5679_v63  ;;  %v1959_v0 = vmax.f32 %v1943_v39, %v1944_v47  ;;  %v5695_v39 = vrot.slane %v5609_v14, %v5442_v11  ;;  %v2103_v47 = vmax.f32 %v2087_v57, %v2088_v61  ;;  %v5709_v57 = vrot.slane %v5609_v14, %v5458_v16 }
 0x241   : > { %v5631_v62 = vpop.f32.mrb[15].mxu1  ;;  %8651 = vst [vmem:[#allocation36_spill] sm:$0xff] %v5737_v35 }
 0x242   : > { %1816 = vmax.xlane.f32.xlu1 %v1815_v46  ;;  %1675 = vmax.xlane.f32.xlu0 %v1674_v53  ;;  %v1770_v46 = vmax.f32 %v1753_v20, %v1754_v10  ;;  %v1801_v53 = vadd.f32 %v5562_v2, %v5521_v45  ;;  %v1850_v20 = vadd.f32 %v5593_v36, %v5529_v49 }
 0x243   : > { %v2135_v10 = vadd.f32 %v5675_v23, %v5482_v27  ;;  %8648 = vst [vmem:[#allocation33_spill] sm:$0xff] %v5709_v57 }
 0x244   : > { %v5645_v13 = vpop.f32.mrb[16].mxu1 }
 0x245   : > { %v5651_v31 = vpop.f32.mrb[17].mxu1 }
 0x246   : > { %1864 = vmax.xlane.f32.xlu1 %v1863_v18  ;;  %1723 = vmax.xlane.f32.xlu0 %v1722_v19  ;;  %v1818_v18 = vmax.f32 %v1801_v53, %v1802_v56  ;;  %v1849_v19 = vadd.f32 %v5589_v33, %v5521_v45  ;;  %v1897_v56 = vadd.f32 %v5617_v48, %v5521_v45 }
 0x248   : > { %v1866_v53 = vmax.f32 %v1849_v19, %v1850_v20  ;;  %v1992_v19 = vadd.f32 %v5695_v39, %v5496_v32  ;;  %v1945_v20 = vadd.f32 %v5639_v3, %v5521_v45 }
 0x24a   : > { %1912 = vmax.xlane.f32.xlu1 %v1911_v38  ;;  %1771 = vmax.xlane.f32.xlu0 %v1770_v46  ;;  %v2136_v38 = vadd.f32 %v5679_v63, %v5496_v32  ;;  %v5691_v46 = vrot.slane %v5604_v43, %v5442_v11 }
 0x24c   : > { %8646 = vst [vmem:[#allocation31_spill] sm:$0xff] %v5691_v46  ;;  %v1991_v9 = vadd.f32 %v5691_v46, %v5482_v27 }
 0x24e   : > { %1960 = vmax.xlane.f32.xlu1 %v1959_v0  ;;  %1819 = vmax.xlane.f32.xlu0 %v1818_v18  ;;  %v1898_v0 = vadd.f32 %v5621_v51, %v5529_v49  ;;  %v2151_v18 = vmax.f32 %v2135_v10, %v2136_v38  ;;  %v1946_v10 = vadd.f32 %v5643_v4, %v5529_v49 }
 0x24f   : > { %v2039_v38 = vadd.f32 %v5705_v7, %v5482_v27 }
 0x250   : > { %v1914_v61 = vmax.f32 %v1897_v56, %v1898_v0  ;;  %v5727_v56 = vrot.slane %v5609_v14, %v5538_v55  ;;  %v2007_v0 = vmax.f32 %v1991_v9, %v1992_v19  ;;  %v1962_v16 = vmax.f32 %v1945_v20, %v1946_v10  ;;  %v1408_v19 = vpop.permute.xlu1 %1407 }
 0x251   : > { %v5741_v9 = vrot.slane %v5609_v14, %v5571_v6  ;;  %v2231_v14 = vadd.f32 %v5737_v35, %v5482_v27  ;;  %v1993_v6 = vadd.f32 %v5691_v46, %v5521_v45 }
 0x252   : > { %2104 = vmax.xlane.f32.xlu1 %v2103_v47  ;;  %1867 = vmax.xlane.f32.xlu0 %v1866_v53  ;;  %v2040_v47 = vadd.f32 %v5709_v57, %v5496_v32  ;;  %v5723_v53 = vrot.slane %v5604_v43, %v5538_v55  ;;  %8650 = vst [vmem:[#allocation35_spill] sm:$0xff] %v5727_v56 }
 0x253   : > { %8652 = vst [vmem:[#allocation37_spill] sm:$0xff] %v5741_v9  ;;  %v2184_v10 = vadd.f32 %v5727_v56, %v5496_v32  ;;  %v1439_v43 = vadd.f32 %v1408_v19, %v5531_v50  ;;  %v1994_v55 = vadd.f32 %v5695_v39, %v5529_v49 }
 0x254   : > { %8649 = vst [vmem:[#allocation34_spill] sm:$0xff] %v5723_v53  ;;  %v2055_v11 = vmax.f32 %v2039_v38, %v2040_v47  ;;  %v2183_v17 = vadd.f32 %v5723_v53, %v5482_v27  ;;  %v2138_v38 = vadd.f32 %v5679_v63, %v5529_v49  ;;  %v1440_v47 = vadd.f32 %v1408_v19, %v5535_v54 }
 0x255   : > { %v2041_v54 = vadd.f32 %v5705_v7, %v5521_v45  ;;  %v2042_v19 = vadd.f32 %v5709_v57, %v5529_v49 }
 0x256   : > { %2152 = vmax.xlane.f32.xlu1 %v2151_v18  ;;  %1915 = vmax.xlane.f32.xlu0 %v1914_v61  ;;  %v2089_v18 = vadd.f32 %v5657_v41, %v5521_v45  ;;  %v2090_v61 = vadd.f32 %v5661_v42, %v5529_v49  ;;  %v5761_v50 = vmax.f32 %v1440_v47, 0.0 }
 0x258   : > { %v2106_v20 = vmax.f32 %v2089_v18, %v2090_v61  ;;  %v2199_v18 = vmax.f32 %v2183_v17, %v2184_v10  ;;  %8654 = vst [vmem:[#allocation39_spill] sm:$0xff] %v5761_v50  ;;  %v1413_v17 = vpop.permute.xlu1 %1412  ;;  %v2010_v10 = vmax.f32 %v1993_v6, %v1994_v55  ;;  %v2186_v55 = vadd.f32 %v5727_v56, %v5529_v49 }
 0x259   : > { %v1442_v47 = vadd.f32 %v1413_v17, %v5558_v1  ;;  %v2233_v1 = vadd.f32 %v5737_v35, %v5521_v45 }
 0x25a   : > { %2008 = vmax.xlane.f32.xlu1 %v2007_v0  ;;  %1963 = vmax.xlane.f32.xlu0 %v1962_v16  ;;  %v2137_v16 = vadd.f32 %v5675_v23, %v5521_v45  ;;  %v2232_v0 = vadd.f32 %v5741_v9, %v5496_v32 }
 0x25c   : > { %v2154_v61 = vmax.f32 %v2137_v16, %v2138_v38  ;;  %v1513_v16 = vadd.f32 %v5469_v22, %v5521_v45  ;;  %v1514_v38 = vadd.f32 %v5480_v26, %v5529_v49 }
 0x25e   : > { %2056 = vmax.xlane.f32.xlu1 %v2055_v11  ;;  %2107 = vmax.xlane.f32.xlu0 %v2106_v20  ;;  %v5759_v11 = vmax.f32 %v1439_v43, 0.0  ;;  %v2247_v20 = vmax.f32 %v2231_v14, %v2232_v0  ;;  %v1441_v43 = vadd.f32 %v1413_v17, %v5552_v60  ;;  %v1530_v12 = vmax.f32 %v1513_v16, %v1514_v38 }
 0x25f   : > { %v1516_v14 = vadd.f32 %v5480_v26, %v5761_v50  ;;  %v5783_v60 = vmax.f32 %v1442_v47, 0.0 }
 0x260   : > { %8653 = vst [vmem:[#allocation38_spill] sm:$0xff] %v5759_v11  ;;  %v1515_v6 = vadd.f32 %v5469_v22, %v5759_v11  ;;  %v5781_v0 = vmax.f32 %v1441_v43, 0.0  ;;  %v1611_v16 = vadd.f32 %v5465_v21, %v5759_v11  ;;  %v1612_v43 = vadd.f32 %v5476_v25, %v5761_v50 }
 0x261   : > { %8656 = vst [vmem:[#allocation41_spill] sm:$0xff] %v5783_v60 }
 0x262   : > { %2200 = vmax.xlane.f32.xlu1 %v2199_v18  ;;  %2155 = vmax.xlane.f32.xlu0 %v2154_v61  ;;  %v2058_v18 = vmax.f32 %v2041_v54, %v2042_v19  ;;  %v2185_v61 = vadd.f32 %v5723_v53, %v5521_v45  ;;  %8655 = vst [vmem:[#allocation40_spill] sm:$0xff] %v5781_v0 }
 0x263   : > { %v2234_v54 = vadd.f32 %v5741_v9, %v5529_v49  ;;  %v1533_v17 = vmax.f32 %v1515_v6, %v1516_v14  ;;  %v1517_v47 = vadd.f32 %v5469_v22, %v5781_v0  ;;  %v1629_v6 = vmax.f32 %v1611_v16, %v1612_v43 }
 0x264   : > { %v2202_v19 = vmax.f32 %v2185_v61, %v2186_v55  ;;  %v1659_v61 = vadd.f32 %v5486_v28, %v5759_v11  ;;  %v1660_v55 = vadd.f32 %v5490_v29, %v5761_v50  ;;  %v1614_v16 = vadd.f32 %v5476_v25, %v5783_v60 }
 0x265   : > { %v1755_v43 = vadd.f32 %v5546_v58, %v5759_v11 }
 0x266   : > { %2248 = vmax.xlane.f32.xlu1 %v2247_v20  ;;  %2011 = vmax.xlane.f32.xlu0 %v2010_v10  ;;  %v1563_v20 = vadd.f32 %v5494_v30, %v5759_v11  ;;  %v1564_v10 = vadd.f32 %v5500_v34, %v5761_v50 }
 0x268   : > { %v1581_v38 = vmax.f32 %v1563_v20, %v1564_v10  ;;  %v1677_v20 = vmax.f32 %v1659_v61, %v1660_v55  ;;  %v1661_v61 = vadd.f32 %v5486_v28, %v5781_v0  ;;  %v1662_v55 = vadd.f32 %v5490_v29, %v5783_v60 }
 0x26a   : > { %2059 = vmax.xlane.f32.xlu0 %v2058_v18  ;;  %1531 = vmax.xlane.f32.xlu1 %v1530_v12  ;;  %v2250_v12 = vmax.f32 %v2233_v1, %v2234_v54  ;;  %v1518_v18 = vadd.f32 %v5480_v26, %v5783_v60  ;;  %v1565_v1 = vadd.f32 %v5494_v30, %v5781_v0 }
 0x26b   : > { %v1566_v54 = vadd.f32 %v5500_v34, %v5783_v60 }
 0x26c   : > { %v1536_v14 = vmax.f32 %v1517_v47, %v1518_v18  ;;  %v1756_v18 = vadd.f32 %v5550_v59, %v5761_v50 }
 0x26d   : > { %v1584_v10 = vmax.f32 %v1565_v1, %v1566_v54  ;;  %v1680_v54 = vmax.f32 %v1661_v61, %v1662_v55 }
 0x26e   : > { %2203 = vmax.xlane.f32.xlu0 %v2202_v19  ;;  %1534 = vmax.xlane.f32.xlu1 %v1533_v17  ;;  %v1707_v19 = vadd.f32 %v5511_v40, %v5759_v11  ;;  %v1708_v17 = vadd.f32 %v5519_v44, %v5761_v50  ;;  %v1773_v1 = vmax.f32 %v1755_v43, %v1756_v18 }
 0x26f   : > { %v1758_v43 = vadd.f32 %v5550_v59, %v5783_v60  ;;  %v1900_v18 = vadd.f32 %v5621_v51, %v5761_v50 }
 0x272   : > { %2251 = vmax.xlane.f32.xlu0 %v2250_v12  ;;  %1582 = vmax.xlane.f32.xlu1 %v1581_v38  ;;  %v1613_v12 = vadd.f32 %v5465_v21, %v5781_v0  ;;  %v1725_v38 = vmax.f32 %v1707_v19, %v1708_v17  ;;  %v1709_v19 = vadd.f32 %v5511_v40, %v5781_v0 }
 0x273   : > { %v1710_v17 = vadd.f32 %v5519_v44, %v5783_v60 }
 0x274   : > { %v1632_v47 = vmax.f32 %v1613_v12, %v1614_v16  ;;  %v1852_v16 = vadd.f32 %v5593_v36, %v5761_v50 }
 0x275   : > { %v1728_v12 = vmax.f32 %v1709_v19, %v1710_v17 }
 0x276   : > { %1630 = vmax.xlane.f32.xlu1 %v1629_v6  ;;  %1537 = vmax.xlane.f32.xlu0 %v1536_v14  ;;  %v1803_v6 = vadd.f32 %v5562_v2, %v5759_v11  ;;  %v1804_v14 = vadd.f32 %v5568_v5, %v5761_v50 }
 0x27a   : > { %1678 = vmax.xlane.f32.xlu1 %v1677_v20  ;;  %1585 = vmax.xlane.f32.xlu0 %v1584_v10  ;;  %v1821_v20 = vmax.f32 %v1803_v6, %v1804_v14  ;;  %v1851_v10 = vadd.f32 %v5589_v33, %v5759_v11  ;;  %v1805_v6 = vadd.f32 %v5562_v2, %v5781_v0 }
 0x27b   : > { %v1806_v14 = vadd.f32 %v5568_v5, %v5783_v60 }
 0x27c   : > { %v1869_v61 = vmax.f32 %v1851_v10, %v1852_v16  ;;  %v1854_v10 = vadd.f32 %v5593_v36, %v5783_v60  ;;  %v2091_v16 = vadd.f32 %v5657_v41, %v5759_v11 }
 0x27d   : > { %v1824_v17 = vmax.f32 %v1805_v6, %v1806_v14 }
 0x27e   : > { %1726 = vmax.xlane.f32.xlu1 %v1725_v38  ;;  %1633 = vmax.xlane.f32.xlu0 %v1632_v47  ;;  %v1757_v38 = vadd.f32 %v5546_v58, %v5781_v0  ;;  %v1899_v47 = vadd.f32 %v5617_v48, %v5759_v11 }
 0x280   : > { %v1776_v55 = vmax.f32 %v1757_v38, %v1758_v43  ;;  %v1917_v19 = vmax.f32 %v1899_v47, %v1900_v18  ;;  %v2092_v43 = vadd.f32 %v5661_v42, %v5761_v50  ;;  %v1901_v47 = vadd.f32 %v5617_v48, %v5781_v0 }
 0x281   : > { %v1902_v18 = vadd.f32 %v5621_v51, %v5783_v60 }
 0x282   : > { %1774 = vmax.xlane.f32.xlu1 %v1773_v1  ;;  %1681 = vmax.xlane.f32.xlu0 %v1680_v54  ;;  %v1947_v1 = vadd.f32 %v5639_v3, %v5759_v11  ;;  %v1948_v54 = vadd.f32 %v5643_v4, %v5761_v50  ;;  %v2109_v6 = vmax.f32 %v2091_v16, %v2092_v43 }
 0x283   : > { %v1920_v14 = vmax.f32 %v1901_v47, %v1902_v18  ;;  %v2094_v16 = vadd.f32 %v5661_v42, %v5783_v60  ;;  %v2044_v43 = vadd.f32 %v5709_v57, %v5761_v50 }
 0x286   : > { %1822 = vmax.xlane.f32.xlu1 %v1821_v20  ;;  %1729 = vmax.xlane.f32.xlu0 %v1728_v12  ;;  %v1853_v20 = vadd.f32 %v5589_v33, %v5781_v0  ;;  %v1965_v12 = vmax.f32 %v1947_v1, %v1948_v54  ;;  %v1949_v1 = vadd.f32 %v5639_v3, %v5781_v0 }
 0x287   : > { %v1950_v54 = vadd.f32 %v5643_v4, %v5783_v60 }
 0x288   : > { %v1872_v38 = vmax.f32 %v1853_v20, %v1854_v10  ;;  %v1996_v10 = vadd.f32 %v5695_v39, %v5761_v50 }
 0x289   : > { %v1968_v20 = vmax.f32 %v1949_v1, %v1950_v54  ;;  %v2187_v54 = vadd.f32 %v5723_v53, %v5759_v11 }
 0x28a   : > { %1870 = vmax.xlane.f32.xlu1 %v1869_v61  ;;  %1777 = vmax.xlane.f32.xlu0 %v1776_v55  ;;  %v2139_v61 = vadd.f32 %v5675_v23, %v5759_v11  ;;  %v2140_v55 = vadd.f32 %v5679_v63, %v5761_v50 }
 0x28e   : > { %1918 = vmax.xlane.f32.xlu1 %v1917_v19  ;;  %1825 = vmax.xlane.f32.xlu0 %v1824_v17  ;;  %v2157_v19 = vmax.f32 %v2139_v61, %v2140_v55  ;;  %v1995_v17 = vadd.f32 %v5691_v46, %v5759_v11  ;;  %v2141_v61 = vadd.f32 %v5675_v23, %v5781_v0 }
 0x28f   : > { %v2142_v55 = vadd.f32 %v5679_v63, %v5783_v60 }
 0x290   : > { %v2013_v47 = vmax.f32 %v1995_v17, %v1996_v10  ;;  %v1997_v10 = vadd.f32 %v5691_v46, %v5781_v0 }
 0x292   : > { %1966 = vmax.xlane.f32.xlu1 %v1965_v12  ;;  %1873 = vmax.xlane.f32.xlu0 %v1872_v38  ;;  %v2093_v12 = vadd.f32 %v5657_v41, %v5781_v0  ;;  %v2043_v38 = vadd.f32 %v5705_v7, %v5759_v11 }
 0x294   : > { %v2112_v18 = vmax.f32 %v2093_v12, %v2094_v16  ;;  %v2061_v17 = vmax.f32 %v2043_v38, %v2044_v43  ;;  %v1998_v12 = vadd.f32 %v5695_v39, %v5783_v60  ;;  %v2236_v38 = vadd.f32 %v5741_v9, %v5761_v50 }
 0x295   : > { %v2045_v43 = vadd.f32 %v5705_v7, %v5781_v0 }
 0x296   : > { %2110 = vmax.xlane.f32.xlu1 %v2109_v6  ;;  %1921 = vmax.xlane.f32.xlu0 %v1920_v14  ;;  %v1418_v6 = vpop.permute.xlu0 %1417 }
 0x297   : > { %v1443_v14 = vadd.f32 %v1418_v6, %v5573_v8  ;;  %v1444_v1 = vadd.f32 %v1418_v6, %v5581_v24  ;;  %v2016_v6 = vmax.f32 %v1997_v10, %v1998_v12 }
 0x299   : > { %v5899_v16 = vmax.f32 %v1443_v14, 0.0  ;;  %v5901_v8 = vmax.f32 %v1444_v1, 0.0  ;;  %v2189_v1 = vadd.f32 %v5723_v53, %v5781_v0 }
 0x29a   : > { %2158 = vmax.xlane.f32.xlu1 %v2157_v19  ;;  %1969 = vmax.xlane.f32.xlu0 %v1968_v20  ;;  %v2188_v19 = vadd.f32 %v5727_v56, %v5761_v50  ;;  %v2160_v20 = vmax.f32 %v2141_v61, %v2142_v55  ;;  %v2046_v61 = vadd.f32 %v5709_v57, %v5783_v60 }
 0x29b   : > { %8657 = vst [vmem:[#allocation42_spill] sm:$0xff] %v5899_v16  ;;  %8658 = vst [vmem:[#allocation43_spill] sm:$0xff] %v5901_v8  ;;  %v1520_v10 = vadd.f32 %v5480_v26, %v5901_v8  ;;  %v1951_v27 = vadd.f32 %v5639_v3, %v5899_v16 }
 0x29c   : > { %v2205_v24 = vmax.f32 %v2187_v54, %v2188_v19  ;;  %v2190_v54 = vadd.f32 %v5727_v56, %v5783_v60 }
 0x29e   : > { %2014 = vmax.xlane.f32.xlu1 %v2013_v47  ;;  %2113 = vmax.xlane.f32.xlu0 %v2112_v18  ;;  %v2235_v47 = vadd.f32 %v5737_v35, %v5759_v11  ;;  %v1423_v18 = vpop.permute.xlu1 %1422 }
 0x29f   : > { %v1445_v55 = vadd.f32 %v1423_v18, %v5595_v37  ;;  %v1446_v14 = vadd.f32 %v1423_v18, %v5611_v15  ;;  %v2208_v15 = vmax.f32 %v2189_v1, %v2190_v54 }
 0x2a0   : > { %v2253_v19 = vmax.f32 %v2235_v47, %v2236_v38  ;;  %v2238_v47 = vadd.f32 %v5741_v9, %v5783_v60  ;;  %v1568_v38 = vadd.f32 %v5500_v34, %v5901_v8 }
 0x2a1   : > { %v5921_v12 = vmax.f32 %v1445_v55, 0.0  ;;  %v5923_v37 = vmax.f32 %v1446_v14, 0.0 }
 0x2a2   : > { %2062 = vmax.xlane.f32.xlu1 %v2061_v17  ;;  %2161 = vmax.xlane.f32.xlu0 %v2160_v20  ;;  %v2064_v17 = vmax.f32 %v2045_v43, %v2046_v61  ;;  %v1519_v20 = vadd.f32 %v5469_v22, %v5899_v16  ;;  %v1615_v43 = vadd.f32 %v5465_v21, %v5899_v16 }
 0x2a3   : > { %8659 = vst [vmem:[#allocation44_spill] sm:$0xff] %v5921_v12  ;;  %8660 = vst [vmem:[#allocation45_spill] sm:$0xff] %v5923_v37  ;;  %v1616_v61 = vadd.f32 %v5476_v25, %v5901_v8  ;;  %v1521_v1 = vadd.f32 %v5469_v22, %v5921_v12  ;;  %v1522_v54 = vadd.f32 %v5480_v26, %v5923_v37 }
 0x2a4   : > { %v1539_v18 = vmax.f32 %v1519_v20, %v1520_v10  ;;  %v1857_v49 = vadd.f32 %v5589_v33, %v5921_v12 }
 0x2a5   : > { %v1635_v20 = vmax.f32 %v1615_v43, %v1616_v61  ;;  %v1542_v10 = vmax.f32 %v1521_v1, %v1522_v54  ;;  %v1617_v43 = vadd.f32 %v5465_v21, %v5921_v12  ;;  %v1618_v61 = vadd.f32 %v5476_v25, %v5923_v37 }
 0x2a6   : > { %2206 = vmax.xlane.f32.xlu1 %v2205_v24  ;;  %2017 = vmax.xlane.f32.xlu0 %v2016_v6  ;;  %v2237_v24 = vadd.f32 %v5737_v35, %v5781_v0  ;;  %v1567_v6 = vadd.f32 %v5494_v30, %v5899_v16  ;;  %v1759_v1 = vadd.f32 %v5546_v58, %v5899_v16 }
 0x2a7   : > { %v1760_v54 = vadd.f32 %v5550_v59, %v5901_v8 }
 0x2a8   : > { %v2256_v55 = vmax.f32 %v2237_v24, %v2238_v47  ;;  %v1587_v14 = vmax.f32 %v1567_v6, %v1568_v38  ;;  %v1570_v24 = vadd.f32 %v5500_v34, %v5923_v37  ;;  %v1711_v47 = vadd.f32 %v5511_v40, %v5899_v16 }
 0x2a9   : > { %v1712_v38 = vadd.f32 %v5519_v44, %v5901_v8 }
 0x2aa   : > { %2254 = vmax.xlane.f32.xlu1 %v2253_v19  ;;  %2065 = vmax.xlane.f32.xlu0 %v2064_v17  ;;  %v1663_v19 = vadd.f32 %v5486_v28, %v5899_v16  ;;  %v1664_v17 = vadd.f32 %v5490_v29, %v5901_v8 }
 0x2ae   : > { %2209 = vmax.xlane.f32.xlu0 %v2208_v15  ;;  %1540 = vmax.xlane.f32.xlu1 %v1539_v18  ;;  %v1569_v15 = vadd.f32 %v5494_v30, %v5921_v12  ;;  %v1683_v18 = vmax.f32 %v1663_v19, %v1664_v17  ;;  %v1731_v19 = vmax.f32 %v1711_v47, %v1712_v38 }
 0x2af   : > { %v1638_v17 = vmax.f32 %v1617_v43, %v1618_v61  ;;  %v1779_v47 = vmax.f32 %v1759_v1, %v1760_v54  ;;  %v1713_v43 = vadd.f32 %v5511_v40, %v5921_v12  ;;  %v1714_v61 = vadd.f32 %v5519_v44, %v5923_v37 }
 0x2b0   : > { %v1590_v6 = vmax.f32 %v1569_v15, %v1570_v24  ;;  %v1855_v1 = vadd.f32 %v5589_v33, %v5899_v16  ;;  %v1856_v54 = vadd.f32 %v5593_v36, %v5901_v8 }
 0x2b2   : > { %2257 = vmax.xlane.f32.xlu0 %v2256_v55  ;;  %1588 = vmax.xlane.f32.xlu1 %v1587_v14  ;;  %v5957_v55 = vpop.permute.xlu0 %1427  ;;  %v5959_v14 = vpop.permute.xlu1 %1432  ;;  %v1875_v11 = vmax.f32 %v1855_v1, %v1856_v54 }
 0x2b6   : > { %1636 = vmax.xlane.f32.xlu1 %v1635_v20  ;;  %1543 = vmax.xlane.f32.xlu0 %v1542_v10  ;;  %v1665_v20 = vadd.f32 %v5486_v28, %v5921_v12  ;;  %v1666_v10 = vadd.f32 %v5490_v29, %v5923_v37 }
 0x2b8   : > { %v1686_v38 = vmax.f32 %v1665_v20, %v1666_v10  ;;  %v1734_v10 = vmax.f32 %v1713_v43, %v1714_v61  ;;  %v1903_v43 = vadd.f32 %v5617_v48, %v5899_v16  ;;  %v1904_v61 = vadd.f32 %v5621_v51, %v5901_v8 }
 0x2ba   : > { %1684 = vmax.xlane.f32.xlu1 %v1683_v18  ;;  %1591 = vmax.xlane.f32.xlu0 %v1590_v6  ;;  %v1807_v18 = vadd.f32 %v5562_v2, %v5899_v16  ;;  %v1808_v6 = vadd.f32 %v5568_v5, %v5901_v8 }
 0x2bc   : > { %v1827_v60 = vmax.f32 %v1807_v18, %v1808_v6 }
 0x2be   : > { %1732 = vmax.xlane.f32.xlu1 %v1731_v19  ;;  %1639 = vmax.xlane.f32.xlu0 %v1638_v17 }
 0x2bf   : > { %v5969_v15 = vpop.xlane.xlu1 %1624  ;;  %v5971_v24 = vpop.xlane.xlu0 %1528 }
 0x2c0   : > { %8661 = vst [vmem:[#allocation46_spill] sm:$0xff] %v5969_v15 }
 0x2c2   : > { %1780 = vmax.xlane.f32.xlu1 %v1779_v47  ;;  %1687 = vmax.xlane.f32.xlu0 %v1686_v38  ;;  %v1761_v47 = vadd.f32 %v5546_v58, %v5921_v12  ;;  %v1762_v38 = vadd.f32 %v5550_v59, %v5923_v37 }
 0x2c3   : > { %v5981_v19 = vpop.xlane.xlu1 %1672  ;;  %v5983_v17 = vpop.xlane.xlu0 %1576 }
 0x2c4   : > { %8662 = vst [vmem:[#allocation47_spill] sm:$0xff] %v5981_v19  ;;  %v2368_v20 = vsel %vm2367_vm4, %v5971_v24, %v5983_v17 }
 0x2c5   : > { %v2377_v18 = vsel %vm2376_vm5, %v2368_v20, %v5969_v15  ;;  %v1782_v20 = vmax.f32 %v1761_v47, %v1762_v38  ;;  %v1952_v47 = vadd.f32 %v5643_v4, %v5901_v8 }
 0x2c6   : > { %1828 = vmax.xlane.f32.xlu1 %v1827_v60  ;;  %1735 = vmax.xlane.f32.xlu0 %v1734_v10  ;;  %v2386_v6 = vsel %vm2385_vm6, %v2377_v18, %v5981_v19  ;;  %v1809_v60 = vadd.f32 %v5562_v2, %v5921_v12  ;;  %v1810_v10 = vadd.f32 %v5568_v5, %v5923_v37 }
 0x2c7   : > { %v6000_v0 = vpop.xlane.xlu1 %1720  ;;  %v6002_v50 = vpop.xlane.xlu0 %1579  ;;  %v1923_v18 = vmax.f32 %v1903_v43, %v1904_v61  ;;  %v1971_v45 = vmax.f32 %v1951_v27, %v1952_v47  ;;  %v1953_v47 = vadd.f32 %v5639_v3, %v5921_v12 }
 0x2c8   : > { %v2394_v32 = vsel %vm932_vm3, %v2386_v6, %v6000_v0  ;;  %v1830_v6 = vmax.f32 %v1809_v60, %v1810_v10  ;;  %v1905_v60 = vadd.f32 %v5617_v48, %v5921_v12  ;;  %v2144_v48 = vadd.f32 %v5679_v63, %v5901_v8 }
 0x2ca   : > { %1876 = vmax.xlane.f32.xlu1 %v1875_v11  ;;  %1783 = vmax.xlane.f32.xlu0 %v1782_v20  ;;  %v1858_v11 = vadd.f32 %v5593_v36, %v5923_v37  ;;  %v2095_v20 = vadd.f32 %v5657_v41, %v5899_v16 }
 0x2cb   : > { %v6014_v1 = vpop.xlane.xlu1 %1768  ;;  %v6016_v54 = vpop.xlane.xlu0 %1627 }
 0x2cc   : > { %v2403_v38 = vsel %vm2402_vm7, %v2394_v32, %v6014_v1  ;;  %v2096_v32 = vadd.f32 %v5661_v42, %v5901_v8  ;;  %v1878_v36 = vmax.f32 %v1857_v49, %v1858_v11 }
 0x2ce   : > { %1924 = vmax.xlane.f32.xlu1 %v1923_v18  ;;  %1831 = vmax.xlane.f32.xlu0 %v1830_v6  ;;  %v1906_v18 = vadd.f32 %v5621_v51, %v5923_v37  ;;  %v2115_v19 = vmax.f32 %v2095_v20, %v2096_v32  ;;  %v1999_v20 = vadd.f32 %v5691_v46, %v5899_v16 }
 0x2cf   : > { %v6028_v43 = vpop.xlane.xlu1 %1816  ;;  %v6030_v61 = vpop.xlane.xlu0 %1675  ;;  %v2000_v32 = vadd.f32 %v5695_v39, %v5901_v8 }
 0x2d0   : > { %8663 = vst [vmem:[#allocation48_spill] sm:$0xff] %v6030_v61  ;;  %v2412_v10 = vsel %vm2411_vm8, %v2403_v38, %v6028_v43  ;;  %v2143_v61 = vadd.f32 %v5675_v23, %v5899_v16  ;;  %v1926_v49 = vmax.f32 %v1905_v60, %v1906_v18  ;;  %v2097_v18 = vadd.f32 %v5657_v41, %v5921_v12 }
 0x2d2   : > { %1972 = vmax.xlane.f32.xlu1 %v1971_v45  ;;  %1879 = vmax.xlane.f32.xlu0 %v1878_v36  ;;  %v1954_v45 = vadd.f32 %v5643_v4, %v5923_v37  ;;  %v2163_v11 = vmax.f32 %v2143_v61, %v2144_v48  ;;  %v2047_v4 = vadd.f32 %v5705_v7, %v5899_v16 }
 0x2d3   : > { %v6042_v6 = vpop.xlane.xlu1 %1864  ;;  %v6044_v15 = vpop.xlane.xlu0 %1723 }
 0x2d4   : > { %v2421_v27 = vsel %vm2420_vm9, %v2412_v10, %v6042_v6  ;;  %v1974_v10 = vmax.f32 %v1953_v47, %v1954_v45 }
 0x2d6   : > { %2116 = vmax.xlane.f32.xlu1 %v2115_v19  ;;  %1927 = vmax.xlane.f32.xlu0 %v1926_v49  ;;  %v2098_v19 = vadd.f32 %v5661_v42, %v5923_v37  ;;  %v2019_v49 = vmax.f32 %v1999_v20, %v2000_v32  ;;  %v2145_v42 = vadd.f32 %v5675_v23, %v5921_v12 }
 0x2d7   : > { %v6056_v36 = vpop.xlane.xlu1 %1912  ;;  %v6058_v38 = vpop.xlane.xlu0 %1771  ;;  %v1447_v20 = vadd.f32 %v5957_v55, %v5623_v52  ;;  %v1448_v32 = vadd.f32 %v5957_v55, %v5631_v62  ;;  %v2002_v52 = vadd.f32 %v5695_v39, %v5923_v37 }
 0x2d8   : > { %v2430_v60 = vsel %vm2429_vm10, %v2421_v27, %v6056_v36  ;;  %v2048_v27 = vadd.f32 %v5709_v57, %v5901_v8  ;;  %v2118_v45 = vmax.f32 %v2097_v18, %v2098_v19  ;;  %v2191_v18 = vadd.f32 %v5723_v53, %v5899_v16 }
 0x2d9   : > { %v6100_v62 = vmax.f32 %v1447_v20, 0.0  ;;  %v6102_v55 = vmax.f32 %v1448_v32, 0.0  ;;  %v2050_v20 = vadd.f32 %v5709_v57, %v5923_v37  ;;  %v1449_v32 = vadd.f32 %v5959_v14, %v5645_v13 }
 0x2da   : > { %2164 = vmax.xlane.f32.xlu1 %v2163_v11  ;;  %1975 = vmax.xlane.f32.xlu0 %v1974_v10  ;;  %v2146_v11 = vadd.f32 %v5679_v63, %v5923_v37  ;;  %v2192_v63 = vadd.f32 %v5727_v56, %v5901_v8 }
 0x2db   : > { %v6070_v48 = vpop.xlane.xlu1 %1960  ;;  %v6072_v61 = vpop.xlane.xlu0 %1819  ;;  %8664 = vst [vmem:[#allocation49_spill] sm:$0xff] %v6100_v62  ;;  %8665 = vst [vmem:[#allocation50_spill] sm:$0xff] %v6102_v55  ;;  %v6213_v57 = vadd.f32 %v5568_v5, %v6102_v55 }
 0x2dc   : > { %v2439_v47 = vsel %vm2438_vm11, %v2430_v60, %v6070_v48  ;;  %v2067_v60 = vmax.f32 %v2047_v4, %v2048_v27  ;;  %v2166_v19 = vmax.f32 %v2145_v42, %v2146_v11  ;;  %v2239_v42 = vadd.f32 %v5737_v35, %v5899_v16 }
 0x2dd   : > { %v2211_v11 = vmax.f32 %v2191_v18, %v2192_v63  ;;  %v2193_v18 = vadd.f32 %v5723_v53, %v5921_v12 }
 0x2de   : > { %2020 = vmax.xlane.f32.xlu1 %v2019_v49  ;;  %2119 = vmax.xlane.f32.xlu0 %v2118_v45  ;;  %v2001_v49 = vadd.f32 %v5691_v46, %v5921_v12  ;;  %v2240_v45 = vadd.f32 %v5741_v9, %v5901_v8 }
 0x2df   : > { %v6088_v10 = vpop.xlane.xlu1 %2104  ;;  %v6090_v41 = vpop.xlane.xlu0 %1867 }
 0x2e0   : > { %v2022_v46 = vmax.f32 %v2001_v49, %v2002_v52  ;;  %v2259_v63 = vmax.f32 %v2239_v42, %v2240_v45  ;;  %v2194_v49 = vadd.f32 %v5727_v56, %v5923_v37 }
 0x2e2   : > { %2068 = vmax.xlane.f32.xlu1 %v2067_v60  ;;  %2167 = vmax.xlane.f32.xlu0 %v2166_v19  ;;  %v2049_v60 = vadd.f32 %v5705_v7, %v5921_v12  ;;  %v1450_v19 = vadd.f32 %v5959_v14, %v5651_v31  ;;  %v1524_v31 = vadd.f32 %v5480_v26, %v6102_v55  ;;  %v6134_v14 = vmax.f32 %v1449_v32, 0.0 }
 0x2e3   : > { %v6104_v4 = vpop.xlane.xlu1 %2152  ;;  %v6106_v27 = vpop.xlane.xlu0 %1915 }
 0x2e4   : > { %v2070_v13 = vmax.f32 %v2049_v60, %v2050_v20  ;;  %8666 = vst [vmem:[#allocation51_spill] sm:$0xff] %v6134_v14  ;;  %v1571_v60 = vadd.f32 %v5494_v30, %v6100_v62  ;;  %v1572_v20 = vadd.f32 %v5500_v34, %v6102_v55  ;;  %v6148_v32 = vmax.f32 %v1450_v19, 0.0 }
 0x2e6   : > { %2212 = vmax.xlane.f32.xlu1 %v2211_v11  ;;  %2023 = vmax.xlane.f32.xlu0 %v2022_v46  ;;  %v1523_v46 = vadd.f32 %v5469_v22, %v6100_v62  ;;  %v2242_v11 = vadd.f32 %v5741_v9, %v5923_v37  ;;  %8667 = vst [vmem:[#allocation52_spill] sm:$0xff] %v6148_v32 }
 0x2e7   : > { %v6120_v16 = vpop.xlane.xlu1 %2008  ;;  %v6122_v8 = vpop.xlane.xlu0 %1963 }
 0x2e8   : > { %v2448_v52 = vsel %vm2447_vm12, %v2439_v47, %v6120_v16  ;;  %v2241_v47 = vadd.f32 %v5737_v35, %v5921_v12  ;;  %v1545_v56 = vmax.f32 %v1523_v46, %v1524_v31  ;;  %v1593_v35 = vmax.f32 %v1571_v60, %v1572_v20 }
 0x2e9   : > { %v1667_v46 = vadd.f32 %v5486_v28, %v6100_v62  ;;  %v1668_v31 = vadd.f32 %v5490_v29, %v6102_v55  ;;  %v1622_v60 = vadd.f32 %v5476_v25, %v6148_v32 }
 0x2ea   : > { %2260 = vmax.xlane.f32.xlu1 %v2259_v63  ;;  %2071 = vmax.xlane.f32.xlu0 %v2070_v13  ;;  %v2214_v13 = vmax.f32 %v2193_v18, %v2194_v49  ;;  %v2262_v19 = vmax.f32 %v2241_v47, %v2242_v11  ;;  %v1619_v18 = vadd.f32 %v5465_v21, %v6100_v62 }
 0x2eb   : > { %v6136_v42 = vpop.xlane.xlu1 %2056  ;;  %v6138_v45 = vpop.xlane.xlu0 %2107  ;;  %v1620_v49 = vadd.f32 %v5476_v25, %v6102_v55  ;;  %v1573_v47 = vadd.f32 %v5494_v30, %v6134_v14  ;;  %v1574_v11 = vadd.f32 %v5500_v34, %v6148_v32  ;;  %v6190_v34 = vadd.f32 %v5546_v58, %v6100_v62 }
 0x2ec   : > { %v2457_v63 = vsel %vm2456_vm13, %v2448_v52, %v6136_v42  ;;  %v6205_v25 = vadd.f32 %v5490_v29, %v6148_v32 }
 0x2ed   : > { %v2466_v53 = vsel %vm2465_vm14, %v2457_v63, %v6088_v10  ;;  %v1641_v30 = vmax.f32 %v1619_v18, %v1620_v49  ;;  %v1689_v18 = vmax.f32 %v1667_v46, %v1668_v31  ;;  %v6209_v49 = vadd.f32 %v5562_v2, %v6100_v62 }
 0x2ee   : > { %2215 = vmax.xlane.f32.xlu0 %v2214_v13  ;;  %1546 = vmax.xlane.f32.xlu1 %v1545_v56  ;;  %v2475_v37 = vsel %vm2474_vm15, %v2466_v53, %v6104_v4  ;;  %v1525_v56 = vadd.f32 %v5469_v22, %v6134_v14  ;;  %v1526_v53 = vadd.f32 %v5480_v26, %v6148_v32 }
 0x2ef   : > { %v6156_v12 = vpop.xlane.xlu1 %2200  ;;  %v6158_v9 = vpop.xlane.xlu0 %2155  ;;  %v1716_v22 = vadd.f32 %v5519_v44, %v6102_v55  ;;  %v1621_v26 = vadd.f32 %v5465_v21, %v6134_v14  ;;  %v6201_v21 = vadd.f32 %v5486_v28, %v6134_v14  ;;  %v6219_v46 = vadd.f32 %v5511_v40, %v6134_v14 }
 0x2f0   : > { %v2484_v52 = vsel %vm2483_vm2, %v2475_v37, %v6156_v12  ;;  %v1715_v37 = vadd.f32 %v5511_v40, %v6100_v62  ;;  %v6223_v31 = vadd.f32 %v5519_v44, %v6148_v32  ;;  %v2303_v44 = vmax.f32 %v6028_v43, %v6042_v6 }
 0x2f1   : > { %v1692_v40 = vmax.f32 %v6201_v21, %v6205_v25  ;;  %v2327_v6 = vmax.f32 %v6088_v10, %v6104_v4 }
 0x2f2   : > { %2263 = vmax.xlane.f32.xlu0 %v2262_v19  ;;  %1594 = vmax.xlane.f32.xlu1 %v1593_v35  ;;  %v6194_v35 = vadd.f32 %v5550_v59, %v6102_v55  ;;  %v1548_v19 = vmax.f32 %v1525_v56, %v1526_v53  ;;  %v1737_v56 = vmax.f32 %v1715_v37, %v1716_v22 }
 0x2f3   : > { %v2249_v20 = vpop.xlane.xlu1 %2248  ;;  %v6186_v63 = vpop.xlane.xlu0 %2011  ;;  %v1644_v53 = vmax.f32 %v1621_v26, %v1622_v60  ;;  %v2271_v22 = vmax.f32 %v5971_v24, %v5983_v17  ;;  %v8669_v24 = vld [vmem:[#allocation47_spill] sm:$0xff]  ;;  %v8670_v17 = vld [vmem:[#allocation46_spill] sm:$0xff] }
 0x2f4   : > { %v6197_v13 = vsel %vm2492_vm0, %v2484_v52, %v2249_v20  ;;  %v1596_v52 = vmax.f32 %v1573_v47, %v1574_v11  ;;  %v1785_v29 = vmax.f32 %v6190_v34, %v6194_v35  ;;  %v2279_v47 = vmax.f32 %v6000_v0, %v6014_v1 }
 0x2f5   : > { %v1833_v0 = vmax.f32 %v6209_v49, %v6213_v57  ;;  %v2280_v1 = vmax.f32 %v6044_v15, %v6058_v38  ;;  %v2295_v43 = vmax.f32 %v8670_v17, %v8669_v24  ;;  %v2351_v34 = vmax.f32 %v6156_v12, %v2249_v20 }
 0x2f6   : > { %1642 = vmax.xlane.f32.xlu1 %v1641_v30  ;;  %1549 = vmax.xlane.f32.xlu0 %v1548_v19  ;;  %v6227_v30 = vadd.f32 %v5589_v33, %v6100_v62  ;;  %v2287_v21 = vmax.f32 %v2271_v22, %v2279_v47  ;;  %v2343_v12 = vmax.f32 %v6120_v16, %v6136_v42 }
 0x2f7   : > { %v2060_v28 = vpop.xlane.xlu0 %2059  ;;  %v1532_v7 = vpop.xlane.xlu1 %1531  ;;  %v2311_v4 = vmax.f32 %v2295_v43, %v2303_v44  ;;  %v1740_v22 = vmax.f32 %v6219_v46, %v6223_v31  ;;  %v1765_v31 = vadd.f32 %v5546_v58, %v6134_v14 }
 0x2f8   : > { %v2272_v11 = vmax.f32 %v1532_v7, %v6002_v50  ;;  %v2369_v37 = vsel %vm2367_vm4, %v1532_v7, %v6002_v50  ;;  %v2304_v7 = vmax.f32 %v6072_v61, %v6090_v41  ;;  %v8668_v50 = vld [vmem:[#allocation48_spill] sm:$0xff] }
 0x2f9   : > { %v2378_v26 = vsel %vm2376_vm5, %v2369_v37, %v6016_v54  ;;  %v2296_v25 = vmax.f32 %v6016_v54, %v8668_v50 }
 0x2fa   : > { %v2387_v60 = vsel %vm2385_vm6, %v2378_v26, %v8668_v50  ;;  %1690 = vmax.xlane.f32.xlu1 %v1689_v18  ;;  %1597 = vmax.xlane.f32.xlu0 %v1596_v52  ;;  %v2288_v18 = vmax.f32 %v2272_v11, %v2280_v1  ;;  %v2319_v52 = vmax.f32 %v6056_v36, %v6070_v48 }
 0x2fb   : > { %v2395_v57 = vsel %vm932_vm3, %v2387_v60, %v6044_v15  ;;  %v2204_v35 = vpop.xlane.xlu0 %2203  ;;  %v6257_v19 = vpop.xlane.xlu1 %1534  ;;  %v2328_v15 = vmax.f32 %v6138_v45, %v6158_v9  ;;  %v2312_v20 = vmax.f32 %v2296_v25, %v2304_v7  ;;  %v2320_v36 = vmax.f32 %v6106_v27, %v6122_v8 }
 0x2fc   : > { %v2404_v49 = vsel %vm2402_vm7, %v2395_v57, %v6058_v38  ;;  %v2335_v38 = vmax.f32 %v2319_v52, %v2327_v6  ;;  %v2359_v48 = vmax.f32 %v2343_v12, %v2351_v34  ;;  %v8672_v34 = vld [vmem:[#allocation26_spill] sm:$0xff]  ;;  %v1814_v25 = vadd.f32 %v5568_v5, %v6148_v32 }
 0x2fd   : > { %v2413_v10 = vsel %vm2411_vm8, %v2404_v49, %v6072_v61  ;;  %v2344_v61 = vmax.f32 %v6186_v63, %v2060_v28  ;;  %v1907_v57 = vadd.f32 %v8672_v34, %v6100_v62  ;;  %v8674_v49 = vld [vmem:[#allocation27_spill] sm:$0xff] }
 0x2fe   : > { %v2422_v54 = vsel %vm2420_vm9, %v2413_v10, %v6090_v41  ;;  %1738 = vmax.xlane.f32.xlu1 %v1737_v56  ;;  %1645 = vmax.xlane.f32.xlu0 %v1644_v53  ;;  %v2502_v41 = vsel %vm2367_vm4, %v2288_v18, %v2312_v20  ;;  %v2336_v56 = vmax.f32 %v2320_v36, %v2328_v15 }
 0x2ff   : > { %v2431_v16 = vsel %vm2429_vm10, %v2422_v54, %v6106_v27  ;;  %v2252_v42 = vpop.xlane.xlu0 %2251  ;;  %v6277_v47 = vpop.xlane.xlu1 %1582  ;;  %v8671_v27 = vld [vmem:[#allocation25_spill] sm:$0xff]  ;;  %v1956_v52 = vadd.f32 %v8674_v49, %v6102_v55  ;;  %v8675_v54 = vld [vmem:[#allocation28_spill] sm:$0xff] }
 0x300   : > { %v2440_v11 = vsel %vm2438_vm11, %v2431_v16, %v6122_v8  ;;  %v2352_v37 = vmax.f32 %v2204_v35, %v2252_v42  ;;  %v1860_v44 = vadd.f32 %v8671_v27, %v6102_v55  ;;  %v2501_v8 = vsel %vm2367_vm4, %v2287_v21, %v2311_v4 }
 0x301   : > { %v2449_v53 = vsel %vm2447_vm12, %v2440_v11, %v6186_v63  ;;  %v2509_v63 = vsel %vm2376_vm5, %v2501_v8, %v2335_v38  ;;  %v2510_v46 = vsel %vm2376_vm5, %v2502_v41, %v2336_v56  ;;  %v1862_v5 = vadd.f32 %v8671_v27, %v6148_v32  ;;  %v8677_v41 = vld [vmem:[#allocation30_spill] sm:$0xff] }
 0x302   : > { %v2458_v26 = vsel %vm2456_vm13, %v2449_v53, %v2060_v28  ;;  %v2360_v1 = vmax.f32 %v2344_v61, %v2352_v37  ;;  %1786 = vmax.xlane.f32.xlu1 %v1785_v29  ;;  %1693 = vmax.xlane.f32.xlu0 %v1692_v40  ;;  %v2517_v29 = vsel %vm2385_vm6, %v2509_v63, %v2359_v48  ;;  %v8676_v48 = vld [vmem:[#allocation29_spill] sm:$0xff] }
 0x303   : > { %v2467_v7 = vsel %vm2465_vm14, %v2458_v26, %v6138_v45  ;;  %v6293_v50 = vpop.xlane.xlu1 %1630  ;;  %v6295_v60 = vpop.xlane.xlu0 %1537  ;;  %v1766_v45 = vadd.f32 %v5550_v59, %v6148_v32  ;;  %v2099_v38 = vadd.f32 %v8675_v54, %v6100_v62  ;;  %v2100_v16 = vadd.f32 %v8676_v48, %v6102_v55 }
 0x304   : > { %v2476_v28 = vsel %vm2474_vm15, %v2467_v7, %v6158_v9  ;;  %v2518_v40 = vsel %vm2385_vm6, %v2510_v46, %v2360_v1  ;;  %v1881_v9 = vmax.f32 %v6227_v30, %v1860_v44  ;;  %v2147_v37 = vadd.f32 %v5675_v23, %v6100_v62  ;;  %v8678_v1 = vld [vmem:[#allocation31_spill] sm:$0xff] }
 0x305   : > { %v2485_v24 = vsel %vm2483_vm2, %v2476_v28, %v2204_v35  ;;  %v4624_v17 = vpack.c.bf16 %v2518_v40, %v2517_v29  ;;  %v1788_v59 = vmax.f32 %v1765_v31, %v1766_v45  ;;  %v1908_v35 = vadd.f32 %v5621_v51, %v6102_v55  ;;  %v8679_v45 = vld [vmem:[#allocation32_spill] sm:$0xff] }
 0x306   : > { %v2494_v43 = vsel %vm2492_vm0, %v2485_v24, %v2252_v42  ;;  %1834 = vmax.xlane.f32.xlu1 %v1833_v0  ;;  %1741 = vmax.xlane.f32.xlu0 %v1740_v22  ;;  %v1813_v0 = vadd.f32 %v5562_v2, %v6134_v14  ;;  %v1861_v2 = vadd.f32 %v5589_v33, %v6134_v14 }
 0x307   : > { %4625 = vmatprep.subr.bf16.mxu0 %v4624_v17  ;;  %v6309_v6 = vpop.xlane.xlu1 %1678  ;;  %v6311_v58 = vpop.xlane.xlu0 %1585  ;;  %v6317_v21 = vpack.c.bf16 %v2494_v43, %v6197_v13  ;;  %v1955_v13 = vadd.f32 %v5639_v3, %v6100_v62  ;;  %v1929_v12 = vmax.f32 %v1907_v57, %v1908_v35  ;;  %v1909_v33 = vadd.f32 %v8672_v34, %v6134_v14  ;;  %v8680_v43 = vld [vmem:[#allocation33_spill] sm:$0xff] }
 0x308   : > { %4627 = vmatpush3.bf16.msra.mxu0 %v4624_v17  ;;  %v1836_v15 = vmax.f32 %v1813_v0, %v1814_v25  ;;  %v1884_v36 = vmax.f32 %v1861_v2, %v1862_v5  ;;  %v1910_v42 = vadd.f32 %v5621_v51, %v6148_v32  ;;  %v2148_v56 = vadd.f32 %v8677_v41, %v6102_v55  ;;  %v8682_v0 = vld [vmem:[#allocation34_spill] sm:$0xff] }
 0x309   : > { %8673 = vst [vmem:[#allocation48_spill] sm:$0xff] %v6317_v21  ;;  %v1977_v20 = vmax.f32 %v1955_v13, %v1956_v52  ;;  %v2121_v53 = vmax.f32 %v2099_v38, %v2100_v16  ;;  %v1957_v27 = vadd.f32 %v5639_v3, %v6134_v14  ;;  %v1958_v51 = vadd.f32 %v8674_v49, %v6148_v32  ;;  %v8683_v13 = vld [vmem:[#allocation35_spill] sm:$0xff] }
 0x30a   : > { %1882 = vmax.xlane.f32.xlu1 %v1881_v9  ;;  %1789 = vmax.xlane.f32.xlu0 %v1788_v59  ;;  %v1932_v22 = vmax.f32 %v1909_v33, %v1910_v42  ;;  %v2003_v8 = vadd.f32 %v8678_v1, %v6100_v62  ;;  %v2004_v7 = vadd.f32 %v5695_v39, %v6102_v55 }
 0x30b   : > { %v6325_v30 = vpop.xlane.xlu1 %1726  ;;  %v6327_v18 = vpop.xlane.xlu0 %1633  ;;  %v2169_v63 = vmax.f32 %v2147_v37, %v2148_v56  ;;  %v1980_v46 = vmax.f32 %v1957_v27, %v1958_v51  ;;  %v2101_v3 = vadd.f32 %v8675_v54, %v6134_v14  ;;  %v2102_v31 = vadd.f32 %v8676_v48, %v6148_v32  ;;  %v8685_v54 = vld [vmem:[#allocation36_spill] sm:$0xff]  ;;  %v8686_v48 = vld [vmem:[#allocation37_spill] sm:$0xff] }
 0x30c   : > { %v2025_v40 = vmax.f32 %v2003_v8, %v2004_v7  ;;  %v2051_v24 = vadd.f32 %v8679_v45, %v6100_v62  ;;  %v2052_v9 = vadd.f32 %v8680_v43, %v6102_v55  ;;  %v2149_v34 = vadd.f32 %v5675_v23, %v6134_v14 }
 0x30d   : > { %v2124_v17 = vmax.f32 %v2101_v3, %v2102_v31  ;;  %v2150_v57 = vadd.f32 %v8677_v41, %v6148_v32  ;;  %v2195_v25 = vadd.f32 %v8682_v0, %v6100_v62  ;;  %v2196_v49 = vadd.f32 %v8683_v13, %v6102_v55 }
 0x30e   : > { %1930 = vmax.xlane.f32.xlu1 %v1929_v12  ;;  %1837 = vmax.xlane.f32.xlu0 %v1836_v15  ;;  %v2073_v52 = vmax.f32 %v2051_v24, %v2052_v9  ;;  %v2005_v23 = vadd.f32 %v8678_v1, %v6134_v14  ;;  %v2006_v15 = vadd.f32 %v5695_v39, %v6148_v32 }
 0x30f   : > { %v6337_v10 = vpop.xlane.xlu1 %1774  ;;  %v6339_v4 = vpop.xlane.xlu0 %1681  ;;  %v2172_v12 = vmax.f32 %v2149_v34, %v2150_v57  ;;  %v2243_v38 = vadd.f32 %v8685_v54, %v6100_v62  ;;  %v2244_v16 = vadd.f32 %v8686_v48, %v6102_v55  ;;  %v2053_v33 = vadd.f32 %v8679_v45, %v6134_v14 }
 0x310   : > { %v2054_v39 = vadd.f32 %v8680_v43, %v6148_v32  ;;  %v2245_v8 = vadd.f32 %v8685_v54, %v6134_v14  ;;  %v2246_v7 = vadd.f32 %v8686_v48, %v6148_v32  ;;  %v2281_v34 = vmax.f32 %v6325_v30, %v6337_v10 }
 0x311   : > { %v2265_v41 = vmax.f32 %v2243_v38, %v2244_v16 }
 0x312   : > { %1978 = vmax.xlane.f32.xlu1 %v1977_v20  ;;  %1885 = vmax.xlane.f32.xlu0 %v1884_v36  ;;  %v2217_v20 = vmax.f32 %v2195_v25, %v2196_v49  ;;  %v2028_v36 = vmax.f32 %v2005_v23, %v2006_v15  ;;  %v2076_v56 = vmax.f32 %v2053_v33, %v2054_v39  ;;  %v2766_v15 = vld [vmem:[%s8413_s14] sm:$0xff] }
 0x313   : > { %v6349_v61 = vpop.xlane.xlu1 %1822  ;;  %v6351_v11 = vpop.xlane.xlu0 %1729  ;;  %v2268_v3 = vmax.f32 %v2245_v8, %v2246_v7  ;;  %v2297_v49 = vmax.f32 %v6293_v50, %v6309_v6 }
 0x316   : > { %2122 = vmax.xlane.f32.xlu1 %v2121_v53  ;;  %1933 = vmax.xlane.f32.xlu0 %v1932_v22  ;;  %v2197_v53 = vadd.f32 %v8682_v0, %v6134_v14  ;;  %v2198_v22 = vadd.f32 %v8683_v13, %v6148_v32 }
 0x317   : > { %v6361_v44 = vpop.xlane.xlu1 %1870  ;;  %v6363_v26 = vpop.xlane.xlu0 %1777 }
 0x318   : > { %v2220_v1 = vmax.f32 %v2197_v53, %v2198_v22  ;;  %v2305_v43 = vmax.f32 %v6349_v61, %v6361_v44 }
 0x31a   : > { %2170 = vmax.xlane.f32.xlu1 %v2169_v63  ;;  %1981 = vmax.xlane.f32.xlu0 %v1980_v46  ;;  %v2313_v48 = vmax.f32 %v2297_v49, %v2305_v43 }
 0x31b   : > { %v6373_v28 = vpop.xlane.xlu1 %1918  ;;  %v6375_v29 = vpop.xlane.xlu0 %1825 }
 0x31e   : > { %2026 = vmax.xlane.f32.xlu1 %v2025_v40  ;;  %2125 = vmax.xlane.f32.xlu0 %v2124_v17  ;;  %v2533_v17 = vld [vmem:[%s8410_s11] sm:$0xff] }
 0x31f   : > { %v6385_v59 = vpop.xlane.xlu1 %1966  ;;  %v6387_v35 = vpop.xlane.xlu0 %1873 }
 0x320   : > { %8681 = vst [vmem:[#allocation47_spill] sm:$0xff] %v6385_v59  ;;  %v2306_v9 = vmax.f32 %v6375_v29, %v6387_v35  ;;  %v2321_v54 = vmax.f32 %v6373_v28, %v6385_v59 }
 0x322   : > { %2074 = vmax.xlane.f32.xlu1 %v2073_v52  ;;  %2173 = vmax.xlane.f32.xlu0 %v2172_v12  ;;  %v2298_v52 = vmax.f32 %v6327_v18, %v6339_v4  ;;  %v2282_v12 = vmax.f32 %v6351_v11, %v6363_v26 }
 0x323   : > { %v6397_v2 = vpop.xlane.xlu1 %2110  ;;  %v6399_v5 = vpop.xlane.xlu0 %1921 }
 0x324   : > { %8684 = vst [vmem:[#allocation46_spill] sm:$0xff] %v6397_v2  ;;  %v2314_v16 = vmax.f32 %v2298_v52, %v2306_v9 }
 0x326   : > { %2218 = vmax.xlane.f32.xlu1 %v2217_v20  ;;  %2029 = vmax.xlane.f32.xlu0 %v2028_v36  ;;  %v2273_v20 = vmax.f32 %v6257_v19, %v6277_v47  ;;  %v2274_v36 = vmax.f32 %v6295_v60, %v6311_v58 }
 0x327   : > { %v6409_v42 = vpop.xlane.xlu1 %2158  ;;  %v6411_v37 = vpop.xlane.xlu0 %1969 }
 0x328   : > { %8687 = vst [vmem:[#allocation25_spill] sm:$0xff] %v6409_v42  ;;  %v2329_v57 = vmax.f32 %v6397_v2, %v6409_v42  ;;  %v2322_v38 = vmax.f32 %v6399_v5, %v6411_v37  ;;  %v2289_v39 = vmax.f32 %v2273_v20, %v2281_v34 }
 0x32a   : > { %2266 = vmax.xlane.f32.xlu1 %v2265_v41  ;;  %2077 = vmax.xlane.f32.xlu0 %v2076_v56  ;;  %v2337_v41 = vmax.f32 %v2321_v54, %v2329_v57  ;;  %v2503_v9 = vsel %vm2367_vm4, %v2289_v39, %v2313_v48  ;;  %v2534_v54 = vld [vmem:[%s8410_s11 + $0x8] sm:$0xff]  ;;  %v2769_v48 = vld [vmem:[%s8413_s14 + $0x18] sm:$0xff] }
 0x32b   : > { %v6417_v27 = vpop.xlane.xlu1 %2014  ;;  %v6419_v51 = vpop.xlane.xlu0 %2113 }
 0x32c   : > { %8688 = vst [vmem:[#allocation26_spill] sm:$0xff] %v6417_v27  ;;  %8689 = vst [vmem:[#allocation27_spill] sm:$0xff] %v6419_v51  ;;  %v2511_v49 = vsel %vm2376_vm5, %v2503_v9, %v2337_v41 }
 0x32e   : > { %2221 = vmax.xlane.f32.xlu0 %v2220_v1  ;;  %v2290_v1 = vmax.f32 %v2274_v36, %v2282_v12 }
 0x32f   : > { %v6425_v63 = vpop.xlane.xlu1 %2062  ;;  %v6427_v46 = vpop.xlane.xlu0 %2161 }
 0x330   : > { %8690 = vst [vmem:[#allocation28_spill] sm:$0xff] %v6425_v63  ;;  %8691 = vst [vmem:[#allocation29_spill] sm:$0xff] %v6427_v46  ;;  %v2330_v0 = vmax.f32 %v6419_v51, %v6427_v46  ;;  %v2345_v33 = vmax.f32 %v6417_v27, %v6425_v63  ;;  %v2504_v34 = vsel %vm2367_vm4, %v2290_v1, %v2314_v16  ;;  %v2525_v16 = vld [vmem:[%s8409_s10] sm:$0xff]  ;;  %v2768_v1 = vld [vmem:[%s8413_s14 + $0x10] sm:$0xff] }
 0x331   : > { %4531 = vmatprep.mubr.msk.f32.mxu0 %vm762_vm1, %v2525_v16  ;;  %v8716_v27 = vld [vmem:[#allocation21_spill] sm:$0xff] }
 0x332   : > { %2269 = vmax.xlane.f32.xlu0 %v2268_v3  ;;  %v2338_v56 = vmax.f32 %v2322_v38, %v2330_v0 }
 0x333   : > { %v6429_v31 = vpop.xlane.xlu1 %2206  ;;  %v6431_v40 = vpop.xlane.xlu0 %2017 }
 0x334   : > { %8692 = vst [vmem:[#allocation30_spill] sm:$0xff] %v6429_v31  ;;  %v2512_v52 = vsel %vm2376_vm5, %v2504_v34, %v2338_v56  ;;  %v2538_v56 = vld [vmem:[%s8410_s11 + $0x28] sm:$0xff]  ;;  %v2540_v34 = vld [vmem:[%s8410_s11 + $0x38] sm:$0xff] }
 0x337   : > { %v6433_v45 = vpop.xlane.xlu1 %2254  ;;  %v6435_v24 = vpop.xlane.xlu0 %2065 }
 0x338   : > { %8693 = vst [vmem:[#allocation31_spill] sm:$0xff] %v6433_v45  ;;  %8694 = vst [vmem:[#allocation32_spill] sm:$0xff] %v6435_v24  ;;  %v2353_v23 = vmax.f32 %v6429_v31, %v6433_v45  ;;  %v2346_v7 = vmax.f32 %v6431_v40, %v6435_v24  ;;  %v8717_v24 = vld [vmem:[#allocation22_spill] sm:$0xff] }
 0x339   : > { %v1470_v59 = vadd.f32 %v8717_v24, %v8716_v27  ;;  %v8718_v27 = vld [vmem:[#allocation18_spill] sm:$0xff] }
 0x33a   : > { %v2361_v8 = vmax.f32 %v2345_v33, %v2353_v23  ;;  %v2535_v33 = vld [vmem:[%s8410_s11 + $0x10] sm:$0xff] }
 0x33b   : > { %v6450_v25 = vpop.xlane.xlu0 %2209  ;;  %v6452_v13 = vpop.xlane.xlu1 %1540  ;;  %2543 = vperm.xlu1 %4929, %v2533_v17   ;;  %v2767_v17 = vld [vmem:[%s8413_s14 + $0x8] sm:$0xff] }
 0x33c   : > { %8695 = vst [vmem:[#allocation33_spill] sm:$0xff] %v6450_v25  ;;  %v2519_v12 = vsel %vm2385_vm6, %v2511_v49, %v2361_v8  ;;  %v2770_v49 = vld [vmem:[%s8413_s14 + $0x20] sm:$0xff] }
 0x33f   : > { %v6475_v53 = vpop.xlane.xlu0 %2257  ;;  %v6477_v22 = vpop.xlane.xlu1 %1588  ;;  %2776 = vperm.xlu1 %4929, %v2766_v15   ;;  %v2536_v15 = vld [vmem:[%s8410_s11 + $0x18] sm:$0xff] }
 0x340   : > { %8696 = vst [vmem:[#allocation34_spill] sm:$0xff] %v6475_v53  ;;  %v2354_v3 = vmax.f32 %v6450_v25, %v6475_v53 }
 0x342   : > { %v2362_v43 = vmax.f32 %v2346_v7, %v2354_v3  ;;  %v2771_v3 = vld [vmem:[%s8413_s14 + $0x28] sm:$0xff] }
 0x343   : > { %v6488_v57 = vpop.xlane.xlu1 %1636  ;;  %v6490_v0 = vpop.xlane.xlu0 %1543  ;;  %2781 = vperm.xlu1 %4929, %v2767_v17   ;;  %v2537_v17 = vld [vmem:[%s8410_s11 + $0x20] sm:$0xff] }
 0x344   : > { %v2520_v23 = vsel %vm2385_vm6, %v2512_v52, %v2362_v43 }
 0x345   : > { %v4628_v20 = vpack.c.bf16 %v2520_v23, %v2519_v12  ;;  %v2773_v23 = vld [vmem:[%s8413_s14 + $0x38] sm:$0xff] }
 0x347   : > { %4629 = vmatprep.subr.bf16.mxu0 %v4628_v20  ;;  %v6502_v38 = vpop.xlane.xlu1 %1684  ;;  %v6504_v36 = vpop.xlane.xlu0 %1591  ;;  %2558 = vperm.xlu1 %4929, %v2536_v15   ;;  %v2539_v15 = vld [vmem:[%s8410_s11 + $0x30] sm:$0xff] }
 0x348   : > { %4631 = vmatpush3.bf16.msra.mxu0 %v4628_v20  ;;  %2548 = vperm.xlu0 %4928, %v2534_v54  }
 0x34b   : > { %v6516_v39 = vpop.xlane.xlu1 %1732  ;;  %v6518_v41 = vpop.xlane.xlu0 %1639  ;;  %2791 = vperm.xlu1 %4929, %v2769_v48   ;;  %v2772_v48 = vld [vmem:[%s8413_s14 + $0x30] sm:$0xff] }
 0x34c   : > { %8697 = vst [vmem:[#allocation35_spill] sm:$0xff] %v6516_v39  ;;  %2553 = vperm.xlu0 %4928, %v2535_v33  }
 0x34f   : > { %v6526_v8 = vpop.xlane.xlu1 %1780  ;;  %v6528_v7 = vpop.xlane.xlu0 %1687  ;;  %2568 = vperm.xlu1 %4929, %v2538_v56  }
 0x350   : > { %8698 = vst [vmem:[#allocation36_spill] sm:$0xff] %v6526_v8  ;;  %8699 = vst [vmem:[#allocation37_spill] sm:$0xff] %v6528_v7  ;;  %2786 = vperm.xlu0 %4928, %v2768_v1   ;;  %v2283_v42 = vmax.f32 %v6516_v39, %v6526_v8 }
 0x353   : > { %v6536_v43 = vpop.xlane.xlu1 %1828  ;;  %v6538_v9 = vpop.xlane.xlu0 %1735  ;;  %2801 = vperm.xlu1 %4929, %v2771_v3  }
 0x354   : > { %8700 = vst [vmem:[#allocation53_spill] sm:$0xff] %v6536_v43  ;;  %8701 = vst [vmem:[#allocation54_spill] sm:$0xff] %v6538_v9  ;;  %2563 = vperm.xlu0 %4928, %v2537_v17  }
 0x357   : > { %v6546_v52 = vpop.xlane.xlu1 %1876  ;;  %v6548_v12 = vpop.xlane.xlu0 %1783  ;;  %2578 = vperm.xlu1 %4929, %v2540_v34  }
 0x358   : > { %8702 = vst [vmem:[#allocation55_spill] sm:$0xff] %v6546_v52  ;;  %8703 = vst [vmem:[#allocation56_spill] sm:$0xff] %v6548_v12  ;;  %2796 = vperm.xlu0 %4928, %v2770_v49   ;;  %v2307_v53 = vmax.f32 %v6536_v43, %v6546_v52  ;;  %v2299_v52 = vmax.f32 %v6488_v57, %v6502_v38  ;;  %v2276_v43 = vmax.f32 %v6490_v0, %v6504_v36 }
 0x35a   : > { %v2315_v8 = vmax.f32 %v2299_v52, %v2307_v53  ;;  %v8721_v52 = vld [vmem:[#allocation39_spill] sm:$0xff] }
 0x35b   : > { %v6556_v20 = vpop.xlane.xlu1 %1924  ;;  %v6558_v54 = vpop.xlane.xlu0 %1831  ;;  %2811 = vperm.xlu1 %4929, %v2773_v23  }
 0x35c   : > { %8704 = vst [vmem:[#allocation57_spill] sm:$0xff] %v6558_v54  ;;  %2573 = vperm.xlu0 %4928, %v2539_v15  }
 0x35f   : > { %v6563_v16 = vpop.xlane.xlu1 %1972  ;;  %v6565_v33 = vpop.xlane.xlu0 %1879 }
 0x360   : > { %8705 = vst [vmem:[#allocation58_spill] sm:$0xff] %v6563_v16  ;;  %8706 = vst [vmem:[#allocation59_spill] sm:$0xff] %v6565_v33  ;;  %2806 = vperm.xlu0 %4928, %v2772_v48   ;;  %v2308_v25 = vmax.f32 %v6558_v54, %v6565_v33  ;;  %v2300_v33 = vmax.f32 %v6518_v41, %v6528_v7  ;;  %v2284_v54 = vmax.f32 %v6538_v9, %v6548_v12 }
 0x362   : > { %v2316_v12 = vmax.f32 %v2300_v33, %v2308_v25  ;;  %v8720_v25 = vld [vmem:[#allocation38_spill] sm:$0xff] }
 0x363   : > { %v6567_v56 = vpop.xlane.xlu1 %2116  ;;  %v6569_v1 = vpop.xlane.xlu0 %1927  ;;  %v1473_v33 = vadd.f32 %v8721_v52, %v8720_v25  ;;  %v8725_v52 = vld [vmem:[#allocation43_spill] sm:$0xff] }
 0x364   : > { %8707 = vst [vmem:[#allocation60_spill] sm:$0xff] %v6567_v56  ;;  %8708 = vst [vmem:[#allocation61_spill] sm:$0xff] %v6569_v1 }
 0x367   : > { %v6571_v3 = vpop.xlane.xlu1 %2164  ;;  %v6573_v17 = vpop.xlane.xlu0 %1975 }
 0x368   : > { %8709 = vst [vmem:[#allocation62_spill] sm:$0xff] %v6571_v3  ;;  %8710 = vst [vmem:[#allocation63_spill] sm:$0xff] %v6573_v17  ;;  %v2331_v46 = vmax.f32 %v6567_v56, %v6571_v3  ;;  %v2323_v56 = vmax.f32 %v6556_v20, %v6563_v16  ;;  %v2324_v24 = vmax.f32 %v6569_v1, %v6573_v17 }
 0x369   : > { %v2292_v17 = vmax.f32 %v2276_v43, %v2284_v54 }
 0x36a   : > { %v2339_v9 = vmax.f32 %v2323_v56, %v2331_v46  ;;  %v8722_v46 = vld [vmem:[#allocation40_spill] sm:$0xff] }
 0x36b   : > { %v6575_v34 = vpop.xlane.xlu1 %2020  ;;  %v6577_v49 = vpop.xlane.xlu0 %2119  ;;  %v2506_v56 = vsel %vm2367_vm4, %v2292_v17, %v2316_v12  ;;  %v8727_v12 = vld [vmem:[#allocation45_spill] sm:$0xff] }
 0x36c   : > { %8711 = vst [vmem:[#allocation64_spill] sm:$0xff] %v6577_v49 }
 0x36f   : > { %v6579_v23 = vpop.xlane.xlu1 %2068  ;;  %v6581_v15 = vpop.xlane.xlu0 %2167 }
 0x370   : > { %8712 = vst [vmem:[#allocation65_spill] sm:$0xff] %v6581_v15  ;;  %v2332_v2 = vmax.f32 %v6577_v49, %v6581_v15  ;;  %v2275_v15 = vmax.f32 %v6452_v13, %v6477_v22  ;;  %v8719_v49 = vld [vmem:[#allocation19_spill] sm:$0xff] }
 0x372   : > { %v2340_v7 = vmax.f32 %v2324_v24, %v2332_v2  ;;  %v8723_v2 = vld [vmem:[#allocation41_spill] sm:$0xff] }
 0x373   : > { %v6583_v45 = vpop.xlane.xlu1 %2212  ;;  %v6585_v21 = vpop.xlane.xlu0 %2023  ;;  %v1476_v24 = vadd.f32 %v8723_v2, %v8722_v46 }
 0x374   : > { %8713 = vst [vmem:[#allocation66_spill] sm:$0xff] %v6583_v45 }
 0x377   : > { %v6587_v48 = vpop.xlane.xlu1 %2260  ;;  %v6589_v31 = vpop.xlane.xlu0 %2071 }
 0x378   : > { %8714 = vst [vmem:[#allocation67_spill] sm:$0xff] %v6587_v48  ;;  %v2355_v3 = vmax.f32 %v6583_v45, %v6587_v48  ;;  %v2347_v48 = vmax.f32 %v6575_v34, %v6579_v23  ;;  %v2291_v45 = vmax.f32 %v2275_v15, %v2283_v42 }
 0x37a   : > { %v2363_v1 = vmax.f32 %v2347_v48, %v2355_v3 }
 0x37b   : > { %v6601_v51 = vpop.xlane.xlu0 %2215  ;;  %v6603_v63 = vpop.xlane.xlu1 %1546 }
 0x37c   : > { %8715 = vst [vmem:[#allocation68_spill] sm:$0xff] %v6603_v63  ;;  %v1467_v63 = vadd.f32 %v8719_v49, %v8718_v27  ;;  %v2348_v49 = vmax.f32 %v6585_v21, %v6589_v31 }
 0x37f   : > { %v6627_v39 = vpop.xlane.xlu0 %2263  ;;  %1471 = vadd.xlane.f32.xlu1 %v1470_v59  ;;  %v6629_v16 = vpop.xlane.xlu1 %1594  ;;  %1468 = vadd.xlane.f32.xlu0 %v1467_v63  ;;  %v2505_v59 = vsel %vm2367_vm4, %v2291_v45, %v2315_v8  ;;  %v2514_v63 = vsel %vm2376_vm5, %v2506_v56, %v2340_v7  ;;  %v8726_v8 = vld [vmem:[#allocation44_spill] sm:$0xff]  ;;  %v1485_v7 = vadd.f32 %v6102_v55, %v6100_v62 }
 0x380   : > { %v2356_v53 = vmax.f32 %v6601_v51, %v6627_v39  ;;  %v2513_v3 = vsel %vm2376_vm5, %v2505_v59, %v2339_v9  ;;  %v1482_v17 = vadd.f32 %v8727_v12, %v8726_v8  ;;  %v1488_v9 = vadd.f32 %v6148_v32, %v6134_v14 }
 0x381   : > { %v2521_v15 = vsel %vm2385_vm6, %v2513_v3, %v2363_v1  ;;  %v2371_v55 = vsel %vm2367_vm4, %v6295_v60, %v6311_v58  ;;  %v2370_v12 = vsel %vm2367_vm4, %v6257_v19, %v6277_v47 }
 0x382   : > { %v2364_v42 = vmax.f32 %v2348_v49, %v2356_v53  ;;  %v8724_v53 = vld [vmem:[#allocation42_spill] sm:$0xff]  ;;  %v2380_v62 = vsel %vm2376_vm5, %v2371_v55, %v6327_v18  ;;  %v2372_v18 = vsel %vm2367_vm4, %v6452_v13, %v6477_v22  ;;  %v8729_v22 = vld [vmem:[#allocation32_spill] sm:$0xff] }
 0x383   : > { %1474 = vadd.xlane.f32.xlu1 %v1473_v33  ;;  %v6641_v43 = vpop.xlane.xlu1 %1642  ;;  %v6643_v54 = vpop.xlane.xlu0 %1549  ;;  %1477 = vadd.xlane.f32.xlu0 %v1476_v24  ;;  %v1479_v45 = vadd.f32 %v8725_v52, %v8724_v53  ;;  %v2389_v8 = vsel %vm2385_vm6, %v2380_v62, %v6339_v4  ;;  %v2379_v52 = vsel %vm2376_vm5, %v2370_v12, %v6293_v50  ;;  %v8734_v12 = vld [vmem:[#allocation54_spill] sm:$0xff] }
 0x384   : > { %v2522_v49 = vsel %vm2385_vm6, %v2514_v63, %v2364_v42  ;;  %v2397_v53 = vsel %vm932_vm3, %v2389_v8, %v6351_v11  ;;  %v2388_v55 = vsel %vm2385_vm6, %v2379_v52, %v6309_v6  ;;  %v8730_v52 = vld [vmem:[#allocation35_spill] sm:$0xff]  ;;  %v8733_v8 = vld [vmem:[#allocation36_spill] sm:$0xff] }
 0x385   : > { %v4632_v48 = vpack.c.bf16 %v2522_v49, %v2521_v15  ;;  %v2406_v60 = vsel %vm2402_vm7, %v2397_v53, %v6363_v26  ;;  %v2396_v19 = vsel %vm932_vm3, %v2388_v55, %v6325_v30  ;;  %v2373_v26 = vsel %vm2367_vm4, %v6490_v0, %v6504_v36  ;;  %v8731_v36 = vld [vmem:[#allocation37_spill] sm:$0xff]  ;;  %v8732_v53 = vld [vmem:[#allocation26_spill] sm:$0xff] }
 0x386   : > { %v2415_v62 = vsel %vm2411_vm8, %v2406_v60, %v6375_v29  ;;  %v2405_v47 = vsel %vm2402_vm7, %v2396_v19, %v6337_v10  ;;  %v8735_v19 = vld [vmem:[#allocation28_spill] sm:$0xff] }
 0x387   : > { %4633 = vmatprep.subr.bf16.mxu0 %v4632_v48  ;;  %1480 = vadd.xlane.f32.xlu1 %v1479_v45  ;;  %v6653_v33 = vpop.xlane.xlu1 %1690  ;;  %v6655_v25 = vpop.xlane.xlu0 %1597  ;;  %v2424_v50 = vsel %vm2420_vm9, %v2415_v62, %v6387_v35  ;;  %v2414_v58 = vsel %vm2411_vm8, %v2405_v47, %v6349_v61  ;;  %v2381_v61 = vsel %vm2376_vm5, %v2372_v18, %v6488_v57  ;;  %v8736_v47 = vld [vmem:[#allocation53_spill] sm:$0xff]  ;;  %v8738_v18 = vld [vmem:[#allocation27_spill] sm:$0xff] }
 0x388   : > { %1483 = vadd.xlane.f32.xlu0 %v1482_v17  ;;  %4635 = vmatpush3.bf16.msra.mxu0 %v4632_v48  ;;  %v2433_v6 = vsel %vm2429_vm10, %v2424_v50, %v6399_v5  ;;  %v2423_v10 = vsel %vm2420_vm9, %v2414_v58, %v6361_v44  ;;  %v2390_v5 = vsel %vm2385_vm6, %v2381_v61, %v6502_v38  ;;  %v8737_v58 = vld [vmem:[#allocation56_spill] sm:$0xff] }
 0x389   : > { %v2442_v11 = vsel %vm2438_vm11, %v2433_v6, %v6411_v37  ;;  %v2432_v29 = vsel %vm2429_vm10, %v2423_v10, %v6373_v28  ;;  %v2382_v44 = vsel %vm2376_vm5, %v2373_v26, %v6518_v41  ;;  %v8728_v37 = vld [vmem:[#allocation47_spill] sm:$0xff]  ;;  %v2398_v0 = vsel %vm932_vm3, %v2390_v5, %v8730_v52  ;;  %v8740_v26 = vld [vmem:[#allocation57_spill] sm:$0xff] }
 0x38a   : > { %v2451_v35 = vsel %vm2447_vm12, %v2442_v11, %v6431_v40  ;;  %v2441_v13 = vsel %vm2438_vm11, %v2432_v29, %v8728_v37  ;;  %v2391_v28 = vsel %vm2385_vm6, %v2382_v44, %v8731_v36  ;;  %v2407_v38 = vsel %vm2402_vm7, %v2398_v0, %v8733_v8  ;;  %v8739_v11 = vld [vmem:[#allocation55_spill] sm:$0xff]  ;;  %v8742_v37 = vld [vmem:[#allocation46_spill] sm:$0xff] }
 0x38b   : > { %v6661_v1 = vpop.xlane.xlu1 %1738  ;;  %1486 = vadd.xlane.f32.xlu1 %v1485_v7  ;;  %v6663_v42 = vpop.xlane.xlu0 %1645  ;;  %v2460_v57 = vsel %vm2456_vm13, %v2451_v35, %v8729_v22  ;;  %v2450_v40 = vsel %vm2447_vm12, %v2441_v13, %v8732_v53  ;;  %v2399_v41 = vsel %vm932_vm3, %v2391_v28, %v8734_v12  ;;  %v2416_v50 = vsel %vm2411_vm8, %v2407_v38, %v8736_v47  ;;  %v8741_v5 = vld [vmem:[#allocation59_spill] sm:$0xff]  ;;  %v8743_v22 = vld [vmem:[#allocation58_spill] sm:$0xff]  ;;  %v8745_v28 = vld [vmem:[#allocation29_spill] sm:$0xff] }
 0x38c   : > { %1489 = vadd.xlane.f32.xlu0 %v1488_v9  ;;  %v2459_v62 = vsel %vm2456_vm13, %v2450_v40, %v8735_v19  ;;  %v2408_v6 = vsel %vm2402_vm7, %v2399_v41, %v8737_v58  ;;  %v2469_v10 = vsel %vm2465_vm14, %v2460_v57, %v8738_v18  ;;  %v2425_v61 = vsel %vm2420_vm9, %v2416_v50, %v8739_v11  ;;  %v8744_v57 = vld [vmem:[#allocation61_spill] sm:$0xff]  ;;  %v8747_v38 = vld [vmem:[#allocation68_spill] sm:$0xff] }
 0x38d   : > { %v2417_v29 = vsel %vm2411_vm8, %v2408_v6, %v8740_v26  ;;  %v2434_v35 = vsel %vm2429_vm10, %v2425_v61, %v6556_v20  ;;  %v6787_v13 = vsel %vm2465_vm14, %v2459_v62, %v8742_v37  ;;  %v6797_v53 = vsel %vm2474_vm15, %v2469_v10, %v8745_v28  ;;  %v8746_v20 = vld [vmem:[#allocation63_spill] sm:$0xff] }
 0x38e   : > { %v2426_v44 = vsel %vm2420_vm9, %v2417_v29, %v8741_v5  ;;  %v2443_v52 = vsel %vm2438_vm11, %v2434_v35, %v8743_v22  ;;  %v2374_v12 = vsel %vm2367_vm4, %v8747_v38, %v6629_v16  ;;  %v2277_v19 = vmax.f32 %v8747_v38, %v6629_v16 }
 0x38f   : > { %v6665_v24 = vpop.xlane.xlu1 %1786  ;;  %v6667_v59 = vpop.xlane.xlu0 %1693  ;;  %v2435_v0 = vsel %vm2429_vm10, %v2426_v44, %v8744_v57  ;;  %v2452_v8 = vsel %vm2447_vm12, %v2443_v52, %v6575_v34  ;;  %v2383_v62 = vsel %vm2376_vm5, %v2374_v12, %v6641_v43  ;;  %v2301_v47 = vmax.f32 %v6641_v43, %v6653_v33 }
 0x390   : > { %v2444_v40 = vsel %vm2438_vm11, %v2435_v0, %v8746_v20  ;;  %v2392_v34 = vsel %vm2385_vm6, %v2383_v62, %v6653_v33  ;;  %v2278_v58 = vmax.f32 %v6643_v54, %v6655_v25  ;;  %v2375_v6 = vsel %vm2367_vm4, %v6643_v54, %v6655_v25 }
 0x391   : > { %v2453_v41 = vsel %vm2447_vm12, %v2444_v40, %v6585_v21  ;;  %v2285_v43 = vmax.f32 %v6661_v1, %v6665_v24  ;;  %v2384_v11 = vsel %vm2376_vm5, %v2375_v6, %v6663_v42  ;;  %v2302_v61 = vmax.f32 %v6663_v42, %v6667_v59 }
 0x392   : > { %v2400_v26 = vsel %vm932_vm3, %v2392_v34, %v6661_v1  ;;  %v2393_v29 = vsel %vm2385_vm6, %v2384_v11, %v6667_v59  ;;  %v2462_v12 = vsel %vm2456_vm13, %v2453_v41, %v6589_v31  ;;  %v8750_v11 = vld [vmem:[#allocation33_spill] sm:$0xff] }
 0x393   : > { %v6669_v56 = vpop.xlane.xlu1 %1834  ;;  %v6671_v3 = vpop.xlane.xlu0 %1741  ;;  %v2293_v52 = vmax.f32 %v2277_v19, %v2285_v43  ;;  %v2409_v19 = vsel %vm2402_vm7, %v2400_v26, %v6665_v24  ;;  %v8753_v26 = vld [vmem:[#allocation65_spill] sm:$0xff] }
 0x394   : > { %v2401_v42 = vsel %vm932_vm3, %v2393_v29, %v6671_v3  ;;  %v8754_v29 = vld [vmem:[#allocation30_spill] sm:$0xff] }
 0x397   : > { %v6673_v63 = vpop.xlane.xlu1 %1882  ;;  %v6675_v15 = vpop.xlane.xlu0 %1789 }
 0x398   : > { %v2309_v21 = vmax.f32 %v6669_v56, %v6673_v63  ;;  %v2286_v25 = vmax.f32 %v6671_v3, %v6675_v15  ;;  %v2410_v1 = vsel %vm2402_vm7, %v2401_v42, %v6675_v15  ;;  %v2461_v3 = vsel %vm2456_vm13, %v2452_v8, %v6579_v23  ;;  %v2527_v42 = vld [vmem:[%s8409_s10 + $0x10] sm:$0xff] }
 0x399   : > { %v2418_v23 = vsel %vm2411_vm8, %v2409_v19, %v6669_v56  ;;  %v2530_v19 = vld [vmem:[%s8409_s10 + $0x28] sm:$0xff] }
 0x39a   : > { %v2317_v44 = vmax.f32 %v2301_v47, %v2309_v21  ;;  %v2294_v28 = vmax.f32 %v2278_v58, %v2286_v25  ;;  %v8751_v25 = vld [vmem:[#allocation60_spill] sm:$0xff] }
 0x39b   : > { %v6677_v49 = vpop.xlane.xlu1 %1930  ;;  %v6679_v48 = vpop.xlane.xlu0 %1837 }
 0x39c   : > { %v2419_v15 = vsel %vm2411_vm8, %v2410_v1, %v6679_v48  ;;  %v2507_v34 = vsel %vm2367_vm4, %v2293_v52, %v2317_v44  ;;  %v8756_v44 = vld [vmem:[#allocation31_spill] sm:$0xff] }
 0x39f   : > { %v6681_v45 = vpop.xlane.xlu1 %1978  ;;  %v6683_v17 = vpop.xlane.xlu0 %1885 }
 0x3a0   : > { %v2310_v16 = vmax.f32 %v6679_v48, %v6683_v17  ;;  %v2325_v35 = vmax.f32 %v6677_v49, %v6681_v45  ;;  %v2428_v62 = vsel %vm2420_vm9, %v2419_v15, %v6683_v17  ;;  %v2427_v48 = vsel %vm2420_vm9, %v2418_v23, %v6673_v63  ;;  %v2763_v23 = vld [vmem:[%s8412_s13 + $0x28] sm:$0xff] }
 0x3a2   : > { %v2318_v37 = vmax.f32 %v2302_v61, %v2310_v16  ;;  %v8748_v16 = vld [vmem:[#allocation64_spill] sm:$0xff]  ;;  %v2487_v61 = vsel %vm2483_vm2, %v6797_v53, %v8750_v11  ;;  %v2526_v53 = vld [vmem:[%s8409_s10 + $0x8] sm:$0xff] }
 0x3a3   : > { %v6685_v7 = vpop.xlane.xlu1 %2122  ;;  %v6687_v9 = vpop.xlane.xlu0 %1933  ;;  %v2471_v56 = vsel %vm2465_vm14, %v2462_v12, %v8748_v16 }
 0x3a4   : > { %v2508_v58 = vsel %vm2367_vm4, %v2294_v28, %v2318_v37  ;;  %v2437_v31 = vsel %vm2429_vm10, %v2428_v62, %v6687_v9  ;;  %v8757_v37 = vld [vmem:[#allocation62_spill] sm:$0xff]  ;;  %v2532_v62 = vld [vmem:[%s8409_s10 + $0x38] sm:$0xff] }
 0x3a5   : > { %v8758_v28 = vld [vmem:[#allocation66_spill] sm:$0xff] }
 0x3a7   : > { %v6689_v32 = vpop.xlane.xlu1 %2170  ;;  %v6691_v14 = vpop.xlane.xlu0 %1981 }
 0x3a8   : > { %v2333_v18 = vmax.f32 %v6685_v7, %v6689_v32  ;;  %v2326_v5 = vmax.f32 %v6687_v9, %v6691_v14  ;;  %v2446_v17 = vsel %vm2438_vm11, %v2437_v31, %v6691_v14  ;;  %v2436_v9 = vsel %vm2429_vm10, %v2427_v48, %v6677_v49  ;;  %v2764_v31 = vld [vmem:[%s8412_s13 + $0x30] sm:$0xff] }
 0x3a9   : > { %v2445_v14 = vsel %vm2438_vm11, %v2436_v9, %v6681_v45  ;;  %v2470_v49 = vsel %vm2465_vm14, %v2461_v3, %v8751_v25  ;;  %v2480_v45 = vsel %vm2474_vm15, %v2471_v56, %v8753_v26  ;;  %vm5030_vm11 = vmmov 0  }
 0x3aa   : > { %v2341_v57 = vmax.f32 %v2325_v35, %v2333_v18  ;;  %v8749_v18 = vld [vmem:[#allocation25_spill] sm:$0xff]  ;;  %v2489_v52 = vsel %vm2483_vm2, %v2480_v45, %v6601_v51 }
 0x3ab   : > { %v6707_v2 = vpop.xlane.xlu1 %2026  ;;  %v6709_v46 = vpop.xlane.xlu0 %2125  ;;  %v2477_v63 = vsel %vm2474_vm15, %v6787_v13, %v8749_v18  ;;  %v2528_v51 = vld [vmem:[%s8409_s10 + $0x18] sm:$0xff] }
 0x3ac   : > { %v2515_v8 = vsel %vm2376_vm5, %v2507_v34, %v2341_v57  ;;  %v2486_v35 = vsel %vm2483_vm2, %v2477_v63, %v8754_v29  ;;  %v2498_v57 = vsel %vm2492_vm0, %v2489_v52, %v6627_v39  ;;  %v8759_v39 = vld [vmem:[#allocation67_spill] sm:$0xff]  ;;  %v2761_v34 = vld [vmem:[%s8412_s13 + $0x18] sm:$0xff] }
 0x3af   : > { %v6730_v30 = vpop.xlane.xlu1 %2074  ;;  %v6732_v4 = vpop.xlane.xlu0 %2173 }
 0x3b0   : > { %v2334_v33 = vmax.f32 %v6709_v46, %v6732_v4  ;;  %v2349_v22 = vmax.f32 %v6707_v2, %v6730_v30 }
 0x3b2   : > { %v2342_v59 = vmax.f32 %v2326_v5, %v2334_v33  ;;  %v8755_v5 = vld [vmem:[#allocation48_spill] sm:$0xff] }
 0x3b3   : > { %v6765_v55 = vpop.xlane.xlu1 %2218  ;;  %v6767_v60 = vpop.xlane.xlu0 %2029 }
 0x3b4   : > { %v2516_v24 = vsel %vm2376_vm5, %v2508_v58, %v2342_v59  ;;  %v2455_v6 = vsel %vm2447_vm12, %v2446_v17, %v6767_v60  ;;  %v2762_v58 = vld [vmem:[%s8412_s13 + $0x20] sm:$0xff] }
 0x3b7   : > { %v6793_v36 = vpop.xlane.xlu0 %2077  ;;  %v6814_v50 = vpop.xlane.xlu1 %2266 }
 0x3b8   : > { %v2357_v54 = vmax.f32 %v6765_v55, %v6814_v50  ;;  %v2350_v40 = vmax.f32 %v6767_v60, %v6793_v36  ;;  %v2464_v33 = vsel %vm2456_vm13, %v2455_v6, %v6793_v36  ;;  %v2454_v60 = vsel %vm2447_vm12, %v2445_v14, %v6707_v2 }
 0x3b9   : > { %v2463_v36 = vsel %vm2456_vm13, %v2454_v60, %v6730_v30  ;;  %v2473_v2 = vsel %vm2465_vm14, %v2464_v33, %v6709_v46  ;;  %v2495_v30 = vsel %vm2492_vm0, %v2486_v35, %v8756_v44  ;;  %v2719_v33 = vld [vmem:[%s8411_s12 + $0x8] sm:$0xff] }
 0x3ba   : > { %v2365_v20 = vmax.f32 %v2349_v22, %v2357_v54  ;;  %v8752_v54 = vld [vmem:[#allocation34_spill] sm:$0xff]  ;;  %v2479_v22 = vsel %vm2474_vm15, %v2470_v49, %v8757_v37  ;;  %v2472_v1 = vsel %vm2465_vm14, %v2463_v36, %v6685_v7  ;;  %v2482_v59 = vsel %vm2474_vm15, %v2473_v2, %v6732_v4  ;;  %v2720_v2 = vld [vmem:[%s8411_s12 + $0x10] sm:$0xff] }
 0x3bb   : > { %v6833_v10 = vpop.xlane.xlu0 %2221  ;;  %v2496_v13 = vsel %vm2492_vm0, %v2487_v61, %v8752_v54  ;;  %v2488_v7 = vsel %vm2483_vm2, %v2479_v22, %v8758_v28  ;;  %v2481_v4 = vsel %vm2474_vm15, %v2472_v1, %v6689_v32  ;;  %v2531_v32 = vld [vmem:[%s8409_s10 + $0x30] sm:$0xff]  ;;  %v2718_v49 = vld [vmem:[%s8411_s12] sm:$0xff] }
 0x3bc   : > { %v2523_v41 = vsel %vm2385_vm6, %v2515_v8, %v2365_v20  ;;  %v4644_v46 = vpack.c.bf16 %v2496_v13, %v2495_v30  ;;  %v2529_v20 = vld [vmem:[%s8409_s10 + $0x20] sm:$0xff]  ;;  %v2490_v15 = vsel %vm2483_vm2, %v2481_v4, %v6765_v55  ;;  %v2765_v8 = vld [vmem:[%s8412_s13 + $0x38] sm:$0xff] }
 0x3bd   : > { %v2758_v55 = vld [vmem:[%s8412_s13] sm:$0xff] }
 0x3bf   : > { %v2270_v0 = vpop.xlane.xlu0 %2269 }
 0x3c0   : > { %v2358_v38 = vmax.f32 %v6833_v10, %v2270_v0 }
 0x3c2   : > { %v2366_v47 = vmax.f32 %v2350_v40, %v2358_v38  ;;  %v2497_v40 = vsel %vm2492_vm0, %v2488_v7, %v8759_v39  ;;  %v2491_v38 = vsel %vm2483_vm2, %v2482_v59, %v6833_v10  ;;  %v2499_v10 = vsel %vm2492_vm0, %v2490_v15, %v6814_v50  ;;  %v2759_v50 = vld [vmem:[%s8412_s13 + $0x8] sm:$0xff]  ;;  %v2722_v59 = vld [vmem:[%s8411_s12 + $0x20] sm:$0xff] }
 0x3c3   : > { %v4648_v3 = vpack.c.bf16 %v2498_v57, %v2497_v40  ;;  %v2500_v12 = vsel %vm2492_vm0, %v2491_v38, %v2270_v0  ;;  %v2723_v7 = vld [vmem:[%s8411_s12 + $0x28] sm:$0xff]  ;;  %vm8760_vm0 = vcmask 130048  }
 0x3c4   : > { %v2524_v21 = vsel %vm2385_vm6, %v2516_v24, %v2366_v47  ;;  %v4652_v0 = vpack.c.bf16 %v2500_v12, %v2499_v10  ;;  %v2760_v47 = vld [vmem:[%s8412_s13 + $0x10] sm:$0xff]  ;;  %v2544_v24 = vpop.permute.xlu1 %2543  ;;  %vm8762_vm4 = vmmov %vm8760_vm0 }
 0x3c5   : > { %v4636_v43 = vpack.c.bf16 %v2524_v21, %v2523_v41  ;;  %v2724_v10 = vld [vmem:[%s8411_s12 + $0x30] sm:$0xff]  ;;  %vm8763_vm5 = vmmov %vm8760_vm0 }
 0x3c6   : > { %vm8764_vm6 = vmmov %vm8760_vm0 }
 0x3c7   : > { %4637 = vmatprep.subr.bf16.mxu0 %v4636_v43  ;;  %v2549_v41 = vpop.permute.xlu0 %2548  ;;  %vm8765_vm7 = vmmov %vm8760_vm0 }
 0x3c8   : > { %4639 = vmatpush3.bf16.msra.mxu0 %v4636_v43  ;;  %v7001_v48 = vpop.permute.xlu1 %2776  ;;  %vm8766_vm8 = vmmov %vm8760_vm0 }
 0x3c9   : > { %4641 = vmatprep.subr.bf16.mxu0 %v8755_v5  ;;  %vm8767_vm9 = vmmov %vm8760_vm0 }
 0x3cb   : > { %4532 = vmatmul.mubr.msk.f32.vlgmr.msra.gmra.mrb[2].mxu0 %vm762_vm1, %v2526_v53  ;;  %v2554_v16 = vpop.permute.xlu0 %2553 }
 0x3cc   : > { %4643 = vmatpush3.bf16.msra.mxu0 %v8755_v5  ;;  %4534 = vmatprep.mubr.msk.f32.mxu0 %vm762_vm1, %v2527_v42  ;;  %v2782_v17 = vpop.permute.xlu1 %2781  ;;  %v2721_v42 = vld [vmem:[%s8411_s12 + $0x18] sm:$0xff] }
 0x3cd   : > { %4645 = vmatprep.subr.bf16.mxu0 %v4644_v46 }
 0x3cf   : > { %4535 = vmatmul.mubr.msk.f32.gmra.mrb[4].mxu0 %vm762_vm1, %v2528_v51  ;;  %v7005_v9 = vpop.permute.xlu0 %2786 }
 0x3d0   : > { %4647 = vmatpush3.bf16.msra.mxu0 %v4644_v46  ;;  %4537 = vmatprep.mubr.msk.f32.mxu0 %vm762_vm1, %v2529_v20  ;;  %v2559_v21 = vpop.permute.xlu1 %2558 }
 0x3d1   : > { %4649 = vmatprep.subr.bf16.mxu0 %v4648_v3 }
 0x3d3   : > { %4538 = vmatmul.mubr.msk.f32.gmra.mrb[6].mxu0 %vm762_vm1, %v2530_v19  ;;  %v2564_v18 = vpop.permute.xlu0 %2563 }
 0x3d4   : > { %4651 = vmatpush3.bf16.msra.mxu0 %v4648_v3  ;;  %4540 = vmatprep.mubr.msk.f32.mxu0 %vm762_vm1, %v2531_v32  ;;  %v7003_v56 = vpop.permute.xlu1 %2791 }
 0x3d5   : > { %4653 = vmatprep.subr.bf16.mxu0 %v4652_v0 }
 0x3d7   : > { %4541 = vmatmul.mubr.msk.f32.gmra.mrb[8].mxu0 %vm762_vm1, %v2532_v62  ;;  %v7015_v53 = vpop.permute.xlu0 %2796  ;;  %v2725_v62 = vld [vmem:[%s8411_s12 + $0x38] sm:$0xff] }
 0x3d8   : > { %4655 = vmatpush3.bf16.msra.mxu0 %v4652_v0  ;;  %4559 = vmatprep.mubr.msk.f32.mxu0 %vm762_vm1, %v2758_v55  ;;  %v2569_v6 = vpop.permute.xlu1 %2568 }
 0x3db   : > { %4560 = vmatmul.mubr.msk.f32.vlgmr.msra.gmra.mrb[10].mxu0 %vm762_vm1, %v2759_v50  ;;  %v2574_v4 = vpop.permute.xlu0 %2573 }
 0x3dc   : > { %4562 = vmatprep.mubr.msk.f32.mxu0 %vm762_vm1, %v2760_v47  ;;  %v7013_v45 = vpop.permute.xlu1 %2801 }
 0x3df   : > { %4563 = vmatmul.mubr.msk.f32.gmra.mrb[12].mxu0 %vm762_vm1, %v2761_v34 }
 0x3e0   : > { %4565 = vmatprep.mubr.msk.f32.mxu0 %vm762_vm1, %v2762_v58  ;;  %v2579_v28 = vpop.permute.xlu1 %2578 }
 0x3e3   : > { %4566 = vmatmul.mubr.msk.f32.gmra.mrb[14].mxu0 %vm762_vm1, %v2763_v23 }
 0x3e4   : > { %4568 = vmatprep.mubr.msk.f32.mxu0 %vm762_vm1, %v2764_v31 }
 0x3e7   : > { %4569 = vmatmul.mubr.msk.f32.gmra.mrb[16].mxu0 %vm762_vm1, %v2765_v8 }
 0x49e   : > { %v4533_v43 = vpop.f32.mrb[2].mxu0 }
 0x49f   : > { %v2677_v63 = vadd.f32 %v4533_v43, %v2549_v41  ;;  %v2671_v14 = vpop.f32.mrb[3].mxu0  ;;  %v2951_v41 = vld [vmem:[%s8414_s15] sm:$0xff] }
 0x4a0   : > { %v2672_v11 = vadd.f32 %v2671_v14, %v2544_v24 }
 0x4a1   : > { %v2711_v61 = vmax.f32 %v2677_v63, 0.0 }
 0x4a2   : > { %v2710_v25 = vmax.f32 %v2672_v11, 0.0  ;;  %v4536_v60 = vpop.f32.mrb[4].mxu0 }
 0x4a3   : > { %v2727_v54 = vmul.f32 %v2719_v33, %v2711_v61  ;;  %v2687_v13 = vadd.f32 %v4536_v60, %v2559_v21  ;;  %v2681_v26 = vpop.f32.mrb[5].mxu0  ;;  %v2953_v61 = vld [vmem:[%s8414_s15 + $0x10] sm:$0xff] }
 0x4a4   : > { %v2682_v36 = vadd.f32 %v2681_v26, %v2554_v16  ;;  %v2726_v29 = vmul.f32 %v2718_v49, %v2710_v25  ;;  %v2952_v16 = vld [vmem:[%s8414_s15 + $0x8] sm:$0xff]  ;;  %v2954_v49 = vld [vmem:[%s8414_s15 + $0x18] sm:$0xff] }
 0x4a5   : > { %v2713_v35 = vmax.f32 %v2687_v13, 0.0  ;;  %v2737_v5 = vsel %vm932_vm3, %v2727_v54, 0.0 }
 0x4a6   : > { %v2712_v44 = vmax.f32 %v2682_v36, 0.0  ;;  %v4539_v30 = vpop.f32.mrb[6].mxu0  ;;  %2738 = vadd.xlane.f32.xlu0 %v2737_v5  ;;  %v2734_v51 = vsel %vm932_vm3, %v2726_v29, 0.0 }
 0x4a7   : > { %v2697_v37 = vadd.f32 %v4539_v30, %v2569_v6  ;;  %v2691_v22 = vpop.f32.mrb[7].mxu0  ;;  %v2729_v46 = vmul.f32 %v2721_v42, %v2713_v35  ;;  %v2812_v42 = vpop.permute.xlu1 %2811 }
 0x4a8   : > { %v2728_v52 = vmul.f32 %v2720_v2, %v2712_v44  ;;  %v2692_v1 = vadd.f32 %v2691_v22, %v2564_v18  ;;  %v2955_v2 = vld [vmem:[%s8414_s15 + $0x20] sm:$0xff]  ;;  %v2956_v44 = vld [vmem:[%s8414_s15 + $0x28] sm:$0xff]  ;;  %v2807_v22 = vpop.permute.xlu0 %2806 }
 0x4a9   : > { %v2715_v57 = vmax.f32 %v2697_v37, 0.0  ;;  %v2743_v0 = vsel %vm932_vm3, %v2729_v46, 0.0 }
 0x4aa   : > { %v2714_v20 = vmax.f32 %v2692_v1, 0.0  ;;  %v4542_v39 = vpop.f32.mrb[8].mxu0  ;;  %2735 = vadd.xlane.f32.xlu0 %v2734_v51  ;;  %v2740_v40 = vsel %vm932_vm3, %v2728_v52, 0.0  ;;  %v2957_v51 = vld [vmem:[%s8414_s15 + $0x30] sm:$0xff] }
 0x4ab   : > { %v2707_v38 = vadd.f32 %v4542_v39, %v2579_v28  ;;  %v2701_v3 = vpop.f32.mrb[9].mxu0  ;;  %2741 = vadd.xlane.f32.xlu1 %v2740_v40  ;;  %v2731_v15 = vmul.f32 %v2723_v7, %v2715_v57  ;;  %v2958_v7 = vld [vmem:[%s8414_s15 + $0x38] sm:$0xff] }
 0x4ac   : > { %v2730_v12 = vmul.f32 %v2722_v59, %v2714_v20  ;;  %v2702_v19 = vadd.f32 %v2701_v3, %v2574_v4 }
 0x4ad   : > { %v2717_v32 = vmax.f32 %v2707_v38, 0.0  ;;  %v2749_v21 = vsel %vm932_vm3, %v2731_v15, 0.0  ;;  %v8768_v15 = vmov 0.0  }
 0x4ae   : > { %v2716_v55 = vmax.f32 %v2702_v19, 0.0  ;;  %v4561_v50 = vpop.f32.mrb[10].mxu0  ;;  %2744 = vadd.xlane.f32.xlu0 %v2743_v0  ;;  %v2746_v47 = vsel %vm932_vm3, %v2730_v12, 0.0  ;;  %v5029_v19 = vmov 0.0|0.0   ;;  %4587 = vmatprep.mubr.msk.f32.mxu0 %vm5030_vm11, %v8768_v15 }
 0x4af   : > { %v2910_v34 = vadd.f32 %v4561_v50, %v2782_v17  ;;  %v2904_v58 = vpop.f32.mrb[11].mxu0  ;;  %2747 = vadd.xlane.f32.xlu1 %v2746_v47  ;;  %v2733_v8 = vmul.f32 %v2725_v62, %v2717_v32  ;;  %4656 = vmatprep.subr.bf16.mxu0 %v5029_v19  ;;  %v1469_v32 = vpop.xlane.xlu0 %1468 }
 0x4b0   : > { %v2732_v23 = vmul.f32 %v2724_v10, %v2716_v55  ;;  %v2905_v31 = vadd.f32 %v2904_v58, %v7001_v48  ;;  %v1472_v10 = vpop.xlane.xlu1 %1471 }
 0x4b1   : > { %v2944_v24 = vmax.f32 %v2910_v34, 0.0  ;;  %v2755_v25 = vsel %vm932_vm3, %v2733_v8, 0.0 }
 0x4b2   : > { %v2943_v6 = vmax.f32 %v2905_v31, 0.0  ;;  %v4564_v43 = vpop.f32.mrb[12].mxu0  ;;  %2750 = vadd.xlane.f32.xlu0 %v2749_v21  ;;  %v2752_v17 = vsel %vm932_vm3, %v2732_v23, 0.0  ;;  %vm8761_vm3 = vmmov %vm8760_vm0 }
 0x4b3   : > { %v2920_v18 = vadd.f32 %v4564_v43, %v7003_v56  ;;  %v2914_v48 = vpop.f32.mrb[13].mxu0  ;;  %2753 = vadd.xlane.f32.xlu1 %v2752_v17  ;;  %v2960_v33 = vmul.f32 %v2952_v16, %v2944_v24  ;;  %v1478_v0 = vpop.xlane.xlu0 %1477  ;;  %v1491_v16 = vmul.f32 0.00390625, %v1469_v32  ;;  %v1492_v17 = vmul.f32 0.00390625, %v1472_v10 }
 0x4b4   : > { %v2959_v63 = vmul.f32 %v2951_v41, %v2943_v6  ;;  %v2915_v14 = vadd.f32 %v2914_v48, %v7005_v9  ;;  %v1475_v62 = vpop.xlane.xlu1 %1474 }
 0x4b5   : > { %v2946_v11 = vmax.f32 %v2920_v18, 0.0  ;;  %v2970_v5 = vsel %vm8761_vm3, %v2960_v33, 0.0  ;;  %v1493_v48 = vmul.f32 0.00390625, %v1475_v62 }
 0x4b6   : > { %v2945_v60 = vmax.f32 %v2915_v14, 0.0  ;;  %v4567_v54 = vpop.f32.mrb[14].mxu0  ;;  %2756 = vadd.xlane.f32.xlu0 %v2755_v25  ;;  %v2967_v56 = vsel %vm8760_vm0, %v2959_v63, 0.0 }
 0x4b7   : > { %v2930_v13 = vadd.f32 %v4567_v54, %v7013_v45  ;;  %v2924_v9 = vpop.f32.mrb[15].mxu0  ;;  %2968 = vadd.xlane.f32.xlu1 %v2967_v56  ;;  %v2962_v29 = vmul.f32 %v2954_v49, %v2946_v11  ;;  %v1484_v55 = vpop.xlane.xlu0 %1483 }
 0x4b8   : > { %v2961_v26 = vmul.f32 %v2953_v61, %v2945_v60  ;;  %v2925_v36 = vadd.f32 %v2924_v9, %v7015_v53  ;;  %v1481_v50 = vpop.xlane.xlu1 %1480  ;;  %v1494_v61 = vmul.f32 0.00390625, %v1478_v0 }
 0x4b9   : > { %v2948_v35 = vmax.f32 %v2930_v13, 0.0  ;;  %v2976_v28 = vsel %vm8763_vm5, %v2962_v29, 0.0  ;;  %v1495_v54 = vmul.f32 0.00390625, %v1481_v50 }
 0x4ba   : > { %v2947_v30 = vmax.f32 %v2925_v36, 0.0  ;;  %v4570_v45 = vpop.f32.mrb[16].mxu0  ;;  %2971 = vadd.xlane.f32.xlu0 %v2970_v5  ;;  %v2973_v37 = vsel %vm8762_vm4, %v2961_v26, 0.0  ;;  %v1496_v26 = vmul.f32 0.00390625, %v1484_v55 }
 0x4bb   : > { %v2940_v53 = vadd.f32 %v4570_v45, %v2812_v42  ;;  %v2934_v52 = vpop.f32.mrb[17].mxu0  ;;  %2974 = vadd.xlane.f32.xlu1 %v2973_v37  ;;  %v2964_v57 = vmul.f32 %v2956_v44, %v2948_v35  ;;  %v1490_v47 = vpop.xlane.xlu0 %1489 }
 0x4bc   : > { %v2963_v1 = vmul.f32 %v2955_v2, %v2947_v30  ;;  %v2935_v46 = vadd.f32 %v2934_v52, %v2807_v22  ;;  %v1487_v58 = vpop.xlane.xlu1 %1486  ;;  %v1498_v52 = vmul.f32 0.00390625, %v1490_v47 }
 0x4bd   : > { %v2950_v59 = vmax.f32 %v2940_v53, 0.0  ;;  %v2982_v38 = vsel %vm8765_vm7, %v2964_v57, 0.0  ;;  %v1497_v30 = vmul.f32 0.00390625, %v1487_v58  ;;  %v3100_v58 = vld [vmem:[%s8417_s18] sm:$0xff] }
 0x4be   : > { %v2949_v20 = vmax.f32 %v2935_v46, 0.0  ;;  %2977 = vadd.xlane.f32.xlu0 %v2976_v28  ;;  %v2979_v39 = vsel %vm8764_vm6, %v2963_v1, 0.0 }
 0x4bf   : > { %2980 = vadd.xlane.f32.xlu1 %v2979_v39  ;;  %v2966_v4 = vmul.f32 %v2958_v7, %v2950_v59 }
 0x4c0   : > { %v2965_v40 = vmul.f32 %v2957_v51, %v2949_v20 }
 0x4c1   : > { %v2988_v12 = vsel %vm8767_vm9, %v2966_v4, 0.0 }
 0x4c2   : > { %2983 = vadd.xlane.f32.xlu0 %v2982_v38  ;;  %v2985_v3 = vsel %vm8766_vm8, %v2965_v40, 0.0 }
 0x4c3   : > { %2986 = vadd.xlane.f32.xlu1 %v2985_v3 }
 0x4c6   : > { %2989 = vadd.xlane.f32.xlu0 %v2988_v12 }
 0x533   : > { %v2739_v34 = vpop.xlane.xlu0 %2738 }
 0x534   : > { %v2992_v14 = vadd.f32 %v2739_v34, %v1492_v17  ;;  %v3024_v34 = vld [vmem:[%s8415_s16] sm:$0xff]  ;;  %v3106_v17 = vld [vmem:[%s8417_s18 + $0x30] sm:$0xff] }
 0x537   : > { %v2736_v23 = vpop.xlane.xlu0 %2735 }
 0x538   : > { %v2742_v31 = vpop.xlane.xlu1 %2741  ;;  %v2991_v6 = vadd.f32 %v2736_v23, %v1491_v16  ;;  %v3025_v23 = vld [vmem:[%s8416_s17] sm:$0xff]  ;;  %v3103_v16 = vld [vmem:[%s8417_s18 + $0x18] sm:$0xff] }
 0x539   : > { %v2993_v33 = vadd.f32 %v2742_v31, %v1493_v48  ;;  %v3109_v48 = vld [vmem:[%s8418_s19 + $0x8] sm:$0xff] }
 0x53b   : > { %v2745_v8 = vpop.xlane.xlu0 %2744 }
 0x53c   : > { %v2748_v24 = vpop.xlane.xlu1 %2747  ;;  %v2994_v13 = vadd.f32 %v2745_v8, %v1494_v61 }
 0x53d   : > { %v2995_v36 = vadd.f32 %v2748_v24, %v1495_v54 }
 0x53f   : > { %v2751_v41 = vpop.xlane.xlu0 %2750 }
 0x540   : > { %v2754_v21 = vpop.xlane.xlu1 %2753  ;;  %v2996_v37 = vadd.f32 %v2751_v41, %v1496_v26  ;;  %v3101_v41 = vld [vmem:[%s8417_s18 + $0x8] sm:$0xff] }
 0x541   : > { %v2997_v1 = vadd.f32 %v2754_v21, %v1497_v30  ;;  %v3102_v21 = vld [vmem:[%s8417_s18 + $0x10] sm:$0xff] }
 0x543   : > { %v2757_v43 = vpop.xlane.xlu0 %2756 }
 0x544   : > { %v2969_v18 = vpop.xlane.xlu1 %2968  ;;  %v2998_v39 = vadd.f32 %v2757_v43, %v1498_v52  ;;  %v3105_v43 = vld [vmem:[%s8417_s18 + $0x28] sm:$0xff] }
 0x545   : > { %v2999_v63 = vadd.f32 %v2991_v6, %v2969_v18  ;;  %v3104_v6 = vld [vmem:[%s8417_s18 + $0x20] sm:$0xff]  ;;  %v3107_v18 = vld [vmem:[%s8417_s18 + $0x38] sm:$0xff] }
 0x547   : > { %v2972_v11 = vpop.xlane.xlu0 %2971  ;;  %v3008_v25 = vmul.f32 0.33333334, %v2999_v63  ;;  %v3108_v63 = vld [vmem:[%s8418_s19] sm:$0xff] }
 0x548   : > { %v3000_v49 = vadd.f32 %v2992_v14, %v2972_v11  ;;  %v2975_v60 = vpop.xlane.xlu1 %2974 }
 0x549   : > { %v3001_v56 = vadd.f32 %v2993_v33, %v2975_v60  ;;  %v3016_v35 = vfloor.f32 %v3008_v25  ;;  %v3111_v25 = vld [vmem:[%s8418_s19 + $0x18] sm:$0xff]  ;;  %v3110_v60 = vld [vmem:[%s8418_s19 + $0x10] sm:$0xff] }
 0x54a   : > { %v3009_v9 = vmul.f32 0.33333334, %v3000_v49 }
 0x54b   : > { %v2978_v29 = vpop.xlane.xlu0 %2977  ;;  %v3010_v5 = vmul.f32 0.33333334, %v3001_v56 }
 0x54c   : > { %v3017_v2 = vfloor.f32 %v3009_v9  ;;  %v3002_v42 = vadd.f32 %v2994_v13, %v2978_v29  ;;  %v2981_v44 = vpop.xlane.xlu1 %2980 }
 0x54d   : > { %v3003_v45 = vadd.f32 %v2995_v36, %v2981_v44  ;;  %v3018_v57 = vfloor.f32 %v3010_v5  ;;  %v3113_v36 = vld [vmem:[%s8418_s19 + $0x28] sm:$0xff] }
 0x54e   : > { %v4657_v22 = vpack.c.bf16 %v3017_v2, %v3016_v35  ;;  %v3011_v53 = vmul.f32 0.33333334, %v3002_v42  ;;  %v3112_v35 = vld [vmem:[%s8418_s19 + $0x20] sm:$0xff] }
 0x54f   : > { %v2984_v46 = vpop.xlane.xlu0 %2983  ;;  %v3012_v51 = vmul.f32 0.33333334, %v3003_v45  ;;  %v3115_v45 = vld [vmem:[%s8418_s19 + $0x38] sm:$0xff] }
 0x550   : > { %v3019_v59 = vfloor.f32 %v3011_v53  ;;  %v3004_v28 = vadd.f32 %v2996_v37, %v2984_v46  ;;  %v2987_v7 = vpop.xlane.xlu1 %2986  ;;  %4658 = vmatpush3.bf16.msra.mxu0 %v4657_v22  ;;  %v3114_v22 = vld [vmem:[%s8418_s19 + $0x30] sm:$0xff] }
 0x551   : > { %v3005_v20 = vadd.f32 %v2997_v1, %v2987_v7  ;;  %4659 = vmatprep.subr.bf16.mxu0 %v5029_v19  ;;  %v3020_v3 = vfloor.f32 %v3012_v51 }
 0x552   : > { %v4660_v40 = vpack.c.bf16 %v3019_v59, %v3018_v57  ;;  %v3013_v4 = vmul.f32 0.33333334, %v3004_v28 }
 0x553   : > { %v2990_v38 = vpop.xlane.xlu0 %2989  ;;  %v3014_v32 = vmul.f32 0.33333334, %v3005_v20 }
 0x554   : > { %v3021_v12 = vfloor.f32 %v3013_v4  ;;  %v3006_v10 = vadd.f32 %v2998_v39, %v2990_v38  ;;  %4661 = vmatpush3.bf16.msra.mxu0 %v4660_v40 }
 0x555   : > { %4662 = vmatprep.subr.bf16.mxu0 %v5029_v19  ;;  %v3022_v55 = vfloor.f32 %v3014_v32 }
 0x556   : > { %v4663_v0 = vpack.c.bf16 %v3021_v12, %v3020_v3  ;;  %v3015_v62 = vmul.f32 0.33333334, %v3006_v10 }
 0x558   : > { %v3023_v50 = vfloor.f32 %v3015_v62  ;;  %4664 = vmatpush3.bf16.msra.mxu0 %v4663_v0 }
 0x559   : > { %4665 = vmatprep.subr.bf16.mxu0 %v5029_v19 }
 0x55a   : > { %v4666_v47 = vpack.c.bf16 %v3023_v50, %v3022_v55 }
 0x55c   : > { %4667 = vmatpush3.bf16.msra.mxu0 %v4666_v47 }
 0x55f   : > { %4588 = vmatmul.mubr.msk.f32.vlgmr.msra.gmra.mrb[18].mxu0 %vm762_vm1, %v3024_v34 }
 0x560   : > { %4592 = vmatprep.mubr.msk.f32.mxu0 %vm2429_vm10, %v3100_v58 }
 0x632   : > { %v3095_v31 = vpop.f32.mrb[18].mxu0 }
 0x633   : > { %v3096_v19 = vadd.f32 %v3095_v31, %v3025_v23  ;;  %v4589_v8 = vpop.f32.mrb[19].mxu0 }
 0x635   : > { %v3099_v24 = vmax.f32 %v3096_v19, 0.0 }
 0x637   : > { %4590 = vmatprep.subr.mxu0 %v3099_v24 }
 0x638   : > { %4591 = vmatpush3.msra.mxu0 %v3099_v24 }
 0x639   : > { %4593 = vmatmul.mubr.msk.f32.vlgmr.msra.gmra.mrb[20].mxu0 %vm2429_vm10, %v3101_v41 }
 0x63a   : > { %4595 = vmatprep.mubr.msk.f32.mxu0 %vm2429_vm10, %v3102_v21 }
 0x63d   : > { %4596 = vmatmul.mubr.msk.f32.gmra.mrb[22].mxu0 %vm2429_vm10, %v3103_v16  ;;  %v8769_v16 = vld [vmem:[#allocation21_spill] sm:$0xff] }
 0x63e   : > { %4598 = vmatprep.mubr.msk.f32.mxu0 %vm2429_vm10, %v3104_v6 }
 0x641   : > { %4599 = vmatmul.mubr.msk.f32.gmra.mrb[24].mxu0 %vm2429_vm10, %v3105_v43  ;;  %v8770_v43 = vld [vmem:[#allocation22_spill] sm:$0xff] }
 0x642   : > { %4601 = vmatprep.mubr.msk.f32.mxu0 %vm2429_vm10, %v3106_v17 }
 0x645   : > { %4602 = vmatmul.mubr.msk.f32.gmra.mrb[26].mxu0 %vm2429_vm10, %v3107_v18 }
 0x70c   : > { %v4594_v14 = vpop.f32.mrb[20].mxu0 }
 0x70d   : > { %v3212_v33 = vadd.f32 %v4594_v14, %v3109_v48  ;;  %v3206_v11 = vpop.f32.mrb[21].mxu0 }
 0x70e   : > { %v3207_v61 = vadd.f32 %v3206_v11, %v3108_v63  ;;  %v8771_v63 = vld [vmem:[#allocation19_spill] sm:$0xff] }
 0x70f   : > { %v4445_v49 = vmul.f32 -1.442695, %v3212_v33 }
 0x710   : > { %v4444_v54 = vmul.f32 -1.442695, %v3207_v61  ;;  %v4597_v56 = vpop.f32.mrb[22].mxu0 }
 0x711   : > { %4931 = vpow2.f32 %v4445_v49  ;;  %v3222_v13 = vadd.f32 %v4597_v56, %v3111_v25  ;;  %v3216_v9 = vpop.f32.mrb[23].mxu0  ;;  %v8772_v49 = vld [vmem:[#allocation40_spill] sm:$0xff] }
 0x712   : > { %4933 = vpow2.f32 %v4444_v54  ;;  %v3217_v26 = vadd.f32 %v3216_v9, %v3110_v60  ;;  %v8773_v54 = vld [vmem:[#allocation41_spill] sm:$0xff] }
 0x713   : > { %v4447_v29 = vmul.f32 -1.442695, %v3222_v13  ;;  %v8774_v13 = vld [vmem:[#allocation38_spill] sm:$0xff] }
 0x714   : > { %v4446_v2 = vmul.f32 -1.442695, %v3217_v26  ;;  %v4600_v5 = vpop.f32.mrb[24].mxu0  ;;  %v8775_v26 = vld [vmem:[#allocation39_spill] sm:$0xff] }
 0x715   : > { %4935 = vpow2.f32 %v4447_v29  ;;  %v3232_v42 = vadd.f32 %v4600_v5, %v3113_v36  ;;  %v3226_v44 = vpop.f32.mrb[25].mxu0  ;;  %v8776_v5 = vld [vmem:[#allocation42_spill] sm:$0xff] }
 0x716   : > { %4937 = vpow2.f32 %v4446_v2  ;;  %v3227_v30 = vadd.f32 %v3226_v44, %v3112_v35  ;;  %v8777_v44 = vld [vmem:[#allocation43_spill] sm:$0xff] }
 0x717   : > { %v4449_v37 = vmul.f32 -1.442695, %v3232_v42 }
 0x718   : > { %v4448_v53 = vmul.f32 -1.442695, %v3227_v30  ;;  %v4603_v52 = vpop.f32.mrb[26].mxu0 }
 0x719   : > { %4939 = vpow2.f32 %v4449_v37  ;;  %v3242_v1 = vadd.f32 %v4603_v52, %v3115_v45  ;;  %v3236_v46 = vpop.f32.mrb[27].mxu0  ;;  %v8778_v45 = vld [vmem:[#allocation44_spill] sm:$0xff] }
 0x71a   : > { %4941 = vpow2.f32 %v4448_v53  ;;  %v3237_v57 = vadd.f32 %v3236_v46, %v3114_v22  ;;  %v8779_v22 = vld [vmem:[#allocation45_spill] sm:$0xff] }
 0x71b   : > { %v4932_v59 = vpop.eup %4931  ;;  %v4451_v51 = vmul.f32 -1.442695, %v3242_v1 }
 0x71c   : > { %v4934_v28 = vpop.eup %4933  ;;  %v3270_v7 = vadd.f32 1.0, %v4932_v59  ;;  %v4450_v20 = vmul.f32 -1.442695, %v3237_v57  ;;  %v8780_v59 = vld [vmem:[#allocation49_spill] sm:$0xff] }
 0x71d   : > { %v3269_v39 = vadd.f32 1.0, %v4934_v28  ;;  %4943 = vpow2.f32 %v4451_v51  ;;  %v8781_v28 = vld [vmem:[#allocation50_spill] sm:$0xff] }
 0x71e   : > { %4945 = vrcp.f32 %v3270_v7 }
 0x71f   : > { %v4936_v40 = vpop.eup %4935  ;;  %4947 = vrcp.f32 %v3269_v39 }
 0x720   : > { %v4938_v4 = vpop.eup %4937  ;;  %v3272_v38 = vadd.f32 1.0, %v4936_v40  ;;  %4949 = vpow2.f32 %v4450_v20  ;;  %v8782_v20 = vld [vmem:[#allocation51_spill] sm:$0xff]  ;;  %v8783_v40 = vld [vmem:[#allocation52_spill] sm:$0xff] }
 0x721   : > { %v3271_v3 = vadd.f32 1.0, %v4938_v4 }
 0x722   : > { %4951 = vrcp.f32 %v3272_v38 }
 0x723   : > { %v4940_v12 = vpop.eup %4939  ;;  %4953 = vrcp.f32 %v3271_v3 }
 0x724   : > { %v4942_v32 = vpop.eup %4941  ;;  %v3274_v10 = vadd.f32 1.0, %v4940_v12  ;;  %v8784_v12 = vlaneseq }
 0x725   : > { %v3273_v0 = vadd.f32 1.0, %v4942_v32 }
 0x726   : > { %v7325_v32 = vand.u32 127, %v8784_v12 }
 0x727   : > { %v4944_v62 = vpop.eup %4943  ;;  %4955 = vrcp.f32 %v3273_v0  ;;  %v7339_v0 = vld [vmem:[%s8421_s22 + $0x8] sm:$0xff] }
 0x728   : > { %v4946_v55 = vpop.eup %4945  ;;  %v3276_v50 = vadd.f32 1.0, %v4944_v62  ;;  %4957 = vrcp.f32 %v3274_v10  ;;  %v7334_v10 = vld [vmem:[%s8421_s22] sm:$0xff]  ;;  %vm3387_vm10 = vcmp.lt.s32.totalorder %v7325_v32, 17  ;;  %vm3679_vm12 = vcmp.lt.s32.totalorder %v7325_v32, 127 }
 0x729   : > { %v4948_v47 = vpop.eup %4947  ;;  %3300 = vperm.xlu0 %4928, %v4946_v55   ;;  %vm3460_vm13 = vcmp.lt.s32.totalorder %v7325_v32, 16  ;;  %vm3752_vm14 = vcmp.lt.s32.totalorder %v7325_v32, 113  ;;  %vm3533_vm15 = vcmp.lt.s32.totalorder %v7325_v32, 15  ;;  %vm3825_vm2 = vcmp.lt.s32.totalorder %v7325_v32, 112 }
 0x72a   : > { %v4950_v34 = vpop.eup %4949  ;;  %3295 = vperm.xlu1 %4929, %v4948_v47   ;;  %4959 = vrcp.f32 %v3276_v50  ;;  %v8785_v50 = vld [vmem:[#allocation15_spill] sm:$0xff]  ;;  %vm3606_vm0 = vcmp.lt.s32.totalorder %v7325_v32, 1  ;;  %vm3898_vm3 = vcmp.lt.s32.totalorder %v7325_v32, 111 }
 0x72b   : > { %v3275_v58 = vadd.f32 1.0, %v4950_v34  ;;  %v7346_v47 = vrot.slane %v7334_v10, %v8785_v50  ;;  %v7350_v34 = vrot.slane %v7339_v0, %v8785_v50  ;;  %v3944_v32 = vld [vmem:[%s8419_s20 + $0x28] sm:$0xff] }
 0x72c   : > { %v4952_v23 = vpop.eup %4951 }
 0x72d   : > { %4961 = vrcp.f32 %v3275_v58  ;;  %v4954_v31 = vpop.eup %4953 }
 0x72e   : > { %3310 = vperm.xlu1 %4929, %v4952_v23  }
 0x731   : > { %v4956_v19 = vpop.eup %4955 }
 0x732   : > { %3315 = vperm.xlu0 %4928, %v4956_v19   ;;  %3305 = vperm.xlu1 %4929, %v4954_v31   ;;  %v4958_v8 = vpop.eup %4957 }
 0x734   : > { %v4960_v24 = vpop.eup %4959 }
 0x736   : > { %3320 = vperm.xlu1 %4929, %v4958_v8  }
 0x737   : > { %v4962_v41 = vpop.eup %4961 }
 0x738   : > { %3325 = vperm.xlu0 %4928, %v4962_v41  }
 0x73a   : > { %3330 = vperm.xlu1 %4929, %v4960_v24  }
 0x7a8   : > { %v3301_v21 = vpop.permute.xlu0 %3300 }
 0x7a9   : > { %v7149_v6 = vmul.f32 %v3301_v21, %v8769_v16  ;;  %v7152_v17 = vmul.f32 %v3301_v21, %v8770_v43  ;;  %v3296_v18 = vpop.permute.xlu1 %3295 }
 0x7aa   : > { %v7155_v48 = vmul.f32 %v3296_v18, %v8718_v27  ;;  %v7158_v14 = vmul.f32 %v3296_v18, %v8771_v63  ;;  %v8786_v63 = vld [vmem:[#allocation20_spill] sm:$0xff] }
 0x7ab   : > { %3355 = vrot.lane.b32.xlu1 %v7149_v6, %s5031_s3 }
 0x7ac   : > { %3353 = vrot.lane.b32.xlu0 %v7155_v48, %s5031_s3  ;;  %v4732_v33 = vpack.c.bf16 %v7152_v17, %v7158_v14  ;;  %v4734_v11 = vpack.c.bf16 %v7149_v6, %v7155_v48 }
 0x7ad   : > { %v3311_v61 = vpop.permute.xlu1 %3310 }
 0x7ae   : > { %4733 = vmatprep.subr.bf16.mxu0 %v4732_v33  ;;  %v7173_v60 = vmul.f32 %v3311_v61, %v8772_v49  ;;  %v7176_v56 = vmul.f32 %v3311_v61, %v8773_v54  ;;  %v7379_v33 = vrot.slane %v7339_v0, %v8786_v63 }
 0x7af   : > { %3371 = vrot.lane.b32.xlu1 %v7152_v17, %s5031_s3  ;;  %4735 = vmatpush1.bf16.msra.mxu0 %v4734_v11 }
 0x7b0   : > { %3369 = vrot.lane.b32.xlu0 %v7158_v14, %s5031_s3 }
 0x7b1   : > { %v3316_v27 = vpop.permute.xlu0 %3315  ;;  %v3306_v25 = vpop.permute.xlu1 %3305 }
 0x7b2   : > { %v7179_v9 = vmul.f32 %v3306_v25, %v8774_v13  ;;  %v7182_v36 = vmul.f32 %v3306_v25, %v8775_v26  ;;  %v7193_v42 = vmul.f32 %v3316_v27, %v8776_v5  ;;  %v7196_v30 = vmul.f32 %v3316_v27, %v8777_v44 }
 0x7b3   : > { %3649 = vrot.lane.b32.xlu1 %v7149_v6, %s5032_s27 }
 0x7b4   : > { %3647 = vrot.lane.b32.xlu0 %v7155_v48, %s5032_s27  ;;  %v4736_v29 = vpack.c.bf16 %v7176_v56, %v7182_v36  ;;  %v4738_v35 = vpack.c.bf16 %v7173_v60, %v7179_v9 }
 0x7b5   : > { %v3321_v2 = vpop.permute.xlu1 %3320 }
 0x7b6   : > { %v7199_v37 = vmul.f32 %v3321_v2, %v8778_v45  ;;  %v7202_v53 = vmul.f32 %v3321_v2, %v8779_v22  ;;  %4737 = vmatprep.subr.bf16.mxu0 %v4736_v29  ;;  %v8787_v2 = vld [vmem:[#allocation17_spill] sm:$0xff] }
 0x7b7   : > { %v3326_v52 = vpop.permute.xlu0 %3325  ;;  %3665 = vrot.lane.b32.xlu1 %v7152_v17, %s5032_s27  ;;  %4739 = vmatpush1.bf16.msra.mxu0 %v4738_v35  ;;  %v7404_v5 = vrot.slane %v7334_v10, %v8787_v2  ;;  %v7408_v44 = vrot.slane %v7339_v0, %v8787_v2 }
 0x7b8   : > { %3663 = vrot.lane.b32.xlu0 %v7158_v14, %s5032_s27  ;;  %v4740_v1 = vpack.c.bf16 %v7202_v53, %v7196_v30  ;;  %v4742_v46 = vpack.c.bf16 %v7199_v37, %v7193_v42  ;;  %v7213_v51 = vmul.f32 %v3326_v52, %v8780_v59  ;;  %v7216_v7 = vmul.f32 %v3326_v52, %v8781_v28 }
 0x7b9   : > { %v3331_v57 = vpop.permute.xlu1 %3330 }
 0x7ba   : > { %v7219_v39 = vmul.f32 %v3331_v57, %v8782_v20  ;;  %v7222_v4 = vmul.f32 %v3331_v57, %v8783_v40  ;;  %4741 = vmatprep.subr.bf16.mxu0 %v4740_v1 }
 0x7bb   : > { %3430 = vrot.lane.b32.xlu1 %v7149_v6, %s8596_s5  ;;  %4743 = vmatpush1.bf16.msra.mxu0 %v4742_v46 }
 0x7bc   : > { %3428 = vrot.lane.b32.xlu0 %v7155_v48, %s8596_s5  ;;  %v4744_v38 = vpack.c.bf16 %v7222_v4, %v7216_v7  ;;  %v4746_v3 = vpack.c.bf16 %v7219_v39, %v7213_v51 }
 0x7be   : > { %4745 = vmatprep.subr.bf16.mxu0 %v4744_v38 }
 0x7bf   : > { %3446 = vrot.lane.b32.xlu1 %v7152_v17, %s8596_s5  ;;  %4747 = vmatpush1.bf16.msra.mxu0 %v4746_v3 }
 0x7c0   : > { %3444 = vrot.lane.b32.xlu0 %v7158_v14, %s8596_s5 }
 0x7c3   : > { %3722 = vrot.lane.b32.xlu1 %v7149_v6, %s5034_s2 }
 0x7c4   : > { %3720 = vrot.lane.b32.xlu0 %v7155_v48, %s5034_s2 }
 0x7c7   : > { %3738 = vrot.lane.b32.xlu1 %v7152_v17, %s5034_s2 }
 0x7c8   : > { %3736 = vrot.lane.b32.xlu0 %v7158_v14, %s5034_s2 }
 0x7cb   : > { %3503 = vrot.lane.b32.xlu1 %v7149_v6, %s8547_s24 }
 0x7cc   : > { %3501 = vrot.lane.b32.xlu0 %v7155_v48, %s8547_s24 }
 0x7cf   : > { %3519 = vrot.lane.b32.xlu1 %v7152_v17, %s8547_s24 }
 0x7d0   : > { %3517 = vrot.lane.b32.xlu0 %v7158_v14, %s8547_s24 }
 0x7d3   : > { %3795 = vrot.lane.b32.xlu1 %v7149_v6, %s5036_s26 }
 0x7d4   : > { %3793 = vrot.lane.b32.xlu0 %v7155_v48, %s5036_s26 }
 0x7d7   : > { %3811 = vrot.lane.b32.xlu1 %v7152_v17, %s5036_s26 }
 0x7d8   : > { %3809 = vrot.lane.b32.xlu0 %v7158_v14, %s5036_s26 }
 0x7db   : > { %3576 = vrot.lane.b32.xlu1 %v7149_v6, %s5037_s4 }
 0x7dc   : > { %3574 = vrot.lane.b32.xlu0 %v7155_v48, %s5037_s4 }
 0x7df   : > { %3592 = vrot.lane.b32.xlu1 %v7152_v17, %s5037_s4 }
 0x7e0   : > { %3590 = vrot.lane.b32.xlu0 %v7158_v14, %s5037_s4 }
 0x7e3   : > { %3868 = vrot.lane.b32.xlu1 %v7149_v6, %s5038_s25 }
 0x7e4   : > { %3866 = vrot.lane.b32.xlu0 %v7155_v48, %s5038_s25 }
 0x7e7   : > { %3884 = vrot.lane.b32.xlu1 %v7152_v17, %s5038_s25 }
 0x7e8   : > { %3882 = vrot.lane.b32.xlu0 %v7158_v14, %s5038_s25  ;;  %v7375_v14 = vrot.slane %v7334_v10, %v8786_v63 }
 0x7eb   : > { %3359 = vrot.lane.b32.xlu1 %v7173_v60, %s5031_s3 }
 0x7ec   : > { %3357 = vrot.lane.b32.xlu0 %v7179_v9, %s5031_s3 }
 0x7ef   : > { %3375 = vrot.lane.b32.xlu1 %v7176_v56, %s5031_s3 }
 0x7f0   : > { %3373 = vrot.lane.b32.xlu0 %v7182_v36, %s5031_s3 }
 0x7f3   : > { %3653 = vrot.lane.b32.xlu1 %v7173_v60, %s5032_s27 }
 0x7f4   : > { %3651 = vrot.lane.b32.xlu0 %v7179_v9, %s5032_s27 }
 0x7f7   : > { %3669 = vrot.lane.b32.xlu1 %v7176_v56, %s5032_s27 }
 0x7f8   : > { %3667 = vrot.lane.b32.xlu0 %v7182_v36, %s5032_s27 }
 0x7fb   : > { %3434 = vrot.lane.b32.xlu1 %v7173_v60, %s8596_s5 }
 0x7fc   : > { %3432 = vrot.lane.b32.xlu0 %v7179_v9, %s8596_s5 }
 0x7ff   : > { %3450 = vrot.lane.b32.xlu1 %v7176_v56, %s8596_s5 }
 0x800   : > { %3448 = vrot.lane.b32.xlu0 %v7182_v36, %s8596_s5 }
 0x803   : > { %3726 = vrot.lane.b32.xlu1 %v7173_v60, %s5034_s2 }
 0x804   : > { %3724 = vrot.lane.b32.xlu0 %v7179_v9, %s5034_s2 }
 0x807   : > { %3742 = vrot.lane.b32.xlu1 %v7176_v56, %s5034_s2 }
 0x808   : > { %3740 = vrot.lane.b32.xlu0 %v7182_v36, %s5034_s2 }
 0x80b   : > { %3507 = vrot.lane.b32.xlu1 %v7173_v60, %s8547_s24 }
 0x80c   : > { %3505 = vrot.lane.b32.xlu0 %v7179_v9, %s8547_s24 }
 0x80f   : > { %3523 = vrot.lane.b32.xlu1 %v7176_v56, %s8547_s24 }
 0x810   : > { %3521 = vrot.lane.b32.xlu0 %v7182_v36, %s8547_s24  ;;  %s8795_s24 = smov 15  }
 0x813   : > { %3799 = vrot.lane.b32.xlu1 %v7173_v60, %s5036_s26 }
 0x814   : > { %3797 = vrot.lane.b32.xlu0 %v7179_v9, %s5036_s26 }
 0x817   : > { %3815 = vrot.lane.b32.xlu1 %v7176_v56, %s5036_s26 }
 0x818   : > { %3813 = vrot.lane.b32.xlu0 %v7182_v36, %s5036_s26 }
 0x81b   : > { %3580 = vrot.lane.b32.xlu1 %v7173_v60, %s5037_s4 }
 0x81c   : > { %3578 = vrot.lane.b32.xlu0 %v7179_v9, %s5037_s4 }
 0x81d   : > { %v3356_v62 = vpop.permute.xlu1 %3355 }
 0x81e   : > { %v3354_v55 = vpop.permute.xlu0 %3353 }
 0x81f   : > { %3596 = vrot.lane.b32.xlu1 %v7176_v56, %s5037_s4 }
 0x820   : > { %3594 = vrot.lane.b32.xlu0 %v7182_v36, %s5037_s4 }
 0x821   : > { %v3372_v58 = vpop.permute.xlu1 %3371 }
 0x822   : > { %v3389_v23 = vsel %vm3387_vm10, %v3356_v62, %v3372_v58  ;;  %v3397_v31 = vsel %vm3387_vm10, %v3372_v58, %v3356_v62  ;;  %v3370_v19 = vpop.permute.xlu0 %3369 }
 0x823   : > { %v3414_v8 = vmul.f32 %v7346_v47, %v3397_v31  ;;  %v3415_v24 = vmul.f32 %v7350_v34, %v3389_v23  ;;  %v3388_v41 = vsel %vm3387_vm10, %v3354_v55, %v3370_v19  ;;  %v3396_v21 = vsel %vm3387_vm10, %v3370_v19, %v3354_v55  ;;  %3872 = vrot.lane.b32.xlu1 %v7173_v60, %s5038_s25  ;;  %v8788_v55 = vld [vmem:[#allocation23_spill] sm:$0xff] }
 0x824   : > { %v3412_v16 = vmul.f32 %v7346_v47, %v3396_v21  ;;  %v3413_v6 = vmul.f32 %v7350_v34, %v3388_v41  ;;  %3870 = vrot.lane.b32.xlu0 %v7179_v9, %s5038_s25  ;;  %v7445_v50 = vrot.slane %v7334_v10, %v8788_v55  ;;  %v7449_v58 = vrot.slane %v7339_v0, %v8788_v55 }
 0x825   : > { %v3650_v43 = vpop.permute.xlu1 %3649 }
 0x826   : > { %v4670_v17 = vpack.c.bf16 %v3414_v8, %v3412_v16  ;;  %v3648_v18 = vpop.permute.xlu0 %3647  ;;  %v4668_v48 = vpack.c.bf16 %v3415_v24, %v3413_v6 }
 0x827   : > { %3888 = vrot.lane.b32.xlu1 %v7176_v56, %s5038_s25 }
 0x828   : > { %3886 = vrot.lane.b32.xlu0 %v7182_v36, %s5038_s25  ;;  %4669 = vmatprep.subr.bf16.mxu1 %v4668_v48 }
 0x829   : > { %4671 = vmatpush1.bf16.msra.mxu1 %v4670_v17  ;;  %v3666_v11 = vpop.permute.xlu1 %3665 }
 0x82a   : > { %v3681_v61 = vsel %vm3679_vm12, %v3650_v43, %v3666_v11  ;;  %v3689_v27 = vsel %vm3679_vm12, %v3666_v11, %v3650_v43  ;;  %v3664_v25 = vpop.permute.xlu0 %3663  ;;  %v8789_v11 = vld [vmem:[#allocation14_spill] sm:$0xff] }
 0x82b   : > { %v3706_v49 = vmul.f32 %v7375_v14, %v3681_v61  ;;  %v3707_v60 = vmul.f32 %v7379_v33, %v3689_v27  ;;  %v3680_v54 = vsel %vm3679_vm12, %v3648_v18, %v3664_v25  ;;  %v3688_v56 = vsel %vm3679_vm12, %v3664_v25, %v3648_v18  ;;  %3363 = vrot.lane.b32.xlu1 %v7199_v37, %s5031_s3 }
 0x82c   : > { %v3704_v13 = vmul.f32 %v7375_v14, %v3680_v54  ;;  %v3705_v9 = vmul.f32 %v7379_v33, %v3688_v56  ;;  %3361 = vrot.lane.b32.xlu0 %v7193_v42, %s5031_s3  ;;  %v7486_v61 = vrot.slane %v7334_v10, %v8789_v11  ;;  %v7490_v27 = vrot.slane %v7339_v0, %v8789_v11 }
 0x82d   : > { %v3431_v26 = vpop.permute.xlu1 %3430 }
 0x82e   : > { %v4750_v36 = vpack.c.bf16 %v3706_v49, %v3704_v13  ;;  %v3429_v29 = vpop.permute.xlu0 %3428  ;;  %v4748_v35 = vpack.c.bf16 %v3707_v60, %v3705_v9  ;;  %8790 = vst [vmem:[#allocation18_spill] sm:$0xff] %v7486_v61  ;;  %8791 = vst [vmem:[#allocation47_spill] sm:$0xff] %v7490_v27 }
 0x82f   : > { %3379 = vrot.lane.b32.xlu1 %v7202_v53, %s5031_s3 }
 0x830   : > { %3377 = vrot.lane.b32.xlu0 %v7196_v30, %s5031_s3  ;;  %4749 = vmatprep.subr.bf16.mxu0 %v4748_v35 }
 0x831   : > { %4751 = vmatpush1.bf16.msra.mxu0 %v4750_v36  ;;  %v3447_v45 = vpop.permute.xlu1 %3446 }
 0x832   : > { %v3462_v22 = vsel %vm3460_vm13, %v3431_v26, %v3447_v45  ;;  %v3470_v52 = vsel %vm3460_vm13, %v3447_v45, %v3431_v26  ;;  %v3445_v1 = vpop.permute.xlu0 %3444 }
 0x833   : > { %v7417_v46 = vmul.f32 %v7404_v5, %v3470_v52  ;;  %v7420_v57 = vmul.f32 %v7408_v44, %v3462_v22  ;;  %v3461_v59 = vsel %vm3460_vm13, %v3429_v29, %v3445_v1  ;;  %v3469_v28 = vsel %vm3460_vm13, %v3445_v1, %v3429_v29  ;;  %3657 = vrot.lane.b32.xlu1 %v7199_v37, %s5032_s27  ;;  %v8792_v52 = vld [vmem:[#allocation24_spill] sm:$0xff] }
 0x834   : > { %v7429_v20 = vmul.f32 %v7404_v5, %v3469_v28  ;;  %v7432_v40 = vmul.f32 %v7408_v44, %v3461_v59  ;;  %3655 = vrot.lane.b32.xlu0 %v7193_v42, %s5032_s27  ;;  %v7527_v1 = vrot.slane %v7334_v10, %v8792_v52  ;;  %v7531_v59 = vrot.slane %v7339_v0, %v8792_v52 }
 0x835   : > { %v3723_v38 = vpop.permute.xlu1 %3722 }
 0x836   : > { %v3721_v12 = vpop.permute.xlu0 %3720  ;;  %8793 = vst [vmem:[#allocation32_spill] sm:$0xff] %v7531_v59 }
 0x837   : > { %3673 = vrot.lane.b32.xlu1 %v7202_v53, %s5032_s27 }
 0x838   : > { %3671 = vrot.lane.b32.xlu0 %v7196_v30, %s5032_s27 }
 0x839   : > { %v3739_v23 = vpop.permute.xlu1 %3738 }
 0x83a   : > { %v3754_v31 = vsel %vm3752_vm14, %v3723_v38, %v3739_v23  ;;  %v3762_v19 = vsel %vm3752_vm14, %v3739_v23, %v3723_v38  ;;  %v3737_v8 = vpop.permute.xlu0 %3736 }
 0x83b   : > { %v7458_v24 = vmul.f32 %v7445_v50, %v3754_v31  ;;  %v7461_v41 = vmul.f32 %v7449_v58, %v3762_v19  ;;  %v3753_v21 = vsel %vm3752_vm14, %v3721_v12, %v3737_v8  ;;  %v3761_v16 = vsel %vm3752_vm14, %v3737_v8, %v3721_v12  ;;  %3438 = vrot.lane.b32.xlu1 %v7199_v37, %s8596_s5 }
 0x83c   : > { %v7470_v6 = vmul.f32 %v7445_v50, %v3753_v21  ;;  %v7473_v43 = vmul.f32 %v7449_v58, %v3761_v16  ;;  %3436 = vrot.lane.b32.xlu0 %v7193_v42, %s8596_s5 }
 0x83d   : > { %v3504_v17 = vpop.permute.xlu1 %3503 }
 0x83e   : > { %v3502_v48 = vpop.permute.xlu0 %3501 }
 0x83f   : > { %3454 = vrot.lane.b32.xlu1 %v7202_v53, %s8596_s5 }
 0x840   : > { %3452 = vrot.lane.b32.xlu0 %v7196_v30, %s8596_s5 }
 0x841   : > { %v3520_v25 = vpop.permute.xlu1 %3519 }
 0x842   : > { %v3535_v49 = vsel %vm3533_vm15, %v3504_v17, %v3520_v25  ;;  %v3543_v60 = vsel %vm3533_vm15, %v3520_v25, %v3504_v17  ;;  %v3518_v54 = vpop.permute.xlu0 %3517 }
 0x843   : > { %v7499_v56 = vmul.f32 %v7486_v61, %v3543_v60  ;;  %v7502_v13 = vmul.f32 %v7490_v27, %v3535_v49  ;;  %v3534_v9 = vsel %vm3533_vm15, %v3502_v48, %v3518_v54  ;;  %v3542_v26 = vsel %vm3533_vm15, %v3518_v54, %v3502_v48  ;;  %3730 = vrot.lane.b32.xlu1 %v7199_v37, %s5034_s2  ;;  %v8797_v49 = vld [vmem:[#allocation16_spill] sm:$0xff] }
 0x844   : > { %v7511_v36 = vmul.f32 %v7486_v61, %v3542_v26  ;;  %v7514_v29 = vmul.f32 %v7490_v27, %v3534_v9  ;;  %3728 = vrot.lane.b32.xlu0 %v7193_v42, %s5034_s2  ;;  %v7568_v60 = vrot.slane %v7334_v10, %v8797_v49  ;;  %v7572_v54 = vrot.slane %v7339_v0, %v8797_v49 }
 0x845   : > { %v3796_v35 = vpop.permute.xlu1 %3795 }
 0x846   : > { %v3794_v45 = vpop.permute.xlu0 %3793  ;;  %8798 = vst [vmem:[#allocation26_spill] sm:$0xff] %v7568_v60  ;;  %8799 = vst [vmem:[#allocation36_spill] sm:$0xff] %v7572_v54 }
 0x847   : > { %3746 = vrot.lane.b32.xlu1 %v7202_v53, %s5034_s2 }
 0x848   : > { %3744 = vrot.lane.b32.xlu0 %v7196_v30, %s5034_s2 }
 0x849   : > { %v3812_v28 = vpop.permute.xlu1 %3811 }
 0x84a   : > { %v3827_v38 = vsel %vm3825_vm2, %v3796_v35, %v3812_v28  ;;  %v3835_v12 = vsel %vm3825_vm2, %v3812_v28, %v3796_v35  ;;  %v3810_v55 = vpop.permute.xlu0 %3809 }
 0x84b   : > { %v7540_v23 = vmul.f32 %v7527_v1, %v3827_v38  ;;  %v7543_v31 = vmul.f32 %v7531_v59, %v3835_v12  ;;  %v3826_v19 = vsel %vm3825_vm2, %v3794_v45, %v3810_v55  ;;  %v3834_v8 = vsel %vm3825_vm2, %v3810_v55, %v3794_v45  ;;  %3511 = vrot.lane.b32.xlu1 %v7199_v37, %s8795_s24 }
 0x84c   : > { %v7552_v21 = vmul.f32 %v7527_v1, %v3826_v19  ;;  %v7555_v16 = vmul.f32 %v7531_v59, %v3834_v8  ;;  %3509 = vrot.lane.b32.xlu0 %v7193_v42, %s8795_s24 }
 0x84d   : > { %8794 = vst [vmem:[#allocation35_spill] sm:$0xff] %v7540_v23  ;;  %v3577_v17 = vpop.permute.xlu1 %3576 }
 0x84e   : > { %8796 = vst [vmem:[#allocation37_spill] sm:$0xff] %v7552_v21  ;;  %v3575_v11 = vpop.permute.xlu0 %3574 }
 0x84f   : > { %3527 = vrot.lane.b32.xlu1 %v7202_v53, %s8795_s24 }
 0x850   : > { %3525 = vrot.lane.b32.xlu0 %v7196_v30, %s8795_s24 }
 0x851   : > { %v3593_v9 = vpop.permute.xlu1 %3592 }
 0x852   : > { %v3608_v26 = vsel %vm3606_vm0, %v3577_v17, %v3593_v9  ;;  %v3616_v35 = vsel %vm3606_vm0, %v3593_v9, %v3577_v17  ;;  %v3591_v45 = vpop.permute.xlu0 %3590 }
 0x853   : > { %v7581_v52 = vmul.f32 %v7568_v60, %v3616_v35  ;;  %v7584_v10 = vmul.f32 %v7572_v54, %v3608_v26  ;;  %v3607_v0 = vsel %vm3606_vm0, %v3575_v11, %v3591_v45  ;;  %v3615_v28 = vsel %vm3606_vm0, %v3591_v45, %v3575_v11  ;;  %3803 = vrot.lane.b32.xlu1 %v7199_v37, %s5036_s26 }
 0x854   : > { %v7593_v38 = vmul.f32 %v7568_v60, %v3615_v28  ;;  %v7596_v12 = vmul.f32 %v7572_v54, %v3607_v0  ;;  %3801 = vrot.lane.b32.xlu0 %v7193_v42, %s5036_s26 }
 0x855   : > { %8800 = vst [vmem:[#allocation54_spill] sm:$0xff] %v7581_v52  ;;  %8801 = vst [vmem:[#allocation28_spill] sm:$0xff] %v7584_v10  ;;  %v7600_v55 = vpop.permute.xlu1 %3868 }
 0x856   : > { %8802 = vst [vmem:[#allocation53_spill] sm:$0xff] %v7593_v38  ;;  %8803 = vst [vmem:[#allocation56_spill] sm:$0xff] %v7596_v12  ;;  %v7604_v8 = vpop.permute.xlu0 %3866 }
 0x857   : > { %8804 = vst [vmem:[#allocation27_spill] sm:$0xff] %v7600_v55  ;;  %8805 = vst [vmem:[#allocation55_spill] sm:$0xff] %v7604_v8  ;;  %3819 = vrot.lane.b32.xlu1 %v7202_v53, %s5036_s26 }
 0x858   : > { %3817 = vrot.lane.b32.xlu0 %v7196_v30, %s5036_s26 }
 0x859   : > { %v7612_v11 = vpop.permute.xlu1 %3884 }
 0x85a   : > { %8806 = vst [vmem:[#allocation57_spill] sm:$0xff] %v7612_v11  ;;  %v7614_v49 = vpop.permute.xlu0 %3882 }
 0x85b   : > { %8807 = vst [vmem:[#allocation59_spill] sm:$0xff] %v7614_v49  ;;  %3584 = vrot.lane.b32.xlu1 %v7199_v37, %s5037_s4 }
 0x85c   : > { %3582 = vrot.lane.b32.xlu0 %v7193_v42, %s5037_s4 }
 0x85d   : > { %v3360_v9 = vpop.permute.xlu1 %3359 }
 0x85e   : > { %v3358_v26 = vpop.permute.xlu0 %3357 }
 0x85f   : > { %3600 = vrot.lane.b32.xlu1 %v7202_v53, %s5037_s4 }
 0x860   : > { %3598 = vrot.lane.b32.xlu0 %v7196_v30, %s5037_s4 }
 0x861   : > { %v3376_v35 = vpop.permute.xlu1 %3375 }
 0x862   : > { %v3391_v45 = vsel %vm3387_vm10, %v3360_v9, %v3376_v35  ;;  %v3399_v0 = vsel %vm3387_vm10, %v3376_v35, %v3360_v9  ;;  %v3374_v28 = vpop.permute.xlu0 %3373 }
 0x863   : > { %v3418_v19 = vmul.f32 %v7346_v47, %v3399_v0  ;;  %v3419_v17 = vmul.f32 %v7350_v34, %v3391_v45  ;;  %v3390_v48 = vsel %vm3387_vm10, %v3358_v26, %v3374_v28  ;;  %v3398_v25 = vsel %vm3387_vm10, %v3374_v28, %v3358_v26  ;;  %3876 = vrot.lane.b32.xlu1 %v7199_v37, %s5038_s25 }
 0x864   : > { %v3416_v2 = vmul.f32 %v7346_v47, %v3398_v25  ;;  %v3417_v22 = vmul.f32 %v7350_v34, %v3390_v48  ;;  %3874 = vrot.lane.b32.xlu0 %v7193_v42, %s5038_s25 }
 0x865   : > { %v3654_v9 = vpop.permute.xlu1 %3653 }
 0x866   : > { %v4674_v35 = vpack.c.bf16 %v3418_v19, %v3416_v2  ;;  %v3652_v0 = vpop.permute.xlu0 %3651  ;;  %v4672_v45 = vpack.c.bf16 %v3419_v17, %v3417_v22 }
 0x867   : > { %3892 = vrot.lane.b32.xlu1 %v7202_v53, %s5038_s25 }
 0x868   : > { %3890 = vrot.lane.b32.xlu0 %v7196_v30, %s5038_s25  ;;  %4673 = vmatprep.subr.bf16.mxu1 %v4672_v45 }
 0x869   : > { %4675 = vmatpush1.bf16.msra.mxu1 %v4674_v35  ;;  %v3670_v37 = vpop.permute.xlu1 %3669 }
 0x86a   : > { %v3683_v25 = vsel %vm3679_vm12, %v3654_v9, %v3670_v37  ;;  %v3691_v48 = vsel %vm3679_vm12, %v3670_v37, %v3654_v9  ;;  %v3668_v42 = vpop.permute.xlu0 %3667 }
 0x86b   : > { %v3710_v2 = vmul.f32 %v7375_v14, %v3683_v25  ;;  %v3711_v22 = vmul.f32 %v7379_v33, %v3691_v48  ;;  %v3682_v53 = vsel %vm3679_vm12, %v3652_v0, %v3668_v42  ;;  %v3690_v30 = vsel %vm3679_vm12, %v3668_v42, %v3652_v0  ;;  %3367 = vrot.lane.b32.xlu1 %v7219_v39, %s5031_s3 }
 0x86c   : > { %v3708_v19 = vmul.f32 %v7375_v14, %v3682_v53  ;;  %v3709_v17 = vmul.f32 %v7379_v33, %v3690_v30  ;;  %3365 = vrot.lane.b32.xlu0 %v7213_v51, %s5031_s3 }
 0x86d   : > { %v3435_v26 = vpop.permute.xlu1 %3434 }
 0x86e   : > { %v4754_v28 = vpack.c.bf16 %v3710_v2, %v3708_v19  ;;  %v3433_v9 = vpop.permute.xlu0 %3432  ;;  %v4752_v35 = vpack.c.bf16 %v3711_v22, %v3709_v17 }
 0x86f   : > { %3383 = vrot.lane.b32.xlu1 %v7222_v4, %s5031_s3 }
 0x870   : > { %3381 = vrot.lane.b32.xlu0 %v7216_v7, %s5031_s3  ;;  %4753 = vmatprep.subr.bf16.mxu0 %v4752_v35 }
 0x871   : > { %4755 = vmatpush1.bf16.msra.mxu0 %v4754_v28  ;;  %v3451_v0 = vpop.permute.xlu1 %3450 }
 0x872   : > { %v3464_v45 = vsel %vm3460_vm13, %v3435_v26, %v3451_v0  ;;  %v3472_v37 = vsel %vm3460_vm13, %v3451_v0, %v3435_v26  ;;  %v3449_v25 = vpop.permute.xlu0 %3448 }
 0x873   : > { %v7669_v48 = vmul.f32 %v7404_v5, %v3472_v37  ;;  %v7672_v42 = vmul.f32 %v7408_v44, %v3464_v45  ;;  %v3463_v2 = vsel %vm3460_vm13, %v3433_v9, %v3449_v25  ;;  %v3471_v22 = vsel %vm3460_vm13, %v3449_v25, %v3433_v9  ;;  %3661 = vrot.lane.b32.xlu1 %v7219_v39, %s5032_s27 }
 0x874   : > { %v7681_v53 = vmul.f32 %v7404_v5, %v3471_v22  ;;  %v7684_v30 = vmul.f32 %v7408_v44, %v3463_v2  ;;  %3659 = vrot.lane.b32.xlu0 %v7213_v51, %s5032_s27 }
 0x875   : > { %v3727_v19 = vpop.permute.xlu1 %3726 }
 0x876   : > { %v3725_v26 = vpop.permute.xlu0 %3724 }
 0x877   : > { %3677 = vrot.lane.b32.xlu1 %v7222_v4, %s5032_s27 }
 0x878   : > { %3675 = vrot.lane.b32.xlu0 %v7216_v7, %s5032_s27 }
 0x879   : > { %v3743_v9 = vpop.permute.xlu1 %3742 }
 0x87a   : > { %v3756_v35 = vsel %vm3752_vm14, %v3727_v19, %v3743_v9  ;;  %v3764_v0 = vsel %vm3752_vm14, %v3743_v9, %v3727_v19  ;;  %v3741_v45 = vpop.permute.xlu0 %3740 }
 0x87b   : > { %v7701_v37 = vmul.f32 %v7445_v50, %v3756_v35  ;;  %v7704_v25 = vmul.f32 %v7449_v58, %v3764_v0  ;;  %v3755_v2 = vsel %vm3752_vm14, %v3725_v26, %v3741_v45  ;;  %v3763_v22 = vsel %vm3752_vm14, %v3741_v45, %v3725_v26  ;;  %3442 = vrot.lane.b32.xlu1 %v7219_v39, %s8596_s5 }
 0x87c   : > { %v7713_v18 = vmul.f32 %v7445_v50, %v3755_v2  ;;  %v7716_v19 = vmul.f32 %v7449_v58, %v3763_v22  ;;  %3440 = vrot.lane.b32.xlu0 %v7213_v51, %s8596_s5 }
 0x87d   : > { %v3508_v9 = vpop.permute.xlu1 %3507 }
 0x87e   : > { %v3506_v0 = vpop.permute.xlu0 %3505 }
 0x87f   : > { %3458 = vrot.lane.b32.xlu1 %v7222_v4, %s8596_s5 }
 0x880   : > { %3456 = vrot.lane.b32.xlu0 %v7216_v7, %s8596_s5 }
 0x881   : > { %v3524_v45 = vpop.permute.xlu1 %3523 }
 0x882   : > { %v3537_v2 = vsel %vm3533_vm15, %v3508_v9, %v3524_v45  ;;  %v3545_v22 = vsel %vm3533_vm15, %v3524_v45, %v3508_v9  ;;  %v3522_v63 = vpop.permute.xlu0 %3521 }
 0x883   : > { %v7733_v35 = vmul.f32 %v7486_v61, %v3545_v22  ;;  %v7736_v17 = vmul.f32 %v7490_v27, %v3537_v2  ;;  %v3536_v26 = vsel %vm3533_vm15, %v3506_v0, %v3522_v63  ;;  %v3544_v28 = vsel %vm3533_vm15, %v3522_v63, %v3506_v0  ;;  %3734 = vrot.lane.b32.xlu1 %v7219_v39, %s5034_s2 }
 0x884   : > { %v7745_v3 = vmul.f32 %v7486_v61, %v3544_v28  ;;  %v7748_v9 = vmul.f32 %v7490_v27, %v3536_v26  ;;  %3732 = vrot.lane.b32.xlu0 %v7213_v51, %s5034_s2 }
 0x885   : > { %v3800_v45 = vpop.permute.xlu1 %3799 }
 0x886   : > { %v3798_v22 = vpop.permute.xlu0 %3797 }
 0x887   : > { %3750 = vrot.lane.b32.xlu1 %v7222_v4, %s5034_s2 }
 0x888   : > { %3748 = vrot.lane.b32.xlu0 %v7216_v7, %s5034_s2 }
 0x889   : > { %v3816_v28 = vpop.permute.xlu1 %3815 }
 0x88a   : > { %v3829_v0 = vsel %vm3825_vm2, %v3800_v45, %v3816_v28  ;;  %v3837_v26 = vsel %vm3825_vm2, %v3816_v28, %v3800_v45  ;;  %v3814_v62 = vpop.permute.xlu0 %3813 }
 0x88b   : > { %v7765_v2 = vmul.f32 %v7527_v1, %v3829_v0  ;;  %v7768_v15 = vmul.f32 %v7531_v59, %v3837_v26  ;;  %v3828_v63 = vsel %vm3825_vm2, %v3798_v22, %v3814_v62  ;;  %v3836_v38 = vsel %vm3825_vm2, %v3814_v62, %v3798_v22  ;;  %3515 = vrot.lane.b32.xlu1 %v7219_v39, %s8795_s24 }
 0x88c   : > { %v7777_v52 = vmul.f32 %v7527_v1, %v3828_v63  ;;  %v7780_v45 = vmul.f32 %v7531_v59, %v3836_v38  ;;  %3513 = vrot.lane.b32.xlu0 %v7213_v51, %s8795_s24 }
 0x88d   : > { %8808 = vst [vmem:[#allocation46_spill] sm:$0xff] %v7765_v2  ;;  %8809 = vst [vmem:[#allocation58_spill] sm:$0xff] %v7768_v15  ;;  %v3581_v28 = vpop.permute.xlu1 %3580 }
 0x88e   : > { %8810 = vst [vmem:[#allocation61_spill] sm:$0xff] %v7777_v52  ;;  %8811 = vst [vmem:[#allocation29_spill] sm:$0xff] %v7780_v45  ;;  %v3579_v26 = vpop.permute.xlu0 %3578 }
 0x88f   : > { %3531 = vrot.lane.b32.xlu1 %v7222_v4, %s8795_s24 }
 0x890   : > { %3529 = vrot.lane.b32.xlu0 %v7216_v7, %s8795_s24 }
 0x891   : > { %v3597_v22 = vpop.permute.xlu1 %3596 }
 0x892   : > { %v3610_v38 = vsel %vm3606_vm0, %v3581_v28, %v3597_v22  ;;  %v3618_v63 = vsel %vm3606_vm0, %v3597_v22, %v3581_v28  ;;  %v3595_v12 = vpop.permute.xlu0 %3594 }
 0x893   : > { %v7797_v0 = vmul.f32 %v7568_v60, %v3618_v63  ;;  %v7800_v10 = vmul.f32 %v7572_v54, %v3610_v38  ;;  %v3609_v62 = vsel %vm3606_vm0, %v3579_v26, %v3595_v12  ;;  %v3617_v52 = vsel %vm3606_vm0, %v3595_v12, %v3579_v26  ;;  %3807 = vrot.lane.b32.xlu1 %v7219_v39, %s5036_s26  ;;  %v3942_v26 = vld [vmem:[%s8419_s20 + $0x18] sm:$0xff] }
 0x894   : > { %v7809_v2 = vmul.f32 %v7568_v60, %v3617_v52  ;;  %v7812_v28 = vmul.f32 %v7572_v54, %v3609_v62  ;;  %3805 = vrot.lane.b32.xlu0 %v7213_v51, %s5036_s26  ;;  %4148 = vmatprep.mubr.f32.mxu0 %v3942_v26  ;;  %v7831_v62 = vld [vmem:[%s8421_s22 + $0x10] ss:$0 sm:$0xff]  ;;  %v7836_v38 = vld [vmem:[%s8421_s22 + $0x18] ss:$0 sm:$0xff] }
 0x895   : > { %8812 = vst [vmem:[#allocation63_spill] sm:$0xff] %v7797_v0  ;;  %8813 = vst [vmem:[#allocation68_spill] sm:$0xff] %v7800_v10  ;;  %v3873_v22 = vpop.permute.xlu1 %3872 }
 0x896   : > { %8814 = vst [vmem:[#allocation64_spill] sm:$0xff] %v7809_v2  ;;  %8815 = vst [vmem:[#allocation25_spill] sm:$0xff] %v7812_v28  ;;  %v3871_v63 = vpop.permute.xlu0 %3870 }
 0x897   : > { %3823 = vrot.lane.b32.xlu1 %v7222_v4, %s5036_s26  ;;  %8816 = vst [vmem:[#allocation33_spill] sm:$0xff] %v7831_v62  ;;  %8817 = vst [vmem:[#allocation60_spill] sm:$0xff] %v7836_v38 }
 0x898   : > { %3821 = vrot.lane.b32.xlu0 %v7216_v7, %s5036_s26  ;;  %s8905_s26 = sld [smem:[#allocation9_spill]] }
 0x899   : > { %v3889_v52 = vpop.permute.xlu1 %3888 }
 0x89a   : > { %v3902_v12 = vsel %vm3898_vm3, %v3873_v22, %v3889_v52  ;;  %v3910_v26 = vsel %vm3898_vm3, %v3889_v52, %v3873_v22  ;;  %v3887_v2 = vpop.permute.xlu0 %3886 }
 0x89b   : > { %v3929_v0 = vmul.f32 %v7831_v62, %v3902_v12  ;;  %v3930_v28 = vmul.f32 %v7836_v38, %v3910_v26  ;;  %v3901_v10 = vsel %vm3898_vm3, %v3871_v63, %v3887_v2  ;;  %v3909_v49 = vsel %vm3898_vm3, %v3887_v2, %v3871_v63  ;;  %3588 = vrot.lane.b32.xlu1 %v7219_v39, %s5037_s4  ;;  %v3940_v2 = vld [vmem:[%s8419_s20 + $0x8] sm:$0xff] }
 0x89c   : > { %v3927_v8 = vmul.f32 %v7831_v62, %v3901_v10  ;;  %v3928_v55 = vmul.f32 %v7836_v38, %v3909_v49  ;;  %3586 = vrot.lane.b32.xlu0 %v7213_v51, %s5037_s4  ;;  %4059 = vmatprep.mubr.f32.mxu1 %v3940_v2 }
 0x89d   : > { %v3364_v22 = vpop.permute.xlu1 %3363 }
 0x89e   : > { %v7854_v12 = vpack.c.bf16 %v3929_v0, %v3927_v8  ;;  %v3362_v52 = vpop.permute.xlu0 %3361  ;;  %v7856_v26 = vpack.c.bf16 %v3930_v28, %v3928_v55  ;;  %s4464_s24 = sshll.u32 %s8905_s26, 10 }
 0x89f   : > { %3604 = vrot.lane.b32.xlu1 %v7222_v4, %s5037_s4 }
 0x8a0   : > { %8818 = vst [vmem:[#allocation34_spill] sm:$0xff] %v7854_v12  ;;  %8819 = vst [vmem:[#allocation65_spill] sm:$0xff] %v7856_v26  ;;  %3602 = vrot.lane.b32.xlu0 %v7216_v7, %s5037_s4  ;;  %s8904_s4 = sld [smem:[#allocation6_spill]] }
 0x8a1   : > { %v3380_v10 = vpop.permute.xlu1 %3379 }
 0x8a2   : > { %v3393_v49 = vsel %vm3387_vm10, %v3364_v22, %v3380_v10  ;;  %v3401_v8 = vsel %vm3387_vm10, %v3380_v10, %v3364_v22  ;;  %v3378_v55 = vpop.permute.xlu0 %3377 }
 0x8a3   : > { %v3422_v0 = vmul.f32 %v7346_v47, %v3401_v8  ;;  %v3423_v28 = vmul.f32 %v7350_v34, %v3393_v49  ;;  %v3392_v63 = vsel %vm3387_vm10, %v3362_v52, %v3378_v55  ;;  %v3400_v2 = vsel %vm3387_vm10, %v3378_v55, %v3362_v52  ;;  %3880 = vrot.lane.b32.xlu1 %v7219_v39, %s5038_s25  ;;  %v3959_v39 = vld [vmem:[%s8420_s21] sm:$0xff] }
 0x8a4   : > { %v3420_v12 = vmul.f32 %v7346_v47, %v3400_v2  ;;  %v3421_v26 = vmul.f32 %v7350_v34, %v3392_v63  ;;  %3878 = vrot.lane.b32.xlu0 %v7213_v51, %s5038_s25  ;;  %v3962_v51 = vld [vmem:[%s8420_s21 + $0x18] sm:$0xff] }
 0x8a5   : > { %v3658_v22 = vpop.permute.xlu1 %3657 }
 0x8a6   : > { %v4678_v10 = vpack.c.bf16 %v3422_v0, %v3420_v12  ;;  %v3656_v8 = vpop.permute.xlu0 %3655  ;;  %v4676_v49 = vpack.c.bf16 %v3423_v28, %v3421_v26  ;;  %s727_s30 = sand.u32 1, %s8904_s4  }
 0x8a7   : > { %3896 = vrot.lane.b32.xlu1 %v7222_v4, %s5038_s25  ;;  %s4382_s28 = sshll.u32 %s727_s30, 6  ;;  %s8357_s26 = scalar_lea.sflag [#allocation3], %s727_s30 }
 0x8a8   : > { %3894 = vrot.lane.b32.xlu0 %v7216_v7, %s5038_s25  ;;  %4677 = vmatprep.subr.bf16.mxu1 %v4676_v49  ;;  %v3960_v49 = vld [vmem:[%s8420_s21 + $0x8] sm:$0xff]  ;;  %s8336_s23 = scalar_lea.vmem [#allocation2], %s4382_s28  ;;  %s8907_s28 = sld [smem:[#allocation77_spill]] }
 0x8a9   : > { %4679 = vmatpush1.bf16.msra.mxu1 %v4678_v10  ;;  %v3674_v52 = vpop.permute.xlu1 %3673  ;;  %s4292_s3 = sshll.u32 %s8336_s23, 4  ;;  %s8350_s3 = int_to_ptr.vmem [resolvable:$true] %s4292_s3 }
 0x8aa   : > { %v3685_v12 = vsel %vm3679_vm12, %v3658_v22, %v3674_v52  ;;  %v3693_v4 = vsel %vm3679_vm12, %v3674_v52, %v3658_v22  ;;  %v3672_v26 = vpop.permute.xlu0 %3671  ;;  %v3961_v22 = vld [vmem:[%s8420_s21 + $0x10] sm:$0xff]  ;;  %s4963_s0 = scalar_lea.vmem %s8350_s3, 1024 }
 0x8ab   : > { %v3714_v7 = vmul.f32 %v7375_v14, %v3685_v12  ;;  %v3715_v55 = vmul.f32 %v7379_v33, %v3693_v4  ;;  %v3684_v0 = vsel %vm3679_vm12, %v3656_v8, %v3672_v26  ;;  %v3692_v28 = vsel %vm3679_vm12, %v3672_v26, %v3656_v8  ;;  %3965 = vperm.xlu1 %4929, %v3959_v39   ;;  %p4964_p11 = scmp.ne.s32.totalorder %s8350_s3, %s4963_s0 }
 0x8ac   : > { %v3712_v63 = vmul.f32 %v7375_v14, %v3684_v0  ;;  %v3713_v2 = vmul.f32 %v7379_v33, %v3692_v28  ;;  %3980 = vperm.xlu0 %4928, %v3962_v51  }
 0x8ad   : > { %v3439_v10 = vpop.permute.xlu1 %3438  ;;  %p4965_p12 = pnand %p4964_p11, %p5199_p5 }
 0x8ae   : > { %v4758_v52 = vpack.c.bf16 %v3714_v7, %v3712_v63  ;;  %v3437_v12 = vpop.permute.xlu0 %3436  ;;  %v4756_v4 = vpack.c.bf16 %v3715_v55, %v3713_v2  ;;  %s8347_s5 = scalar_lea.hbm %s8907_s28, %s4464_s24  ;;  %s5039_s24 = smov [#allocation2]  }
 0x8af   : > { %3975 = vperm.xlu1 %4929, %v3961_v22   ;;  %p4966_p13 = pneg %p4965_p12  ;;  %s4967_s2 = sshll.u32 %s5039_s24, 4  ;;  %s4968_s2 = int_to_ptr.vmem [resolvable:$false] %s4967_s2 }
 0x8b0   : > { %3970 = vperm.xlu0 %4928, %v3960_v49   ;;  %4757 = vmatprep.subr.bf16.mxu0 %v4756_v4  ;;  %s4969_s25 = scalar_lea.vmem %s4968_s2, 2048  ;;  %p4970_p0 = scmp.lt.s32.totalorder %s8350_s3, %s4968_s2 }
 0x8b1   : > { %4759 = vmatpush1.bf16.msra.mxu0 %v4758_v52  ;;  %v3455_v8 = vpop.permute.xlu1 %3454  ;;  %p4971_p1 = scmp.lt.s32.totalorder %s4969_s25, %s4963_s0 }
 0x8b2   : > { %v3466_v39 = vsel %vm3460_vm13, %v3439_v10, %v3455_v8  ;;  %v3474_v51 = vsel %vm3460_vm13, %v3455_v8, %v3439_v10  ;;  %v3453_v26 = vpop.permute.xlu0 %3452 }
 0x8b3   : > { %v7914_v0 = vmul.f32 %v7404_v5, %v3474_v51  ;;  %v7917_v28 = vmul.f32 %v7408_v44, %v3466_v39  ;;  %v3465_v7 = vsel %vm3460_vm13, %v3437_v12, %v3453_v26  ;;  %v3473_v55 = vsel %vm3460_vm13, %v3453_v26, %v3437_v12  ;;  %p4972_p2 = por %p4971_p1, %p4970_p0 }
 0x8b4   : > { %v7924_v63 = vmul.f32 %v7404_v5, %v3473_v55  ;;  %v7927_v2 = vmul.f32 %v7408_v44, %v3465_v7 }
 0x8b5   : > { %v3731_v22 = vpop.permute.xlu1 %3730  ;;  %p4973_p3 = pnand %p4972_p2, %p4966_p13 }
 0x8b6   : > { %v3729_v49 = vpop.permute.xlu0 %3728 }
 0x8b9   : > { %v3747_v4 = vpop.permute.xlu1 %3746 }
 0x8ba   : > { %v3758_v8 = vsel %vm3752_vm14, %v3731_v22, %v3747_v4  ;;  %v3766_v12 = vsel %vm3752_vm14, %v3747_v4, %v3731_v22  ;;  %v3745_v39 = vpop.permute.xlu0 %3744 }
 0x8bb   : > { %v7938_v51 = vmul.f32 %v7445_v50, %v3758_v8  ;;  %v7941_v26 = vmul.f32 %v7449_v58, %v3766_v12  ;;  %v3757_v7 = vsel %vm3752_vm14, %v3729_v49, %v3745_v39  ;;  %v3765_v55 = vsel %vm3752_vm14, %v3745_v39, %v3729_v49 }
 0x8bc   : > { %v7948_v10 = vmul.f32 %v7445_v50, %v3757_v7  ;;  %v7951_v52 = vmul.f32 %v7449_v58, %v3765_v55 }
 0x8bd   : > { %v3512_v22 = vpop.permute.xlu1 %3511 }
 0x8be   : > { %v3510_v8 = vpop.permute.xlu0 %3509 }
 0x8c1   : > { %v3528_v38 = vpop.permute.xlu1 %3527 }
 0x8c2   : > { %v3539_v11 = vsel %vm3533_vm15, %v3512_v22, %v3528_v38  ;;  %v3547_v49 = vsel %vm3533_vm15, %v3528_v38, %v3512_v22  ;;  %v3526_v39 = vpop.permute.xlu0 %3525 }
 0x8c3   : > { %v7962_v7 = vmul.f32 %v7486_v61, %v3547_v49  ;;  %v7965_v55 = vmul.f32 %v7490_v27, %v3539_v11  ;;  %v3538_v4 = vsel %vm3533_vm15, %v3510_v8, %v3526_v39  ;;  %v3546_v12 = vsel %vm3533_vm15, %v3526_v39, %v3510_v8 }
 0x8c4   : > { %v7972_v45 = vmul.f32 %v7486_v61, %v3546_v12  ;;  %v7975_v15 = vmul.f32 %v7490_v27, %v3538_v4 }
 0x8c5   : > { %8820 = vst [vmem:[#allocation30_spill] sm:$0xff] %v7962_v7  ;;  %v3804_v38 = vpop.permute.xlu1 %3803 }
 0x8c6   : > { %8821 = vst [vmem:[#allocation48_spill] sm:$0xff] %v7972_v45  ;;  %v3802_v49 = vpop.permute.xlu0 %3801 }
 0x8c9   : > { %v3820_v21 = vpop.permute.xlu1 %3819 }
 0x8ca   : > { %v3831_v23 = vsel %vm3825_vm2, %v3804_v38, %v3820_v21  ;;  %v3839_v8 = vsel %vm3825_vm2, %v3820_v21, %v3804_v38  ;;  %v3818_v12 = vpop.permute.xlu0 %3817 }
 0x8cb   : > { %v7986_v39 = vmul.f32 %v7527_v1, %v3831_v23  ;;  %v7989_v4 = vmul.f32 %v7531_v59, %v3839_v8  ;;  %v3830_v22 = vsel %vm3825_vm2, %v3802_v49, %v3818_v12  ;;  %v3838_v11 = vsel %vm3825_vm2, %v3818_v12, %v3802_v49 }
 0x8cc   : > { %v7996_v45 = vmul.f32 %v7527_v1, %v3830_v22  ;;  %v7999_v7 = vmul.f32 %v7531_v59, %v3838_v11 }
 0x8cd   : > { %8822 = vst [vmem:[#allocation31_spill] sm:$0xff] %v7986_v39  ;;  %v3585_v21 = vpop.permute.xlu1 %3584 }
 0x8ce   : > { %8823 = vst [vmem:[#allocation62_spill] sm:$0xff] %v7996_v45  ;;  %v3583_v38 = vpop.permute.xlu0 %3582 }
 0x8d1   : > { %v3601_v27 = vpop.permute.xlu1 %3600 }
 0x8d2   : > { %v3612_v61 = vsel %vm3606_vm0, %v3585_v21, %v3601_v27  ;;  %v3620_v49 = vsel %vm3606_vm0, %v3601_v27, %v3585_v21  ;;  %v3599_v22 = vpop.permute.xlu0 %3598 }
 0x8d3   : > { %v8010_v12 = vmul.f32 %v7568_v60, %v3620_v49  ;;  %v8013_v11 = vmul.f32 %v7572_v54, %v3612_v61  ;;  %v3611_v23 = vsel %vm3606_vm0, %v3583_v38, %v3599_v22  ;;  %v3619_v8 = vsel %vm3606_vm0, %v3599_v22, %v3583_v38 }
 0x8d4   : > { %v8020_v45 = vmul.f32 %v7568_v60, %v3619_v8  ;;  %v8023_v39 = vmul.f32 %v7572_v54, %v3611_v23 }
 0x8d5   : > { %8824 = vst [vmem:[#allocation66_spill] sm:$0xff] %v8010_v12  ;;  %8825 = vst [vmem:[#allocation67_spill] sm:$0xff] %v8013_v11  ;;  %v8025_v27 = vpop.permute.xlu1 %3876 }
 0x8d6   : > { %8826 = vst [vmem:[#allocation21_spill] sm:$0xff] %v8020_v45  ;;  %8827 = vst [vmem:[#allocation22_spill] sm:$0xff] %v8023_v39  ;;  %v8029_v49 = vpop.permute.xlu0 %3874 }
 0x8d7   : > { %8828 = vst [vmem:[#allocation19_spill] sm:$0xff] %v8025_v27  ;;  %8829 = vst [vmem:[#allocation40_spill] sm:$0xff] %v8029_v49 }
 0x8d9   : > { %v8033_v59 = vpop.permute.xlu1 %3892 }
 0x8da   : > { %8830 = vst [vmem:[#allocation41_spill] sm:$0xff] %v8033_v59  ;;  %v3904_v38 = vsel %vm3898_vm3, %v8025_v27, %v8033_v59  ;;  %v8039_v8 = vpop.permute.xlu0 %3890 }
 0x8db   : > { %8831 = vst [vmem:[#allocation38_spill] sm:$0xff] %v8039_v8  ;;  %v3933_v23 = vmul.f32 %v7831_v62, %v3904_v38  ;;  %v3903_v22 = vsel %vm3898_vm3, %v8029_v49, %v8039_v8 }
 0x8dc   : > { %v3931_v21 = vmul.f32 %v7831_v62, %v3903_v22 }
 0x8dd   : > { %v3368_v45 = vpop.permute.xlu1 %3367 }
 0x8de   : > { %v8047_v61 = vpack.c.bf16 %v3933_v23, %v3931_v21  ;;  %v3366_v12 = vpop.permute.xlu0 %3365 }
 0x8e0   : > { %8832 = vst [vmem:[#allocation39_spill] sm:$0xff] %v8047_v61 }
 0x8e1   : > { %v3384_v54 = vpop.permute.xlu1 %3383 }
 0x8e2   : > { %v3395_v60 = vsel %vm3387_vm10, %v3368_v45, %v3384_v54  ;;  %v3403_v39 = vsel %vm3387_vm10, %v3384_v54, %v3368_v45  ;;  %v3382_v11 = vpop.permute.xlu0 %3381 }
 0x8e3   : > { %v3426_v38 = vmul.f32 %v7346_v47, %v3403_v39  ;;  %v3427_v59 = vmul.f32 %v7350_v34, %v3395_v60  ;;  %v3394_v8 = vsel %vm3387_vm10, %v3366_v12, %v3382_v11  ;;  %v3402_v21 = vsel %vm3387_vm10, %v3382_v11, %v3366_v12 }
 0x8e4   : > { %v3424_v23 = vmul.f32 %v7346_v47, %v3402_v21  ;;  %v3425_v22 = vmul.f32 %v7350_v34, %v3394_v8  ;;  %v8833_v12 = vpack.c.bf16 %v7420_v57, %v7432_v40 }
 0x8e5   : > { %v3662_v61 = vpop.permute.xlu1 %3661 }
 0x8e6   : > { %v4682_v49 = vpack.c.bf16 %v3426_v38, %v3424_v23  ;;  %v3660_v27 = vpop.permute.xlu0 %3659  ;;  %v4680_v62 = vpack.c.bf16 %v3427_v59, %v3425_v22  ;;  %v8835_v38 = vpack.c.bf16 %v7672_v42, %v7684_v30  ;;  %v8837_v23 = vpack.c.bf16 %v7917_v28, %v7927_v2 }
 0x8e7   : > { %v8838_v42 = vpack.c.bf16 %v7461_v41, %v7473_v43  ;;  %v8839_v28 = vpack.c.bf16 %v7914_v0, %v7924_v63  ;;  %v8840_v41 = vpack.c.bf16 %v7458_v24, %v7470_v6  ;;  %v8843_v63 = vpack.c.bf16 %v7502_v13, %v7514_v29 }
 0x8e8   : > { %4681 = vmatprep.subr.bf16.mxu1 %v4680_v62  ;;  %v8845_v13 = vpack.c.bf16 %v7499_v56, %v7511_v36  ;;  %v8846_v29 = vpack.c.bf16 %v7938_v51, %v7948_v10  ;;  %v8849_v51 = vpack.c.bf16 %v7965_v55, %v7975_v15  ;;  %v8853_v15 = vld [vmem:[#allocation30_spill] sm:$0xff]  ;;  %v8854_v55 = vld [vmem:[#allocation48_spill] sm:$0xff] }
 0x8e9   : > { %4683 = vmatpush1.bf16.msra.mxu1 %v4682_v49  ;;  %v3678_v54 = vpop.permute.xlu1 %3677 }
 0x8ea   : > { %v3687_v60 = vsel %vm3679_vm12, %v3662_v61, %v3678_v54  ;;  %v3695_v45 = vsel %vm3679_vm12, %v3678_v54, %v3662_v61  ;;  %v3676_v39 = vpop.permute.xlu0 %3675  ;;  %4685 = vmatprep.subr.bf16.mxu1 %v8833_v12  ;;  %v8834_v61 = vpack.c.bf16 %v7417_v46, %v7429_v20 }
 0x8eb   : > { %v3718_v47 = vmul.f32 %v7375_v14, %v3687_v60  ;;  %v3719_v34 = vmul.f32 %v7379_v33, %v3695_v45  ;;  %v3686_v59 = vsel %vm3679_vm12, %v3660_v27, %v3676_v39  ;;  %v3694_v62 = vsel %vm3679_vm12, %v3676_v39, %v3660_v27 }
 0x8ec   : > { %v3716_v11 = vmul.f32 %v7375_v14, %v3686_v59  ;;  %v3717_v49 = vmul.f32 %v7379_v33, %v3694_v62  ;;  %v8836_v27 = vpack.c.bf16 %v7669_v48, %v7681_v53  ;;  %v8841_v39 = vpack.c.bf16 %v7704_v25, %v7716_v19 }
 0x8ed   : > { %4687 = vmatpush1.bf16.msra.mxu1 %v8834_v61  ;;  %v3443_v57 = vpop.permute.xlu1 %3442  ;;  %v8844_v25 = vpack.c.bf16 %v7941_v26, %v7951_v52 }
 0x8ee   : > { %v4762_v40 = vpack.c.bf16 %v3718_v47, %v3716_v11  ;;  %v3441_v8 = vpop.permute.xlu0 %3440  ;;  %4689 = vmatprep.subr.bf16.mxu1 %v8835_v38  ;;  %v4760_v21 = vpack.c.bf16 %v3719_v34, %v3717_v49  ;;  %v8847_v11 = vpack.c.bf16 %v7736_v17, %v7748_v9  ;;  %v8850_v17 = vpack.c.bf16 %v7543_v31, %v7555_v16  ;;  %v8851_v9 = vld [vmem:[#allocation18_spill] sm:$0xff]  ;;  %v8856_v31 = vld [vmem:[#allocation35_spill] sm:$0xff]  ;;  %v8857_v16 = vld [vmem:[#allocation37_spill] sm:$0xff] }
 0x8f0   : > { %4761 = vmatprep.subr.bf16.mxu0 %v4760_v21  ;;  %v8855_v21 = vpack.c.bf16 %v8853_v15, %v8854_v55  ;;  %v8888_v15 = vld [vmem:[#allocation38_spill] sm:$0xff] }
 0x8f1   : > { %4691 = vmatpush1.bf16.msra.mxu1 %v8836_v27  ;;  %4763 = vmatpush1.bf16.msra.mxu0 %v4762_v40  ;;  %v3459_v14 = vpop.permute.xlu1 %3458  ;;  %v8858_v27 = vpack.c.bf16 %v8856_v31, %v8857_v16  ;;  %v8890_v31 = vld [vmem:[#allocation64_spill] sm:$0xff] }
 0x8f2   : > { %v3468_v33 = vsel %vm3460_vm13, %v3443_v57, %v3459_v14  ;;  %v3476_v46 = vsel %vm3460_vm13, %v3459_v14, %v3443_v57  ;;  %v3457_v20 = vpop.permute.xlu0 %3456  ;;  %4693 = vmatprep.subr.bf16.mxu1 %v8837_v23  ;;  %4765 = vmatprep.subr.bf16.mxu0 %v8838_v42  ;;  %v8860_v23 = vld [vmem:[#allocation29_spill] sm:$0xff] }
 0x8f3   : > { %v3499_v48 = vmul.f32 %v7404_v5, %v3476_v46  ;;  %v3500_v53 = vmul.f32 %v7408_v44, %v3468_v33  ;;  %v3467_v30 = vsel %vm3460_vm13, %v3441_v8, %v3457_v20  ;;  %v3475_v22 = vsel %vm3460_vm13, %v3457_v20, %v3441_v8  ;;  %v8859_v20 = vld [vmem:[#allocation58_spill] sm:$0xff] }
 0x8f4   : > { %v3497_v54 = vmul.f32 %v7404_v5, %v3475_v22  ;;  %v3498_v60 = vmul.f32 %v7408_v44, %v3467_v30  ;;  %v8842_v5 = vpack.c.bf16 %v7701_v37, %v7713_v18  ;;  %v8861_v42 = vpack.c.bf16 %v8859_v20, %v8860_v23  ;;  %v8863_v30 = vld [vmem:[#allocation27_spill] sm:$0xff] }
 0x8f5   : > { %4695 = vmatpush1.bf16.msra.mxu1 %v8839_v28  ;;  %4767 = vmatpush1.bf16.msra.mxu0 %v8840_v41  ;;  %v3735_v43 = vpop.permute.xlu1 %3734  ;;  %v8865_v28 = vld [vmem:[#allocation59_spill] sm:$0xff] }
 0x8f6   : > { %v4698_v2 = vpack.c.bf16 %v3499_v48, %v3497_v54  ;;  %v3733_v45 = vpop.permute.xlu0 %3732  ;;  %4769 = vmatprep.subr.bf16.mxu0 %v8841_v39  ;;  %v4696_v12 = vpack.c.bf16 %v3500_v53, %v3498_v60  ;;  %v8862_v53 = vld [vmem:[#allocation57_spill] sm:$0xff]  ;;  %v8864_v60 = vld [vmem:[#allocation55_spill] sm:$0xff] }
 0x8f7   : > { %v3900_v22 = vsel %vm3898_vm3, %v8863_v30, %v8862_v53  ;;  %v3908_v54 = vsel %vm3898_vm3, %v8862_v53, %v8863_v30  ;;  %v3907_v41 = vsel %vm3898_vm3, %v8865_v28, %v8864_v60  ;;  %v8895_v30 = vld [vmem:[#allocation26_spill] sm:$0xff] }
 0x8f8   : > { %4697 = vmatprep.subr.bf16.mxu1 %v4696_v12  ;;  %v3899_v12 = vsel %vm3898_vm3, %v8864_v60, %v8865_v28 }
 0x8f9   : > { %4699 = vmatpush1.bf16.msra.mxu1 %v4698_v2  ;;  %4771 = vmatpush1.bf16.msra.mxu0 %v8842_v5  ;;  %v3751_v44 = vpop.permute.xlu1 %3750  ;;  %v8867_v2 = vld [vmem:[#allocation61_spill] sm:$0xff] }
 0x8fa   : > { %v3760_v0 = vsel %vm3752_vm14, %v3735_v43, %v3751_v44  ;;  %v3768_v24 = vsel %vm3752_vm14, %v3751_v44, %v3735_v43  ;;  %v3749_v6 = vpop.permute.xlu0 %3748  ;;  %4701 = vmatprep.subr.bf16.mxu1 %v8843_v63  ;;  %4773 = vmatprep.subr.bf16.mxu0 %v8844_v25  ;;  %v8866_v43 = vld [vmem:[#allocation46_spill] sm:$0xff]  ;;  %v8872_v25 = vpack.c.bf16 %v7989_v4, %v7999_v7  ;;  %v8876_v4 = vld [vmem:[#allocation53_spill] sm:$0xff] }
 0x8fb   : > { %v3791_v19 = vmul.f32 %v7445_v50, %v3760_v0  ;;  %v3792_v18 = vmul.f32 %v7449_v58, %v3768_v24  ;;  %v3759_v37 = vsel %vm3752_vm14, %v3733_v45, %v3749_v6  ;;  %v3767_v47 = vsel %vm3752_vm14, %v3749_v6, %v3733_v45  ;;  %v8869_v24 = vld [vmem:[#allocation28_spill] sm:$0xff]  ;;  %v8875_v7 = vld [vmem:[#allocation54_spill] sm:$0xff] }
 0x8fc   : > { %v3789_v34 = vmul.f32 %v7445_v50, %v3759_v37  ;;  %v3790_v59 = vmul.f32 %v7449_v58, %v3767_v47  ;;  %v8848_v50 = vpack.c.bf16 %v7733_v35, %v7745_v3  ;;  %v8852_v35 = vld [vmem:[#allocation47_spill] sm:$0xff]  ;;  %v8868_v45 = vpack.c.bf16 %v8866_v43, %v8867_v2  ;;  %v8870_v6 = vld [vmem:[#allocation56_spill] sm:$0xff]  ;;  %v3947_v43 = vld [vmem:[%s8419_s20 + $0x40] sm:$0xff] }
 0x8fd   : > { %4703 = vmatpush1.bf16.msra.mxu1 %v8845_v13  ;;  %4775 = vmatpush1.bf16.msra.mxu0 %v8846_v29  ;;  %v3516_v52 = vpop.permute.xlu1 %3515  ;;  %v8871_v63 = vpack.c.bf16 %v8869_v24, %v8870_v6  ;;  %v3946_v6 = vld [vmem:[%s8419_s20 + $0x38] sm:$0xff] }
 0x8fe   : > { %v4778_v26 = vpack.c.bf16 %v3791_v19, %v3789_v34  ;;  %v3514_v62 = vpop.permute.xlu0 %3513  ;;  %4705 = vmatprep.subr.bf16.mxu1 %v8847_v11  ;;  %v4776_v49 = vpack.c.bf16 %v3792_v18, %v3790_v59  ;;  %v8873_v18 = vld [vmem:[#allocation32_spill] sm:$0xff]  ;;  %v8878_v11 = vld [vmem:[#allocation31_spill] sm:$0xff] }
 0x8ff   : > { %v8874_v59 = vld [vmem:[#allocation60_spill] sm:$0xff] }
 0x900   : > { %4777 = vmatprep.subr.bf16.mxu0 %v4776_v49  ;;  %v3926_v13 = vmul.f32 %v8874_v59, %v3908_v54  ;;  %v3924_v29 = vmul.f32 %v8874_v59, %v3907_v41  ;;  %v8879_v49 = vld [vmem:[#allocation62_spill] sm:$0xff]  ;;  %v8896_v54 = vld [vmem:[#allocation36_spill] sm:$0xff] }
 0x901   : > { %4707 = vmatpush1.bf16.msra.mxu1 %v8848_v50  ;;  %4779 = vmatpush1.bf16.msra.mxu0 %v4778_v26  ;;  %v3532_v58 = vpop.permute.xlu1 %3531  ;;  %v8880_v50 = vpack.c.bf16 %v8878_v11, %v8879_v49 }
 0x902   : > { %v3541_v56 = vsel %vm3533_vm15, %v3516_v52, %v3532_v58  ;;  %v3549_v36 = vsel %vm3533_vm15, %v3532_v58, %v3516_v52  ;;  %v3530_v10 = vpop.permute.xlu0 %3529  ;;  %4709 = vmatprep.subr.bf16.mxu1 %v8849_v51  ;;  %4781 = vmatprep.subr.bf16.mxu0 %v8850_v17 }
 0x903   : > { %v3572_v3 = vmul.f32 %v8851_v9, %v3549_v36  ;;  %v3573_v61 = vmul.f32 %v8852_v35, %v3541_v56  ;;  %v3540_v57 = vsel %vm3533_vm15, %v3514_v62, %v3530_v10  ;;  %v3548_v40 = vsel %vm3533_vm15, %v3530_v10, %v3514_v62  ;;  %v8881_v56 = vld [vmem:[#allocation33_spill] sm:$0xff] }
 0x904   : > { %v3570_v8 = vmul.f32 %v8851_v9, %v3548_v40  ;;  %v3571_v38 = vmul.f32 %v8852_v35, %v3540_v57  ;;  %v8877_v62 = vpack.c.bf16 %v8875_v7, %v8876_v4  ;;  %v3925_v36 = vmul.f32 %v8881_v56, %v3900_v22  ;;  %v8882_v9 = vld [vmem:[#allocation68_spill] sm:$0xff]  ;;  %v8885_v57 = vld [vmem:[#allocation19_spill] sm:$0xff]  ;;  %v8886_v40 = vld [vmem:[#allocation41_spill] sm:$0xff] }
 0x905   : > { %4711 = vmatpush1.bf16.msra.mxu1 %v8855_v21  ;;  %4783 = vmatpush1.bf16.msra.mxu0 %v8858_v27  ;;  %v3808_v14 = vpop.permute.xlu1 %3807  ;;  %v3923_v10 = vmul.f32 %v8881_v56, %v3899_v12  ;;  %v8889_v21 = vld [vmem:[#allocation63_spill] sm:$0xff] }
 0x906   : > { %v4714_v33 = vpack.c.bf16 %v3572_v3, %v3570_v8  ;;  %v3806_v46 = vpop.permute.xlu0 %3805  ;;  %4785 = vmatprep.subr.bf16.mxu0 %v8861_v42  ;;  %v4712_v48 = vpack.c.bf16 %v3573_v61, %v3571_v38  ;;  %v8883_v3 = vld [vmem:[#allocation25_spill] sm:$0xff]  ;;  %v4796_v61 = vpack.c.bf16 %v3926_v13, %v3924_v29  ;;  %v3912_v8 = vsel %vm3898_vm3, %v8886_v40, %v8885_v57  ;;  %v8887_v38 = vld [vmem:[#allocation40_spill] sm:$0xff]  ;;  %v8892_v42 = vld [vmem:[#allocation67_spill] sm:$0xff] }
 0x907   : > { %v3911_v55 = vsel %vm3898_vm3, %v8888_v15, %v8887_v38  ;;  %v8891_v16 = vpack.c.bf16 %v8889_v21, %v8890_v31  ;;  %v3934_v2 = vmul.f32 %v8874_v59, %v3912_v8  ;;  %v3939_v29 = vld [vmem:[%s8419_s20] sm:$0xff]  ;;  %v3954_v40 = vld [vmem:[%s8419_s20 + $0x78] sm:$0xff]  ;;  %v3948_v8 = vld [vmem:[%s8419_s20 + $0x48] sm:$0xff] }
 0x908   : > { %4713 = vmatprep.subr.bf16.mxu1 %v4712_v48  ;;  %v8893_v48 = vld [vmem:[#allocation22_spill] sm:$0xff]  ;;  %v3958_v38 = vld [vmem:[%s8419_s20 + $0x98] sm:$0xff]  ;;  %v3953_v15 = vld [vmem:[%s8419_s20 + $0x70] sm:$0xff] }
 0x909   : > { %4715 = vmatpush1.bf16.msra.mxu1 %v4714_v33  ;;  %4787 = vmatpush1.bf16.msra.mxu0 %v8868_v45  ;;  %v3824_v39 = vpop.permute.xlu1 %3823  ;;  %v4798_v33 = vpack.c.bf16 %v3925_v36, %v3923_v10  ;;  %v8894_v53 = vpack.c.bf16 %v8892_v42, %v8893_v48  ;;  %v3932_v45 = vmul.f32 %v8874_v59, %v3911_v55  ;;  %v3955_v57 = vld [vmem:[%s8419_s20 + $0x80] sm:$0xff] }
 0x90a   : > { %v3833_v5 = vsel %vm3825_vm2, %v3808_v14, %v3824_v39  ;;  %v3841_v44 = vsel %vm3825_vm2, %v3824_v39, %v3808_v14  ;;  %v3822_v0 = vpop.permute.xlu0 %3821  ;;  %4717 = vmatprep.subr.bf16.mxu1 %v8871_v63  ;;  %4789 = vmatprep.subr.bf16.mxu0 %v8872_v25  ;;  %v3941_v14 = vld [vmem:[%s8419_s20 + $0x10] sm:$0xff] }
 0x90b   : > { %v3864_v19 = vmul.f32 %v7527_v1, %v3833_v5  ;;  %v3865_v37 = vmul.f32 %v8873_v18, %v3841_v44  ;;  %v3832_v47 = vsel %vm3825_vm2, %v3806_v46, %v3822_v0  ;;  %v3840_v34 = vsel %vm3825_vm2, %v3822_v0, %v3806_v46  ;;  %v8897_v5 = vld [vmem:[#allocation66_spill] sm:$0xff]  ;;  %v8898_v44 = vld [vmem:[#allocation21_spill] sm:$0xff] }
 0x90c   : > { %v3862_v52 = vmul.f32 %v7527_v1, %v3832_v47  ;;  %v3863_v26 = vmul.f32 %v8873_v18, %v3840_v34  ;;  %v8884_v1 = vpack.c.bf16 %v8882_v9, %v8883_v3  ;;  %v8899_v0 = vpack.c.bf16 %v8897_v5, %v8898_v44  ;;  %v3952_v47 = vld [vmem:[%s8419_s20 + $0x68] sm:$0xff]  ;;  %v8901_v34 = vld [vmem:[#allocation34_spill] sm:$0xff]  ;;  %v3950_v3 = vld [vmem:[%s8419_s20 + $0x58] sm:$0xff] }
 0x90d   : > { %4719 = vmatpush1.bf16.msra.mxu1 %v8877_v62  ;;  %4791 = vmatpush1.bf16.msra.mxu0 %v8880_v50  ;;  %v3589_v58 = vpop.permute.xlu1 %3588  ;;  %v3956_v9 = vld [vmem:[%s8419_s20 + $0x88] sm:$0xff] }
 0x90e   : > { %v4794_v51 = vpack.c.bf16 %v3864_v19, %v3862_v52  ;;  %v3587_v17 = vpop.permute.xlu0 %3586  ;;  %4721 = vmatprep.subr.bf16.mxu1 %v8884_v1  ;;  %v4792_v35 = vpack.c.bf16 %v3865_v37, %v3863_v26  ;;  %v8900_v19 = vld [vmem:[#allocation65_spill] sm:$0xff]  ;;  %v4804_v37 = vpack.c.bf16 %v3934_v2, %v3932_v45  ;;  %v3951_v52 = vld [vmem:[%s8419_s20 + $0x60] sm:$0xff]  ;;  %v3949_v1 = vld [vmem:[%s8419_s20 + $0x50] sm:$0xff] }
 0x910   : > { %4793 = vmatprep.subr.bf16.mxu0 %v4792_v35  ;;  %v3943_v35 = vld [vmem:[%s8419_s20 + $0x20] sm:$0xff] }
 0x911   : > { %4723 = vmatpush1.bf16.msra.mxu1 %v8891_v16  ;;  %4795 = vmatpush1.bf16.msra.mxu0 %v4794_v51  ;;  %v3605_v27 = vpop.permute.xlu1 %3604  ;;  %v3957_v51 = vld [vmem:[%s8419_s20 + $0x90] sm:$0xff] }
 0x912   : > { %v3614_v46 = vsel %vm3606_vm0, %v3589_v58, %v3605_v27  ;;  %v3622_v20 = vsel %vm3606_vm0, %v3605_v27, %v3589_v58  ;;  %v3603_v23 = vpop.permute.xlu0 %3602  ;;  %4725 = vmatprep.subr.bf16.mxu1 %v8894_v53  ;;  %4797 = vmatprep.subr.bf16.mxu0 %v4796_v61  ;;  %v3945_v58 = vld [vmem:[%s8419_s20 + $0x30] sm:$0xff] }
 0x913   : > { %v3645_v22 = vmul.f32 %v8895_v30, %v3622_v20  ;;  %v3646_v60 = vmul.f32 %v8896_v54, %v3614_v46  ;;  %v3613_v28 = vsel %vm3606_vm0, %v3587_v17, %v3603_v23  ;;  %v3621_v41 = vsel %vm3606_vm0, %v3603_v23, %v3587_v17  ;;  %v8902_v17 = vld [vmem:[#allocation39_spill] sm:$0xff] }
 0x914   : > { %v3643_v39 = vmul.f32 %v8895_v30, %v3621_v41  ;;  %v3644_v12 = vmul.f32 %v8896_v54, %v3613_v28  ;;  %4149 = vmatmul.mubr.f32.vlgmr.msra.gmra.mrb[28].mxu0 %v3941_v14 }
 0x915   : > { %4727 = vmatpush1.bf16.msra.mxu1 %v8899_v0  ;;  %4799 = vmatpush1.bf16.msra.mxu0 %v4798_v33  ;;  %v3881_v24 = vpop.permute.xlu1 %3880 }
 0x916   : > { %v4730_v63 = vpack.c.bf16 %v3645_v22, %v3643_v39  ;;  %v3879_v25 = vpop.permute.xlu0 %3878  ;;  %4801 = vmatprep.subr.bf16.mxu0 %v8900_v19  ;;  %4154 = vmatprep.mubr.f32.mxu0 %v3947_v43  ;;  %v4728_v18 = vpack.c.bf16 %v3646_v60, %v3644_v12 }
 0x918   : > { %4729 = vmatprep.subr.bf16.mxu1 %v4728_v18  ;;  %4155 = vmatmul.mubr.f32.gmra.mrb[30].mxu0 %v3946_v6 }
 0x919   : > { %4731 = vmatpush1.bf16.msra.mxu1 %v4730_v63  ;;  %4803 = vmatpush1.bf16.msra.mxu0 %v8901_v34  ;;  %v3897_v13 = vpop.permute.xlu1 %3896 }
 0x91a   : > { %v3906_v26 = vsel %vm3898_vm3, %v3881_v24, %v3897_v13  ;;  %v3914_v7 = vsel %vm3898_vm3, %v3897_v13, %v3881_v24  ;;  %v3895_v4 = vpop.permute.xlu0 %3894  ;;  %4812 = vmatprep.subr.bf16.mxu1 %v4796_v61  ;;  %4805 = vmatprep.subr.bf16.mxu0 %v4804_v37  ;;  %v8903_v61 = vmov 0.0  }
 0x91b   : > { %v3937_v62 = vmul.f32 %v8881_v56, %v3906_v26  ;;  %v3938_v11 = vmul.f32 %v8874_v59, %v3914_v7  ;;  %v3905_v49 = vsel %vm3898_vm3, %v3879_v25, %v3895_v4  ;;  %v3913_v50 = vsel %vm3898_vm3, %v3895_v4, %v3879_v25  ;;  %4160 = vmatprep.mubr.f32.mxu0 %v3952_v47 }
 0x91c   : > { %v3935_v36 = vmul.f32 %v8881_v56, %v3905_v49  ;;  %v3936_v10 = vmul.f32 %v8874_v59, %v3913_v50  ;;  %4060 = vmatmul.mubr.f32.vlgmr.msra.gmra.mrb[18].mxu1 %v3939_v29  ;;  %4161 = vmatmul.mubr.f32.gmra.mrb[32].mxu0 %v3951_v52 }
 0x91d   : > { %4816 = vmatpush1.bf16.msra.mxu1 %v4798_v33  ;;  %4807 = vmatpush1.bf16.msra.mxu0 %v8902_v17 }
 0x91e   : > { %v4810_v56 = vpack.c.bf16 %v3937_v62, %v3935_v36  ;;  %4813 = vmatprep.subr.bf16.mxu1 %v8900_v19  ;;  %4065 = vmatprep.mubr.f32.mxu1 %v3945_v58  ;;  %v4808_v59 = vpack.c.bf16 %v3938_v11, %v3936_v10 }
 0x91f   : > { %4166 = vmatprep.mubr.f32.mxu0 %v3957_v51 }
 0x920   : > { %4066 = vmatmul.mubr.f32.gmra.mrb[20].mxu1 %v3944_v32  ;;  %4167 = vmatmul.mubr.f32.gmra.mrb[34].mxu0 %v3956_v9 }
 0x921   : > { %4809 = vmatprep.subr.bf16.mxu0 %v4808_v59  ;;  %4817 = vmatpush1.bf16.msra.mxu1 %v8901_v34 }
 0x922   : > { %4811 = vmatpush1.bf16.msra.mxu0 %v4810_v56  ;;  %4814 = vmatprep.subr.bf16.mxu1 %v4804_v37 }
 0x923   : > { %4071 = vmatprep.mubr.f32.mxu1 %v3950_v3  ;;  %4237 = vmatprep.mubr.f32.mxu0 %v8903_v61 }
 0x924   : > { %4072 = vmatmul.mubr.f32.gmra.mrb[22].mxu1 %v3949_v1 }
 0x925   : > { %4454 = vmatmul.mubr.msk.f32.vlgmr.msra.gmra.mrb[28].mxu0 %vm762_vm1, %v3943_v35  ;;  %4818 = vmatpush1.bf16.msra.mxu1 %v8902_v17 }
 0x926   : > { %4815 = vmatprep.subr.bf16.mxu1 %v4808_v59  ;;  %4077 = vmatprep.mubr.f32.mxu1 %v3955_v57 }
 0x927   : > { %4243 = vmatprep.mubr.f32.mxu0 %v8903_v61 }
 0x928   : > { %4078 = vmatmul.mubr.f32.gmra.mrb[24].mxu1 %v3954_v40 }
 0x929   : > { %4455 = vmatmul.mubr.msk.f32.gmra.mrb[30].mxu0 %vm762_vm1, %v3948_v8  ;;  %4819 = vmatpush1.bf16.msra.mxu1 %v4810_v56 }
 0x92a   : > { %4249 = vmatprep.mubr.f32.mxu0 %v8903_v61  ;;  %4255 = vmatprep.mubr.f32.mxu1 %v8903_v61  ;;  %v3966_v46 = vpop.permute.xlu1 %3965 }
 0x92b   : > { %v3981_v31 = vpop.permute.xlu0 %3980 }
 0x92c   : > { %4457 = vmatmul.mubr.msk.f32.vlgmr.msra.gmra.mrb[26].mxu1 %vm762_vm1, %v3958_v38 }
 0x92d   : > { %4456 = vmatmul.mubr.msk.f32.gmra.mrb[32].mxu0 %vm762_vm1, %v3953_v15 }
 0x92e   : > { %v3976_v6 = vpop.permute.xlu1 %3975 }
 0x92f   : > { %v3971_v54 = vpop.permute.xlu0 %3970 }
 0x9ef   : > { %v4061_v55 = vpop.f32.mrb[18].mxu1 }
 0x9f0   : > { %v4063_v21 = vpop.f32.mrb[19].mxu1  ;;  %v4062_v20 = vadd.f32 %v4061_v55, %v3966_v46 }
 0x9f1   : > { %v4064_v42 = vadd.f32 %v4063_v21, %v3966_v46 }
 0x9f3   : > { %v4067_v16 = vpop.f32.mrb[20].mxu1  ;;  %v4168_v27 = vpop.f32.mrb[34].mxu0 }
 0x9f4   : > { %v4069_v14 = vpop.f32.mrb[21].mxu1  ;;  %v4170_v33 = vpop.f32.mrb[35].mxu0  ;;  %v4068_v28 = vadd.f32 %v4067_v16, %v3971_v54 }
 0x9f5   : > { %v4070_v2 = vadd.f32 %v4069_v14, %v3971_v54 }
 0x9f7   : > { %v4073_v23 = vpop.f32.mrb[22].mxu1 }
 0x9f8   : > { %v4239_v48 = vpop.f32.mrb[28].mxu0  ;;  %v4075_v53 = vpop.f32.mrb[23].mxu1  ;;  %v4074_v19 = vadd.f32 %v4073_v23, %v3976_v6 }
 0x9f9   : > { %v4821_v30 = vadd.f32 %v4239_v48, %v4062_v20  ;;  %v4241_v22 = vpop.f32.mrb[29].mxu0  ;;  %v4076_v34 = vadd.f32 %v4075_v53, %v3976_v6 }
 0x9fa   : > { %v4823_v60 = vadd.f32 %v4241_v22, %v4064_v42 }
 0x9fb   : > { %v4262_v41 = vmax.f32 %v4821_v30, 0.0  ;;  %v4079_v43 = vpop.f32.mrb[24].mxu1 }
 0x9fc   : > { %v4263_v45 = vmax.f32 %v4823_v60, 0.0  ;;  %v4080_v39 = vadd.f32 %v4079_v43, %v3981_v31  ;;  %v4245_v12 = vpop.f32.mrb[30].mxu0  ;;  %v4081_v5 = vpop.f32.mrb[25].mxu1 }
 0x9fd   : > { %4270 = vst [vmem:[%s8336_s23] sm:$0xff] %v4262_v41  ;;  %v4825_v44 = vadd.f32 %v4245_v12, %v4068_v28  ;;  %v4082_v0 = vadd.f32 %v4081_v5, %v3981_v31  ;;  %v4247_v24 = vpop.f32.mrb[31].mxu0 }
 0x9fe   : > { %4271 = vst [vmem:[%s8336_s23 + $0x8] sm:$0xff] %v4263_v45  ;;  %v4827_v63 = vadd.f32 %v4247_v24, %v4070_v2  ;;  %v4169_v25 = vadd.f32 %v4168_v27, %v4080_v39 }
 0x9ff   : > { %v4264_v18 = vmax.f32 %v4825_v44, 0.0  ;;  %v4257_v37 = vpop.f32.mrb[26].mxu1  ;;  %v4171_v47 = vadd.f32 %v4170_v33, %v4082_v0 }
 0xa00   : > { %v4265_v13 = vmax.f32 %v4827_v63, 0.0  ;;  %v4251_v29 = vpop.f32.mrb[32].mxu0  ;;  %v4258_v52 = vadd.f32 %v4257_v37, %v4169_v25  ;;  %v4259_v26 = vpop.f32.mrb[27].mxu1 }
 0xa01   : > { %4272 = vst [vmem:[%s8336_s23 + $0x10] sm:$0xff] %v4264_v18  ;;  %v4829_v7 = vadd.f32 %v4251_v29, %v4074_v19  ;;  %v4253_v4 = vpop.f32.mrb[33].mxu0  ;;  %v4260_v62 = vadd.f32 %v4259_v26, %v4171_v47 }
 0xa02   : > { %4273 = vst [vmem:[%s8336_s23 + $0x18] sm:$0xff] %v4265_v13  ;;  %v4268_v11 = vmax.f32 %v4258_v52, 0.0  ;;  %v4831_v49 = vadd.f32 %v4253_v4, %v4076_v34 }
 0xa03   : > { %v4266_v50 = vmax.f32 %v4829_v7, 0.0  ;;  %v4269_v58 = vmax.f32 %v4260_v62, 0.0 }
 0xa04   : > { %4276 = vst [vmem:[%s8336_s23 + $0x30] sm:$0xff] %v4268_v11  ;;  %v4267_v36 = vmax.f32 %v4831_v49, 0.0 }
 0xa05   : > { %4274 = vst [vmem:[%s8336_s23 + $0x20] sm:$0xff] %v4266_v50  ;;  %4277 = vst [vmem:[%s8336_s23 + $0x38] sm:$0xff] %v4269_v58 }
 0xa06   : > { %4275 = vst [vmem:[%s8336_s23 + $0x28] sm:$0xff] %v4267_v36 }
 0xa07   : > { %4976 = shalt.err (!%p4973_p3)
}
 0xa08   : > { %s4977_s4 = scalar_lea.hbm %s8347_s5, 1024  ;;  %s4981_s24 = scalar_lea.hbm %s8907_s28, 2048 }
 0xa09   : > { %p4978_p4 = scmp.ne.s32.totalorder %s8347_s5, %s4977_s4  ;;  %p4982_p9 = scmp.lt.u32.totalorder %s8347_s5, %s8907_s28 }
 0xa0a   : > { %p4983_p10 = scmp.lt.u32.totalorder %s4981_s24, %s4977_s4  ;;  %p4985_p12 = scmp.lt.u32.totalorder %s4977_s4, %s8347_s5 }
 0xa0b   : > { %p4979_p7 = pnand %p4978_p4, %p5199_p5 }
 0xa0c   : > { %p4984_p11 = por %p4983_p10, %p4982_p9 }
 0xa0d   : > { %p4980_p8 = pneg %p4979_p7 }
 0xa0e   : > { %p4986_p13 = por %p4985_p12, %p4984_p11 }
 0xa10   : > { %p4987_p0 = pnand %p4986_p13, %p4980_p8 }
 0xa12   : > { %4990 = shalt.err (!%p4987_p0)
}
 0xa13   : > { %s5040_s0 = smov 256   ;;  %s8908_s25 = smov 16  }
 0xa14   : > { %4876 = dma.vmem_to_hbm [thread:$0]  (%p5199_p5), %s8350_s3, 1024, %s8347_s5, %s8357_s26, %s5040_s0, %s5040_s0, %s8908_s25  }
 0xa15 PF: > { %s8909_s30 = sld [smem:[#allocation8_spill]]  ;;  %s8910_s23 = sld [smem:[#allocation5_spill]] }
 0xa1b   : > { %p4882_p1 = scmp.ge.s32.totalorder %s8909_s30, 2  ;;  %s4307_s1 = sand.u32 1, %s8910_s23  }
 0xa1c   : > { %s4308_s4 = scalar_lea.sflag [#allocation3], %s4307_s1 }
 0xa1d   : > { %p4879_p2 = pnand %p4882_p1, %p5203_p6 }
 0xa1f   : > { %5008 = dma.done.wait (!%p4879_p2), %s4308_s4, 1024  }
 0xa20   : > { %5010 = vsyncadd (!%p4879_p2), %s4308_s4, 4294966272  ;;  %s8912_s25 = sld [smem:[#allocation10_spill]]  ;;  %s8913_s4 = sld [smem:[#allocation6_spill]] }
 0xa21   : > { %s8914_s30 = sld [smem:[#allocation7_spill]]  ;;  %s8915_s24 = sld [smem:[#allocation11_spill]] }
 0xa26   : > { %p33_p3 = scmp.ge.s32.totalorder %s8912_s25, 4  }
 0xa28   :  { %35 = sbr.rel (!%p33_p3) target bundleno = 13 (0xd), region = 153 }
 0xa2f   :  { %4313 = vsyncpa [#allocation3], 1 }
 0xa30   :  { %4315 = vsyncpa [#allocation3 + $0x1], 1 }

</bundles_post_ra>
